<compile_context>
chip_gen: v7x
topology: tpu7x:2x2x1
jax: 0.10.0
libtpu: 0.0.40
codegen_flags: <defaults>
</compile_context>

<pallas_src>
import jax
import jax.numpy as jnp
import numpy as np
from jax import lax
from jax.experimental import pallas as pl
from jax.experimental.pallas import tpu as pltpu


# ----------------------------------------------------------------------------
# in-kernel helpers
# ----------------------------------------------------------------------------
def _reflect_pad_into(dst_ref, src):
    """Write src (H, W, C) into dst_ref (H+2, W+2, C) with 1px reflection pad."""
    H, W, _ = src.shape
    src = src.astype(dst_ref.dtype)
    dst_ref[1:H + 1, 1:W + 1, :] = src
    dst_ref[0:1, 1:W + 1, :] = src[1:2]                  # top row    <- row 1
    dst_ref[H + 1:H + 2, 1:W + 1, :] = src[H - 2:H - 1]  # bottom row <- row H-2
    dst_ref[:, 0:1, :] = dst_ref[:, 2:3, :]              # left col (incl corners)
    dst_ref[:, W + 1:W + 2, :] = dst_ref[:, W - 1:W, :]  # right col (incl corners)


def _conv3x3_relu_small(pad_ref, w_ref, b_ref, H, W):
    """3x3 conv + ReLU for tiny Cin (first layer): 9 accumulating K=3 dots.

    pad_ref: (H+2, W+2, Cin) compute-dtype scratch, w_ref: (9, Cin, Cout)
    compute-dtype, b_ref: (1, Cout) f32.  Returns (H*W, Cout) f32.
    """
    Cin = pad_ref.shape[-1]
    Cout = w_ref.shape[-1]
    n = H * W
    acc = jnp.zeros((n, Cout), jnp.float32) + b_ref[...]
    for t in range(9):
        dy, dx = divmod(t, 3)
        patch = pad_ref[pl.ds(dy, H), pl.ds(dx, W), :].reshape(n, Cin)
        acc = acc + jnp.dot(patch, w_ref[t], preferred_element_type=jnp.float32)
    return jnp.maximum(acc, 0.0)


def _conv3x3_relu_paired(pad_ref, w_ref, b_ref, H, W):
    """3x3 conv + ReLU with Cin=64: operands streamed straight from the padded
    scratch into the MXU (no im2col slab).  Tap pairs are concatenated in
    registers into a 128-lane LHS so each accumulating dot has K=128
    (4 x K=128 + 1 x K=64); weight rows stay in natural tap-major order.

    pad_ref: (H+2, W+2, 64) compute-dtype, w_ref: (576, Cout) compute-dtype,
    b_ref: (1, Cout) f32.  Returns (H*W, Cout) f32.
    """
    Cin = pad_ref.shape[-1]            # 64
    Cout = w_ref.shape[-1]
    n = H * W
    acc = jnp.zeros((n, Cout), jnp.float32) + b_ref[...]

    def patch(t):
        dy, dx = divmod(t, 3)
        return pad_ref[pl.ds(dy, H), pl.ds(dx, W), :].reshape(n, Cin)

    for c in range(4):                 # taps (0,1),(2,3),(4,5),(6,7)
        lhs = jnp.concatenate([patch(2 * c), patch(2 * c + 1)], axis=-1)
        acc = acc + jnp.dot(lhs, w_ref[2 * c * Cin:(2 * c + 2) * Cin, :],
                            preferred_element_type=jnp.float32)
    acc = acc + jnp.dot(patch(8), w_ref[8 * Cin:, :],        # last tap, K=64
                        preferred_element_type=jnp.float32)
    return jnp.maximum(acc, 0.0)


# ----------------------------------------------------------------------------
# fused encoder kernel (one batch element per grid step)
# ----------------------------------------------------------------------------
def _encoder2_kernel(x_ref, w2_ref, b2_ref, w3_ref, b3_ref, w4_ref, b4_ref,
                     o_ref, xp_ref, a2p_ref, a3_ref, a4p_ref):
    H, W, _ = x_ref.shape
    Hp, Wp = H // 2, W // 2
    C = a3_ref.shape[-1]                                   # 64

    # conv1 (1x1) is already folded into w2/b2 by the wrapper.
    # ---- reflect pad input, conv2(3->64) + relu2 ----------------------------
    _reflect_pad_into(xp_ref, x_ref[...])
    a2 = _conv3x3_relu_small(xp_ref, w2_ref, b2_ref, H, W)           # (H*W, 64)

    # ---- reflect pad, conv3(64->64) + relu3 ---------------------------------
    _reflect_pad_into(a2p_ref, a2.reshape(H, W, C))
    a3 = _conv3x3_relu_paired(a2p_ref, w3_ref, b3_ref, H, W)         # (H*W, 64)
    a3_ref[...] = a3.reshape(H, W, C)

    # ---- fused 2x2 / stride-2 max pool (stays in VMEM) ----------------------
    ev = a3_ref[:, pl.ds(0, Wp, stride=2), :]            # even output columns
    od = a3_ref[:, pl.ds(1, Wp, stride=2), :]            # odd  output columns
    wmax = jnp.maximum(ev, od).reshape(Hp, 2, Wp, C)     # split H (leading dim)
    pooled = jnp.maximum(wmax[:, 0], wmax[:, 1])         # (Hp, Wp, 64)
    # TODO(synk): pool_idx from return_indices=True is discarded by the torch
    # forward, so it is not computed here.

    # ---- reflect pad, conv4(64->128) + relu4 --------------------------------
    _reflect_pad_into(a4p_ref, pooled)
    a4 = _conv3x3_relu_paired(a4p_ref, w4_ref, b4_ref, Hp, Wp)       # (HpWp,128)
    o_ref[...] = a4.reshape(Hp, Wp, -1).astype(o_ref.dtype)


# ----------------------------------------------------------------------------
# wrapper (NCHW in / NCHW out by default, exact Encoder2 forward)
# ----------------------------------------------------------------------------
def encoder2_forward(x_nchw, params, *, compute_dtype=jnp.bfloat16,
                     out_format="NCHW"):
    """compute_dtype=bf16 (default) halves MXU/DMA cost on v5e/v6e/v7x with f32
    accumulation; pass jnp.float32 for bit-tight numerics."""
    x = jnp.transpose(x_nchw, (0, 2, 3, 1)).astype(jnp.float32)      # -> NHWC
    N, H, W, Cin = x.shape
    assert Cin == 3 and H % 2 == 0 and W % 2 == 0 and H >= 4 and W >= 4
    Hp, Wp = H // 2, W // 2
    cdt = compute_dtype
    csize = jnp.dtype(cdt).itemsize

    # --- fold conv1 (1x1 pointwise) through the reflection pad into conv2 ----
    w1 = params["w1"][0, 0]                                           # (3, 3)
    w2 = params["w2"]                                                 # (3,3,3,64)
    w2f = jnp.einsum("im,yxmo->yxio", w1, w2)                         # (3,3,3,64)
    b2f = params["b2"] + jnp.einsum("m,yxmo->o", params["b1"], w2)

    # weights pre-cast/pre-reshaped once here; no per-step casts in the kernel
    w2k = w2f.reshape(9, 3, 64).astype(cdt)
    w3k = params["w3"].reshape(9 * 64, 64).astype(cdt)                # (576, 64)
    w4k = params["w4"].reshape(9 * 64, 128).astype(cdt)               # (576,128)
    b2k = b2f.reshape(1, 64).astype(jnp.float32)
    b3k = params["b3"].reshape(1, 64).astype(jnp.float32)
    b4k = params["b4"].reshape(1, 128).astype(jnp.float32)

    flops = 2 * N * (H * W * 27 * 64 + H * W * 576 * 64 + Hp * Wp * 576 * 128)
    bytes_accessed = (4 * (x.size + N * Hp * Wp * 128 + 64 + 64 + 128)
                      + csize * (w2k.size + w3k.size + w4k.size))

    # --- VMEM budget: scratches + double-buffered in/out blocks + weights ----
    scratch_bytes = ((H + 2) * (W + 2) * 3 * csize
                     + (H + 2) * (W + 2) * 64 * csize
                     + H * W * 64 * 4
                     + (Hp + 2) * (Wp + 2) * 64 * csize)
    io_bytes = 2 * (H * W * 3 * 4 + Hp * Wp * 128 * 4)
    w_bytes = 2 * ((w2k.size + w3k.size + w4k.size) * csize + (64 + 64 + 128) * 4)
    vmem_need = scratch_bytes + io_bytes + w_bytes
    vmem_limit = int(min(100 * 1024 * 1024,
                         max(32 * 1024 * 1024, 1.5 * vmem_need)))

    out_nhwc = pl.pallas_call(
        _encoder2_kernel,
        out_shape=jax.ShapeDtypeStruct((N, Hp, Wp, 128), jnp.float32),
        grid=(N,),
        in_specs=[
            pl.BlockSpec((None, H, W, 3), lambda n: (n, 0, 0, 0)),
            pl.BlockSpec((9, 3, 64), lambda n: (0, 0, 0)),
            pl.BlockSpec((1, 64), lambda n: (0, 0)),
            pl.BlockSpec((576, 64), lambda n: (0, 0)),
            pl.BlockSpec((1, 64), lambda n: (0, 0)),
            pl.BlockSpec((576, 128), lambda n: (0, 0)),
            pl.BlockSpec((1, 128), lambda n: (0, 0)),
        ],
        out_specs=pl.BlockSpec((None, Hp, Wp, 128), lambda n: (n, 0, 0, 0)),
        scratch_shapes=[
            pltpu.VMEM((H + 2, W + 2, 3), cdt),           # padded input
            pltpu.VMEM((H + 2, W + 2, 64), cdt),          # padded conv2 out
            pltpu.VMEM((H, W, 64), jnp.float32),          # conv3 out (for pool)
            pltpu.VMEM((Hp + 2, Wp + 2, 64), cdt),        # padded pooled
        ],
        compiler_params=pltpu.CompilerParams(
            dimension_semantics=("parallel",),
            vmem_limit_bytes=vmem_limit),
        cost_estimate=pl.CostEstimate(flops=flops, transcendentals=0,
                                      bytes_accessed=bytes_accessed),
    )(x, w2k, b2k, w3k, b3k, w4k, b4k)

    if out_format == "NHWC":
        return out_nhwc
    return jnp.transpose(out_nhwc, (0, 3, 1, 2))                      # -> NCHW


# ----------------------------------------------------------------------------
# Deterministic parameter init (PyTorch Conv2d shapes, transposed to HWIO)
# ----------------------------------------------------------------------------
def init_params(key):
    def conv_init(k, cin, cout, ksz):
        kw_, kb_ = jax.random.split(k)
        fan_in = cin * ksz * ksz
        bound = 1.0 / np.sqrt(fan_in)
        w = jax.random.uniform(kw_, (cout, cin, ksz, ksz), jnp.float32, -bound, bound)
        b = jax.random.uniform(kb_, (cout,), jnp.float32, -bound, bound)
        return jnp.transpose(w, (2, 3, 1, 0)), b          # (KH, KW, Cin, Cout)

    k1, k2, k3, k4 = jax.random.split(key, 4)
    w1, b1 = conv_init(k1, 3, 3, 1)       # conv1: Conv2d(3, 3, 1)
    w2, b2 = conv_init(k2, 3, 64, 3)      # conv2: Conv2d(3, 64, 3)
    w3, b3 = conv_init(k3, 64, 64, 3)     # conv3: Conv2d(64, 64, 3)
    w4, b4 = conv_init(k4, 64, 128, 3)    # conv4: Conv2d(64, 128, 3)
    return dict(w1=w1, b1=b1, w2=w2, b2=b2, w3=w3, b3=b3, w4=w4, b4=b4)


# ----------------------------------------------------------------------------
# Pure-JAX reference for verification (unfused, mirrors the torch module)
# ----------------------------------------------------------------------------
def _reflect_pad(x):
    return jnp.pad(x, ((0, 0), (1, 1), (1, 1), (0, 0)), mode="reflect")


def _ref_conv(x, w, b, relu):
    y = lax.conv_general_dilated(
        x, w, (1, 1), "VALID",
        dimension_numbers=("NHWC", "HWIO", "NHWC"),
        precision=lax.Precision.HIGHEST)
    y = y + b.reshape(1, 1, 1, -1)
    return jnp.maximum(y, 0.0) if relu else y


def _ref_maxpool(x):
    N, H, W, C = x.shape
    return jnp.max(x.reshape(N, H // 2, 2, W // 2, 2, C), axis=(2, 4))


def _ref_forward(x_nchw, params):
    x = jnp.transpose(x_nchw, (0, 2, 3, 1)).astype(jnp.float32)
    out = _ref_conv(x, params["w1"], params["b1"], relu=False)
    out = _reflect_pad(out)
    out = _ref_conv(out, params["w2"], params["b2"], relu=True)
    out = _reflect_pad(out)
    out = _ref_conv(out, params["w3"], params["b3"], relu=True)
    out = _ref_maxpool(out)
    out = _reflect_pad(out)
    out = _ref_conv(out, params["w4"], params["b4"], relu=True)
    return jnp.transpose(out, (0, 3, 1, 2))


if __name__ == "__main__":
    key = jax.random.PRNGKey(0)
    pkey, xkey = jax.random.split(key)
    params = init_params(pkey)
    x = jax.random.normal(xkey, (2, 3, 16, 16), jnp.float32)   # NCHW, like torch

    ref = jax.block_until_ready(_ref_forward(x, params))

    # f32 path: tight numerical check against the unfused reference.
    out_f32 = jax.block_until_ready(
        encoder2_forward(x, params, compute_dtype=jnp.float32))
    assert out_f32.shape == (2, 128, 8, 8), out_f32.shape
    np.testing.assert_allclose(np.asarray(out_f32), np.asarray(ref),
                               rtol=5e-3, atol=5e-3)

    # default bf16 path (f32 accumulation): looser tolerance.
    out_bf16 = jax.block_until_ready(encoder2_forward(x, params))
    assert out_bf16.shape == (2, 128, 8, 8), out_bf16.shape
    np.testing.assert_allclose(np.asarray(out_bf16), np.asarray(ref),
                               rtol=5e-2, atol=5e-2)

    print("KERNEL_OK")
</pallas_src>

<mosaic_0001>
module attributes {stable_mosaic.version = 11 : i64} {
  func.func @_encoder2_kernel(%arg0: i32, %arg1: memref<1x16x16x3xf32, #tpu.memory_space<vmem>>, %arg2: memref<9x3x64xf32, #tpu.memory_space<vmem>>, %arg3: memref<1x64xf32, #tpu.memory_space<vmem>>, %arg4: memref<576x64xf32, #tpu.memory_space<vmem>>, %arg5: memref<1x64xf32, #tpu.memory_space<vmem>>, %arg6: memref<576x128xf32, #tpu.memory_space<vmem>>, %arg7: memref<1x128xf32, #tpu.memory_space<vmem>>, %arg8: memref<1x8x8x128xf32, #tpu.memory_space<vmem>>, %arg9: memref<18x18x3xf32, #tpu.memory_space<vmem>>, %arg10: memref<18x18x64xf32, #tpu.memory_space<vmem>>, %arg11: memref<16x16x64xf32, #tpu.memory_space<vmem>>, %arg12: memref<10x10x64xf32, #tpu.memory_space<vmem>>) attributes {dimension_semantics = [#tpu.dimension_semantics<parallel>], iteration_bounds = array<i64: 2>, scalar_prefetch = 0 : i64, scratch_operands = 4 : i64, tpu.core_type = #tpu.core_type<tc>, window_params = [{transform_indices = @transform_0, window_bounds = array<i64: 1, 16, 16, 3>}, {pipeline_mode = #tpu.pipeline_mode<synchronous>, transform_indices = @transform_1, window_bounds = array<i64: 9, 3, 64>}, {pipeline_mode = #tpu.pipeline_mode<synchronous>, transform_indices = @transform_2, window_bounds = array<i64: 1, 64>}, {pipeline_mode = #tpu.pipeline_mode<synchronous>, transform_indices = @transform_3, window_bounds = array<i64: 576, 64>}, {pipeline_mode = #tpu.pipeline_mode<synchronous>, transform_indices = @transform_4, window_bounds = array<i64: 1, 64>}, {pipeline_mode = #tpu.pipeline_mode<synchronous>, transform_indices = @transform_5, window_bounds = array<i64: 576, 128>}, {pipeline_mode = #tpu.pipeline_mode<synchronous>, transform_indices = @transform_6, window_bounds = array<i64: 1, 128>}, {transform_indices = @transform_7, window_bounds = array<i64: 1, 8, 8, 128>}]} {
    %c0 = arith.constant 0 : index
    %c0_0 = arith.constant 0 : index
    %c0_1 = arith.constant 0 : index
    %c0_2 = arith.constant 0 : index
    %0 = vector.load %arg1[%c0, %c0_0, %c0_1, %c0_2] : memref<1x16x16x3xf32, #tpu.memory_space<vmem>>, vector<1x16x16x3xf32>
    %1 = vector.shape_cast %0 : vector<1x16x16x3xf32> to vector<16x16x3xf32>
    %c1 = arith.constant 1 : index
    %c1_3 = arith.constant 1 : index
    %c0_4 = arith.constant 0 : index
    %2 = vector.load %arg9[%c1, %c1_3, %c0_4] : memref<18x18x3xf32, #tpu.memory_space<vmem>>, vector<16x16x3xf32>
    tpu.vector_store %arg9[%c1, %c1_3, %c0_4], %1 {strides = array<i32>} : memref<18x18x3xf32, #tpu.memory_space<vmem>>, vector<16x16x3xf32>,
    %3 = vector.extract_strided_slice %1 {offsets = [1, 0, 0], sizes = [1, 16, 3], strides = [1, 1, 1]} : vector<16x16x3xf32> to vector<1x16x3xf32>
    %c0_5 = arith.constant 0 : index
    %c1_6 = arith.constant 1 : index
    %c0_7 = arith.constant 0 : index
    %4 = vector.load %arg9[%c0_5, %c1_6, %c0_7] : memref<18x18x3xf32, #tpu.memory_space<vmem>>, vector<1x16x3xf32>
    tpu.vector_store %arg9[%c0_5, %c1_6, %c0_7], %3 {strides = array<i32>} : memref<18x18x3xf32, #tpu.memory_space<vmem>>, vector<1x16x3xf32>,
    %5 = vector.extract_strided_slice %1 {offsets = [14, 0, 0], sizes = [1, 16, 3], strides = [1, 1, 1]} : vector<16x16x3xf32> to vector<1x16x3xf32>
    %c17 = arith.constant 17 : index
    %c1_8 = arith.constant 1 : index
    %c0_9 = arith.constant 0 : index
    %6 = vector.load %arg9[%c17, %c1_8, %c0_9] : memref<18x18x3xf32, #tpu.memory_space<vmem>>, vector<1x16x3xf32>
    tpu.vector_store %arg9[%c17, %c1_8, %c0_9], %5 {strides = array<i32>} : memref<18x18x3xf32, #tpu.memory_space<vmem>>, vector<1x16x3xf32>,
    %c0_10 = arith.constant 0 : index
    %c2 = arith.constant 2 : index
    %c0_11 = arith.constant 0 : index
    %7 = vector.load %arg9[%c0_10, %c2, %c0_11] : memref<18x18x3xf32, #tpu.memory_space<vmem>>, vector<18x1x3xf32>
    %c0_12 = arith.constant 0 : index
    %c0_13 = arith.constant 0 : index
    %c0_14 = arith.constant 0 : index
    %8 = vector.load %arg9[%c0_12, %c0_13, %c0_14] : memref<18x18x3xf32, #tpu.memory_space<vmem>>, vector<18x1x3xf32>
    tpu.vector_store %arg9[%c0_12, %c0_13, %c0_14], %7 {strides = array<i32>} : memref<18x18x3xf32, #tpu.memory_space<vmem>>, vector<18x1x3xf32>,
    %c0_15 = arith.constant 0 : index
    %c15 = arith.constant 15 : index
    %c0_16 = arith.constant 0 : index
    %9 = vector.load %arg9[%c0_15, %c15, %c0_16] : memref<18x18x3xf32, #tpu.memory_space<vmem>>, vector<18x1x3xf32>
    %c0_17 = arith.constant 0 : index
    %c17_18 = arith.constant 17 : index
    %c0_19 = arith.constant 0 : index
    %10 = vector.load %arg9[%c0_17, %c17_18, %c0_19] : memref<18x18x3xf32, #tpu.memory_space<vmem>>, vector<18x1x3xf32>
    tpu.vector_store %arg9[%c0_17, %c17_18, %c0_19], %9 {strides = array<i32>} : memref<18x18x3xf32, #tpu.memory_space<vmem>>, vector<18x1x3xf32>,
    %cst = arith.constant 0.000000e+00 : f32
    %11 = vector.broadcast %cst : f32 to vector<256x64xf32>
    %c0_20 = arith.constant 0 : index
    %c0_21 = arith.constant 0 : index
    %12 = vector.load %arg3[%c0_20, %c0_21] : memref<1x64xf32, #tpu.memory_space<vmem>>, vector<1x64xf32>
    %13 = vector.broadcast %12 : vector<1x64xf32> to vector<256x64xf32>
    %14 = arith.addf %11, %13 : vector<256x64xf32>
    %c0_22 = arith.constant 0 : index
    %c0_23 = arith.constant 0 : index
    %c0_24 = arith.constant 0 : index
    %15 = vector.load %arg9[%c0_22, %c0_23, %c0_24] : memref<18x18x3xf32, #tpu.memory_space<vmem>>, vector<16x16x3xf32>
    %16 = vector.shape_cast %15 : vector<16x16x3xf32> to vector<256x3xf32>
    %c0_25 = arith.constant 0 : index
    %c0_26 = arith.constant 0 : index
    %c0_27 = arith.constant 0 : index
    %17 = vector.load %arg2[%c0_25, %c0_26, %c0_27] : memref<9x3x64xf32, #tpu.memory_space<vmem>>, vector<1x3x64xf32>
    %18 = vector.shape_cast %17 : vector<1x3x64xf32> to vector<3x64xf32>
    %cst_28 = arith.constant dense<0.000000e+00> : vector<256x64xf32>
    %19 = tpu.matmul %16, %18, %cst_28 {dimension_numbers = #tpu.dot_dimension_numbers<[1], [0], [0], [1], [0, 0, 1, 1], [], []>} : vector<256x3xf32>, vector<3x64xf32>, vector<256x64xf32> -> vector<256x64xf32>
    %20 = arith.addf %14, %19 : vector<256x64xf32>
    %c0_29 = arith.constant 0 : index
    %c1_30 = arith.constant 1 : index
    %c0_31 = arith.constant 0 : index
    %21 = vector.load %arg9[%c0_29, %c1_30, %c0_31] : memref<18x18x3xf32, #tpu.memory_space<vmem>>, vector<16x16x3xf32>
    %22 = vector.shape_cast %21 : vector<16x16x3xf32> to vector<256x3xf32>
    %c1_32 = arith.constant 1 : index
    %c0_33 = arith.constant 0 : index
    %c0_34 = arith.constant 0 : index
    %23 = vector.load %arg2[%c1_32, %c0_33, %c0_34] : memref<9x3x64xf32, #tpu.memory_space<vmem>>, vector<1x3x64xf32>
    %24 = vector.shape_cast %23 : vector<1x3x64xf32> to vector<3x64xf32>
    %cst_35 = arith.constant dense<0.000000e+00> : vector<256x64xf32>
    %25 = tpu.matmul %22, %24, %cst_35 {dimension_numbers = #tpu.dot_dimension_numbers<[1], [0], [0], [1], [0, 0, 1, 1], [], []>} : vector<256x3xf32>, vector<3x64xf32>, vector<256x64xf32> -> vector<256x64xf32>
    %26 = arith.addf %20, %25 : vector<256x64xf32>
    %c0_36 = arith.constant 0 : index
    %c2_37 = arith.constant 2 : index
    %c0_38 = arith.constant 0 : index
    %27 = vector.load %arg9[%c0_36, %c2_37, %c0_38] : memref<18x18x3xf32, #tpu.memory_space<vmem>>, vector<16x16x3xf32>
    %28 = vector.shape_cast %27 : vector<16x16x3xf32> to vector<256x3xf32>
    %c2_39 = arith.constant 2 : index
    %c0_40 = arith.constant 0 : index
    %c0_41 = arith.constant 0 : index
    %29 = vector.load %arg2[%c2_39, %c0_40, %c0_41] : memref<9x3x64xf32, #tpu.memory_space<vmem>>, vector<1x3x64xf32>
    %30 = vector.shape_cast %29 : vector<1x3x64xf32> to vector<3x64xf32>
    %cst_42 = arith.constant dense<0.000000e+00> : vector<256x64xf32>
    %31 = tpu.matmul %28, %30, %cst_42 {dimension_numbers = #tpu.dot_dimension_numbers<[1], [0], [0], [1], [0, 0, 1, 1], [], []>} : vector<256x3xf32>, vector<3x64xf32>, vector<256x64xf32> -> vector<256x64xf32>
    %32 = arith.addf %26, %31 : vector<256x64xf32>
    %c1_43 = arith.constant 1 : index
    %c0_44 = arith.constant 0 : index
    %c0_45 = arith.constant 0 : index
    %33 = vector.load %arg9[%c1_43, %c0_44, %c0_45] : memref<18x18x3xf32, #tpu.memory_space<vmem>>, vector<16x16x3xf32>
    %34 = vector.shape_cast %33 : vector<16x16x3xf32> to vector<256x3xf32>
    %c3 = arith.constant 3 : index
    %c0_46 = arith.constant 0 : index
    %c0_47 = arith.constant 0 : index
    %35 = vector.load %arg2[%c3, %c0_46, %c0_47] : memref<9x3x64xf32, #tpu.memory_space<vmem>>, vector<1x3x64xf32>
    %36 = vector.shape_cast %35 : vector<1x3x64xf32> to vector<3x64xf32>
    %cst_48 = arith.constant dense<0.000000e+00> : vector<256x64xf32>
    %37 = tpu.matmul %34, %36, %cst_48 {dimension_numbers = #tpu.dot_dimension_numbers<[1], [0], [0], [1], [0, 0, 1, 1], [], []>} : vector<256x3xf32>, vector<3x64xf32>, vector<256x64xf32> -> vector<256x64xf32>
    %38 = arith.addf %32, %37 : vector<256x64xf32>
    %c1_49 = arith.constant 1 : index
    %c1_50 = arith.constant 1 : index
    %c0_51 = arith.constant 0 : index
    %39 = vector.load %arg9[%c1_49, %c1_50, %c0_51] : memref<18x18x3xf32, #tpu.memory_space<vmem>>, vector<16x16x3xf32>
    %40 = vector.shape_cast %39 : vector<16x16x3xf32> to vector<256x3xf32>
    %c4 = arith.constant 4 : index
    %c0_52 = arith.constant 0 : index
    %c0_53 = arith.constant 0 : index
    %41 = vector.load %arg2[%c4, %c0_52, %c0_53] : memref<9x3x64xf32, #tpu.memory_space<vmem>>, vector<1x3x64xf32>
    %42 = vector.shape_cast %41 : vector<1x3x64xf32> to vector<3x64xf32>
    %cst_54 = arith.constant dense<0.000000e+00> : vector<256x64xf32>
    %43 = tpu.matmul %40, %42, %cst_54 {dimension_numbers = #tpu.dot_dimension_numbers<[1], [0], [0], [1], [0, 0, 1, 1], [], []>} : vector<256x3xf32>, vector<3x64xf32>, vector<256x64xf32> -> vector<256x64xf32>
    %44 = arith.addf %38, %43 : vector<256x64xf32>
    %c1_55 = arith.constant 1 : index
    %c2_56 = arith.constant 2 : index
    %c0_57 = arith.constant 0 : index
    %45 = vector.load %arg9[%c1_55, %c2_56, %c0_57] : memref<18x18x3xf32, #tpu.memory_space<vmem>>, vector<16x16x3xf32>
    %46 = vector.shape_cast %45 : vector<16x16x3xf32> to vector<256x3xf32>
    %c5 = arith.constant 5 : index
    %c0_58 = arith.constant 0 : index
    %c0_59 = arith.constant 0 : index
    %47 = vector.load %arg2[%c5, %c0_58, %c0_59] : memref<9x3x64xf32, #tpu.memory_space<vmem>>, vector<1x3x64xf32>
    %48 = vector.shape_cast %47 : vector<1x3x64xf32> to vector<3x64xf32>
    %cst_60 = arith.constant dense<0.000000e+00> : vector<256x64xf32>
    %49 = tpu.matmul %46, %48, %cst_60 {dimension_numbers = #tpu.dot_dimension_numbers<[1], [0], [0], [1], [0, 0, 1, 1], [], []>} : vector<256x3xf32>, vector<3x64xf32>, vector<256x64xf32> -> vector<256x64xf32>
    %50 = arith.addf %44, %49 : vector<256x64xf32>
    %c2_61 = arith.constant 2 : index
    %c0_62 = arith.constant 0 : index
    %c0_63 = arith.constant 0 : index
    %51 = vector.load %arg9[%c2_61, %c0_62, %c0_63] : memref<18x18x3xf32, #tpu.memory_space<vmem>>, vector<16x16x3xf32>
    %52 = vector.shape_cast %51 : vector<16x16x3xf32> to vector<256x3xf32>
    %c6 = arith.constant 6 : index
    %c0_64 = arith.constant 0 : index
    %c0_65 = arith.constant 0 : index
    %53 = vector.load %arg2[%c6, %c0_64, %c0_65] : memref<9x3x64xf32, #tpu.memory_space<vmem>>, vector<1x3x64xf32>
    %54 = vector.shape_cast %53 : vector<1x3x64xf32> to vector<3x64xf32>
    %cst_66 = arith.constant dense<0.000000e+00> : vector<256x64xf32>
    %55 = tpu.matmul %52, %54, %cst_66 {dimension_numbers = #tpu.dot_dimension_numbers<[1], [0], [0], [1], [0, 0, 1, 1], [], []>} : vector<256x3xf32>, vector<3x64xf32>, vector<256x64xf32> -> vector<256x64xf32>
    %56 = arith.addf %50, %55 : vector<256x64xf32>
    %c2_67 = arith.constant 2 : index
    %c1_68 = arith.constant 1 : index
    %c0_69 = arith.constant 0 : index
    %57 = vector.load %arg9[%c2_67, %c1_68, %c0_69] : memref<18x18x3xf32, #tpu.memory_space<vmem>>, vector<16x16x3xf32>
    %58 = vector.shape_cast %57 : vector<16x16x3xf32> to vector<256x3xf32>
    %c7 = arith.constant 7 : index
    %c0_70 = arith.constant 0 : index
    %c0_71 = arith.constant 0 : index
    %59 = vector.load %arg2[%c7, %c0_70, %c0_71] : memref<9x3x64xf32, #tpu.memory_space<vmem>>, vector<1x3x64xf32>
    %60 = vector.shape_cast %59 : vector<1x3x64xf32> to vector<3x64xf32>
    %cst_72 = arith.constant dense<0.000000e+00> : vector<256x64xf32>
    %61 = tpu.matmul %58, %60, %cst_72 {dimension_numbers = #tpu.dot_dimension_numbers<[1], [0], [0], [1], [0, 0, 1, 1], [], []>} : vector<256x3xf32>, vector<3x64xf32>, vector<256x64xf32> -> vector<256x64xf32>
    %62 = arith.addf %56, %61 : vector<256x64xf32>
    %c2_73 = arith.constant 2 : index
    %c2_74 = arith.constant 2 : index
    %c0_75 = arith.constant 0 : index
    %63 = vector.load %arg9[%c2_73, %c2_74, %c0_75] : memref<18x18x3xf32, #tpu.memory_space<vmem>>, vector<16x16x3xf32>
    %64 = vector.shape_cast %63 : vector<16x16x3xf32> to vector<256x3xf32>
    %c8 = arith.constant 8 : index
    %c0_76 = arith.constant 0 : index
    %c0_77 = arith.constant 0 : index
    %65 = vector.load %arg2[%c8, %c0_76, %c0_77] : memref<9x3x64xf32, #tpu.memory_space<vmem>>, vector<1x3x64xf32>
    %66 = vector.shape_cast %65 : vector<1x3x64xf32> to vector<3x64xf32>
    %cst_78 = arith.constant dense<0.000000e+00> : vector<256x64xf32>
    %67 = tpu.matmul %64, %66, %cst_78 {dimension_numbers = #tpu.dot_dimension_numbers<[1], [0], [0], [1], [0, 0, 1, 1], [], []>} : vector<256x3xf32>, vector<3x64xf32>, vector<256x64xf32> -> vector<256x64xf32>
    %68 = arith.addf %62, %67 : vector<256x64xf32>
    %cst_79 = arith.constant 0.000000e+00 : f32
    %69 = vector.broadcast %cst_79 : f32 to vector<256x64xf32>
    %70 = arith.maximumf %68, %69 : vector<256x64xf32>
    %71 = vector.shape_cast %70 : vector<256x64xf32> to vector<16x16x64xf32>
    %c1_80 = arith.constant 1 : index
    %c1_81 = arith.constant 1 : index
    %c0_82 = arith.constant 0 : index
    %72 = vector.load %arg10[%c1_80, %c1_81, %c0_82] : memref<18x18x64xf32, #tpu.memory_space<vmem>>, vector<16x16x64xf32>
    tpu.vector_store %arg10[%c1_80, %c1_81, %c0_82], %71 {strides = array<i32>} : memref<18x18x64xf32, #tpu.memory_space<vmem>>, vector<16x16x64xf32>,
    %73 = vector.extract_strided_slice %71 {offsets = [1, 0, 0], sizes = [1, 16, 64], strides = [1, 1, 1]} : vector<16x16x64xf32> to vector<1x16x64xf32>
    %c0_83 = arith.constant 0 : index
    %c1_84 = arith.constant 1 : index
    %c0_85 = arith.constant 0 : index
    %74 = vector.load %arg10[%c0_83, %c1_84, %c0_85] : memref<18x18x64xf32, #tpu.memory_space<vmem>>, vector<1x16x64xf32>
    tpu.vector_store %arg10[%c0_83, %c1_84, %c0_85], %73 {strides = array<i32>} : memref<18x18x64xf32, #tpu.memory_space<vmem>>, vector<1x16x64xf32>,
    %75 = vector.extract_strided_slice %71 {offsets = [14, 0, 0], sizes = [1, 16, 64], strides = [1, 1, 1]} : vector<16x16x64xf32> to vector<1x16x64xf32>
    %c17_86 = arith.constant 17 : index
    %c1_87 = arith.constant 1 : index
    %c0_88 = arith.constant 0 : index
    %76 = vector.load %arg10[%c17_86, %c1_87, %c0_88] : memref<18x18x64xf32, #tpu.memory_space<vmem>>, vector<1x16x64xf32>
    tpu.vector_store %arg10[%c17_86, %c1_87, %c0_88], %75 {strides = array<i32>} : memref<18x18x64xf32, #tpu.memory_space<vmem>>, vector<1x16x64xf32>,
    %c0_89 = arith.constant 0 : index
    %c2_90 = arith.constant 2 : index
    %c0_91 = arith.constant 0 : index
    %77 = vector.load %arg10[%c0_89, %c2_90, %c0_91] : memref<18x18x64xf32, #tpu.memory_space<vmem>>, vector<18x1x64xf32>
    %c0_92 = arith.constant 0 : index
    %c0_93 = arith.constant 0 : index
    %c0_94 = arith.constant 0 : index
    %78 = vector.load %arg10[%c0_92, %c0_93, %c0_94] : memref<18x18x64xf32, #tpu.memory_space<vmem>>, vector<18x1x64xf32>
    tpu.vector_store %arg10[%c0_92, %c0_93, %c0_94], %77 {strides = array<i32>} : memref<18x18x64xf32, #tpu.memory_space<vmem>>, vector<18x1x64xf32>,
    %c0_95 = arith.constant 0 : index
    %c15_96 = arith.constant 15 : index
    %c0_97 = arith.constant 0 : index
    %79 = vector.load %arg10[%c0_95, %c15_96, %c0_97] : memref<18x18x64xf32, #tpu.memory_space<vmem>>, vector<18x1x64xf32>
    %c0_98 = arith.constant 0 : index
    %c17_99 = arith.constant 17 : index
    %c0_100 = arith.constant 0 : index
    %80 = vector.load %arg10[%c0_98, %c17_99, %c0_100] : memref<18x18x64xf32, #tpu.memory_space<vmem>>, vector<18x1x64xf32>
    tpu.vector_store %arg10[%c0_98, %c17_99, %c0_100], %79 {strides = array<i32>} : memref<18x18x64xf32, #tpu.memory_space<vmem>>, vector<18x1x64xf32>,
    %cst_101 = arith.constant 0.000000e+00 : f32
    %81 = vector.broadcast %cst_101 : f32 to vector<256x64xf32>
    %c0_102 = arith.constant 0 : index
    %c0_103 = arith.constant 0 : index
    %82 = vector.load %arg5[%c0_102, %c0_103] : memref<1x64xf32, #tpu.memory_space<vmem>>, vector<1x64xf32>
    %83 = vector.broadcast %82 : vector<1x64xf32> to vector<256x64xf32>
    %84 = arith.addf %81, %83 : vector<256x64xf32>
    %c0_104 = arith.constant 0 : index
    %c0_105 = arith.constant 0 : index
    %c0_106 = arith.constant 0 : index
    %85 = vector.load %arg10[%c0_104, %c0_105, %c0_106] : memref<18x18x64xf32, #tpu.memory_space<vmem>>, vector<16x16x64xf32>
    %86 = vector.shape_cast %85 : vector<16x16x64xf32> to vector<256x64xf32>
    %c0_107 = arith.constant 0 : index
    %c1_108 = arith.constant 1 : index
    %c0_109 = arith.constant 0 : index
    %87 = vector.load %arg10[%c0_107, %c1_108, %c0_109] : memref<18x18x64xf32, #tpu.memory_space<vmem>>, vector<16x16x64xf32>
    %88 = vector.shape_cast %87 : vector<16x16x64xf32> to vector<256x64xf32>
    %89 = tpu.concatenate %86, %88 in 1 : vector<256x64xf32>, vector<256x64xf32> -> vector<256x128xf32>
    %c0_110 = arith.constant 0 : index
    %c0_111 = arith.constant 0 : index
    %90 = vector.load %arg4[%c0_110, %c0_111] : memref<576x64xf32, #tpu.memory_space<vmem>>, vector<128x64xf32>
    %cst_112 = arith.constant dense<0.000000e+00> : vector<256x64xf32>
    %91 = tpu.matmul %89, %90, %cst_112 {dimension_numbers = #tpu.dot_dimension_numbers<[1], [0], [0], [1], [0, 0, 1, 1], [], []>} : vector<256x128xf32>, vector<128x64xf32>, vector<256x64xf32> -> vector<256x64xf32>
    %92 = arith.addf %84, %91 : vector<256x64xf32>
    %c0_113 = arith.constant 0 : index
    %c2_114 = arith.constant 2 : index
    %c0_115 = arith.constant 0 : index
    %93 = vector.load %arg10[%c0_113, %c2_114, %c0_115] : memref<18x18x64xf32, #tpu.memory_space<vmem>>, vector<16x16x64xf32>
    %94 = vector.shape_cast %93 : vector<16x16x64xf32> to vector<256x64xf32>
    %c1_116 = arith.constant 1 : index
    %c0_117 = arith.constant 0 : index
    %c0_118 = arith.constant 0 : index
    %95 = vector.load %arg10[%c1_116, %c0_117, %c0_118] : memref<18x18x64xf32, #tpu.memory_space<vmem>>, vector<16x16x64xf32>
    %96 = vector.shape_cast %95 : vector<16x16x64xf32> to vector<256x64xf32>
    %97 = tpu.concatenate %94, %96 in 1 : vector<256x64xf32>, vector<256x64xf32> -> vector<256x128xf32>
    %c128 = arith.constant 128 : index
    %c0_119 = arith.constant 0 : index
    %98 = vector.load %arg4[%c128, %c0_119] : memref<576x64xf32, #tpu.memory_space<vmem>>, vector<128x64xf32>
    %cst_120 = arith.constant dense<0.000000e+00> : vector<256x64xf32>
    %99 = tpu.matmul %97, %98, %cst_120 {dimension_numbers = #tpu.dot_dimension_numbers<[1], [0], [0], [1], [0, 0, 1, 1], [], []>} : vector<256x128xf32>, vector<128x64xf32>, vector<256x64xf32> -> vector<256x64xf32>
    %100 = arith.addf %92, %99 : vector<256x64xf32>
    %c1_121 = arith.constant 1 : index
    %c1_122 = arith.constant 1 : index
    %c0_123 = arith.constant 0 : index
    %101 = vector.load %arg10[%c1_121, %c1_122, %c0_123] : memref<18x18x64xf32, #tpu.memory_space<vmem>>, vector<16x16x64xf32>
    %102 = vector.shape_cast %101 : vector<16x16x64xf32> to vector<256x64xf32>
    %c1_124 = arith.constant 1 : index
    %c2_125 = arith.constant 2 : index
    %c0_126 = arith.constant 0 : index
    %103 = vector.load %arg10[%c1_124, %c2_125, %c0_126] : memref<18x18x64xf32, #tpu.memory_space<vmem>>, vector<16x16x64xf32>
    %104 = vector.shape_cast %103 : vector<16x16x64xf32> to vector<256x64xf32>
    %105 = tpu.concatenate %102, %104 in 1 : vector<256x64xf32>, vector<256x64xf32> -> vector<256x128xf32>
    %c256 = arith.constant 256 : index
    %c0_127 = arith.constant 0 : index
    %106 = vector.load %arg4[%c256, %c0_127] : memref<576x64xf32, #tpu.memory_space<vmem>>, vector<128x64xf32>
    %cst_128 = arith.constant dense<0.000000e+00> : vector<256x64xf32>
    %107 = tpu.matmul %105, %106, %cst_128 {dimension_numbers = #tpu.dot_dimension_numbers<[1], [0], [0], [1], [0, 0, 1, 1], [], []>} : vector<256x128xf32>, vector<128x64xf32>, vector<256x64xf32> -> vector<256x64xf32>
    %108 = arith.addf %100, %107 : vector<256x64xf32>
    %c2_129 = arith.constant 2 : index
    %c0_130 = arith.constant 0 : index
    %c0_131 = arith.constant 0 : index
    %109 = vector.load %arg10[%c2_129, %c0_130, %c0_131] : memref<18x18x64xf32, #tpu.memory_space<vmem>>, vector<16x16x64xf32>
    %110 = vector.shape_cast %109 : vector<16x16x64xf32> to vector<256x64xf32>
    %c2_132 = arith.constant 2 : index
    %c1_133 = arith.constant 1 : index
    %c0_134 = arith.constant 0 : index
    %111 = vector.load %arg10[%c2_132, %c1_133, %c0_134] : memref<18x18x64xf32, #tpu.memory_space<vmem>>, vector<16x16x64xf32>
    %112 = vector.shape_cast %111 : vector<16x16x64xf32> to vector<256x64xf32>
    %113 = tpu.concatenate %110, %112 in 1 : vector<256x64xf32>, vector<256x64xf32> -> vector<256x128xf32>
    %c384 = arith.constant 384 : index
    %c0_135 = arith.constant 0 : index
    %114 = vector.load %arg4[%c384, %c0_135] : memref<576x64xf32, #tpu.memory_space<vmem>>, vector<128x64xf32>
    %cst_136 = arith.constant dense<0.000000e+00> : vector<256x64xf32>
    %115 = tpu.matmul %113, %114, %cst_136 {dimension_numbers = #tpu.dot_dimension_numbers<[1], [0], [0], [1], [0, 0, 1, 1], [], []>} : vector<256x128xf32>, vector<128x64xf32>, vector<256x64xf32> -> vector<256x64xf32>
    %116 = arith.addf %108, %115 : vector<256x64xf32>
    %c2_137 = arith.constant 2 : index
    %c2_138 = arith.constant 2 : index
    %c0_139 = arith.constant 0 : index
    %117 = vector.load %arg10[%c2_137, %c2_138, %c0_139] : memref<18x18x64xf32, #tpu.memory_space<vmem>>, vector<16x16x64xf32>
    %118 = vector.shape_cast %117 : vector<16x16x64xf32> to vector<256x64xf32>
    %c512 = arith.constant 512 : index
    %c0_140 = arith.constant 0 : index
    %119 = vector.load %arg4[%c512, %c0_140] : memref<576x64xf32, #tpu.memory_space<vmem>>, vector<64x64xf32>
    %cst_141 = arith.constant dense<0.000000e+00> : vector<256x64xf32>
    %120 = tpu.matmul %118, %119, %cst_141 {dimension_numbers = #tpu.dot_dimension_numbers<[1], [0], [0], [1], [0, 0, 1, 1], [], []>} : vector<256x64xf32>, vector<64x64xf32>, vector<256x64xf32> -> vector<256x64xf32>
    %121 = arith.addf %116, %120 : vector<256x64xf32>
    %cst_142 = arith.constant 0.000000e+00 : f32
    %122 = vector.broadcast %cst_142 : f32 to vector<256x64xf32>
    %123 = arith.maximumf %121, %122 : vector<256x64xf32>
    %124 = vector.shape_cast %123 : vector<256x64xf32> to vector<16x16x64xf32>
    %c0_143 = arith.constant 0 : index
    %c0_144 = arith.constant 0 : index
    %c0_145 = arith.constant 0 : index
    %125 = vector.load %arg11[%c0_143, %c0_144, %c0_145] : memref<16x16x64xf32, #tpu.memory_space<vmem>>, vector<16x16x64xf32>
    tpu.vector_store %arg11[%c0_143, %c0_144, %c0_145], %124 {strides = array<i32>} : memref<16x16x64xf32, #tpu.memory_space<vmem>>, vector<16x16x64xf32>,
    %c0_146 = arith.constant 0 : index
    %c0_147 = arith.constant 0 : index
    %c0_148 = arith.constant 0 : index
    %126 = tpu.strided_load %arg11[%c0_146, %c0_147, %c0_148] {strides = array<i32: 1, 2, 1>} : memref<16x16x64xf32, #tpu.memory_space<vmem>>, vector<16x8x64xf32>
    %c0_149 = arith.constant 0 : index
    %c1_150 = arith.constant 1 : index
    %c0_151 = arith.constant 0 : index
    %127 = tpu.strided_load %arg11[%c0_149, %c1_150, %c0_151] {strides = array<i32: 1, 2, 1>} : memref<16x16x64xf32, #tpu.memory_space<vmem>>, vector<16x8x64xf32>
    %128 = arith.maximumf %126, %127 : vector<16x8x64xf32>
    %129 = vector.shape_cast %128 : vector<16x8x64xf32> to vector<8x2x8x64xf32>
    %130 = vector.extract_strided_slice %129 {offsets = [0, 0, 0, 0], sizes = [8, 1, 8, 64], strides = [1, 1, 1, 1]} : vector<8x2x8x64xf32> to vector<8x1x8x64xf32>
    %131 = vector.shape_cast %130 : vector<8x1x8x64xf32> to vector<8x8x64xf32>
    %132 = vector.extract_strided_slice %129 {offsets = [0, 1, 0, 0], sizes = [8, 1, 8, 64], strides = [1, 1, 1, 1]} : vector<8x2x8x64xf32> to vector<8x1x8x64xf32>
    %133 = vector.shape_cast %132 : vector<8x1x8x64xf32> to vector<8x8x64xf32>
    %134 = arith.maximumf %131, %133 : vector<8x8x64xf32>
    %c1_152 = arith.constant 1 : index
    %c1_153 = arith.constant 1 : index
    %c0_154 = arith.constant 0 : index
    %135 = vector.load %arg12[%c1_152, %c1_153, %c0_154] : memref<10x10x64xf32, #tpu.memory_space<vmem>>, vector<8x8x64xf32>
    tpu.vector_store %arg12[%c1_152, %c1_153, %c0_154], %134 {strides = array<i32>} : memref<10x10x64xf32, #tpu.memory_space<vmem>>, vector<8x8x64xf32>,
    %136 = vector.extract_strided_slice %134 {offsets = [1, 0, 0], sizes = [1, 8, 64], strides = [1, 1, 1]} : vector<8x8x64xf32> to vector<1x8x64xf32>
    %c0_155 = arith.constant 0 : index
    %c1_156 = arith.constant 1 : index
    %c0_157 = arith.constant 0 : index
    %137 = vector.load %arg12[%c0_155, %c1_156, %c0_157] : memref<10x10x64xf32, #tpu.memory_space<vmem>>, vector<1x8x64xf32>
    tpu.vector_store %arg12[%c0_155, %c1_156, %c0_157], %136 {strides = array<i32>} : memref<10x10x64xf32, #tpu.memory_space<vmem>>, vector<1x8x64xf32>,
    %138 = vector.extract_strided_slice %134 {offsets = [6, 0, 0], sizes = [1, 8, 64], strides = [1, 1, 1]} : vector<8x8x64xf32> to vector<1x8x64xf32>
    %c9 = arith.constant 9 : index
    %c1_158 = arith.constant 1 : index
    %c0_159 = arith.constant 0 : index
    %139 = vector.load %arg12[%c9, %c1_158, %c0_159] : memref<10x10x64xf32, #tpu.memory_space<vmem>>, vector<1x8x64xf32>
    tpu.vector_store %arg12[%c9, %c1_158, %c0_159], %138 {strides = array<i32>} : memref<10x10x64xf32, #tpu.memory_space<vmem>>, vector<1x8x64xf32>,
    %c0_160 = arith.constant 0 : index
    %c2_161 = arith.constant 2 : index
    %c0_162 = arith.constant 0 : index
    %140 = vector.load %arg12[%c0_160, %c2_161, %c0_162] : memref<10x10x64xf32, #tpu.memory_space<vmem>>, vector<10x1x64xf32>
    %c0_163 = arith.constant 0 : index
    %c0_164 = arith.constant 0 : index
    %c0_165 = arith.constant 0 : index
    %141 = vector.load %arg12[%c0_163, %c0_164, %c0_165] : memref<10x10x64xf32, #tpu.memory_space<vmem>>, vector<10x1x64xf32>
    tpu.vector_store %arg12[%c0_163, %c0_164, %c0_165], %140 {strides = array<i32>} : memref<10x10x64xf32, #tpu.memory_space<vmem>>, vector<10x1x64xf32>,
    %c0_166 = arith.constant 0 : index
    %c7_167 = arith.constant 7 : index
    %c0_168 = arith.constant 0 : index
    %142 = vector.load %arg12[%c0_166, %c7_167, %c0_168] : memref<10x10x64xf32, #tpu.memory_space<vmem>>, vector<10x1x64xf32>
    %c0_169 = arith.constant 0 : index
    %c9_170 = arith.constant 9 : index
    %c0_171 = arith.constant 0 : index
    %143 = vector.load %arg12[%c0_169, %c9_170, %c0_171] : memref<10x10x64xf32, #tpu.memory_space<vmem>>, vector<10x1x64xf32>
    tpu.vector_store %arg12[%c0_169, %c9_170, %c0_171], %142 {strides = array<i32>} : memref<10x10x64xf32, #tpu.memory_space<vmem>>, vector<10x1x64xf32>,
    %cst_172 = arith.constant 0.000000e+00 : f32
    %144 = vector.broadcast %cst_172 : f32 to vector<64x128xf32>
    %c0_173 = arith.constant 0 : index
    %c0_174 = arith.constant 0 : index
    %145 = vector.load %arg7[%c0_173, %c0_174] : memref<1x128xf32, #tpu.memory_space<vmem>>, vector<1x128xf32>
    %146 = vector.broadcast %145 : vector<1x128xf32> to vector<64x128xf32>
    %147 = arith.addf %144, %146 : vector<64x128xf32>
    %c0_175 = arith.constant 0 : index
    %c0_176 = arith.constant 0 : index
    %c0_177 = arith.constant 0 : index
    %148 = vector.load %arg12[%c0_175, %c0_176, %c0_177] : memref<10x10x64xf32, #tpu.memory_space<vmem>>, vector<8x8x64xf32>
    %149 = vector.shape_cast %148 : vector<8x8x64xf32> to vector<64x64xf32>
    %c0_178 = arith.constant 0 : index
    %c1_179 = arith.constant 1 : index
    %c0_180 = arith.constant 0 : index
    %150 = vector.load %arg12[%c0_178, %c1_179, %c0_180] : memref<10x10x64xf32, #tpu.memory_space<vmem>>, vector<8x8x64xf32>
    %151 = vector.shape_cast %150 : vector<8x8x64xf32> to vector<64x64xf32>
    %152 = tpu.concatenate %149, %151 in 1 : vector<64x64xf32>, vector<64x64xf32> -> vector<64x128xf32>
    %c0_181 = arith.constant 0 : index
    %c0_182 = arith.constant 0 : index
    %153 = vector.load %arg6[%c0_181, %c0_182] : memref<576x128xf32, #tpu.memory_space<vmem>>, vector<128x128xf32>
    %cst_183 = arith.constant dense<0.000000e+00> : vector<64x128xf32>
    %154 = tpu.matmul %152, %153, %cst_183 {dimension_numbers = #tpu.dot_dimension_numbers<[1], [0], [0], [1], [0, 0, 1, 1], [], []>} : vector<64x128xf32>, vector<128x128xf32>, vector<64x128xf32> -> vector<64x128xf32>
    %155 = arith.addf %147, %154 : vector<64x128xf32>
    %c0_184 = arith.constant 0 : index
    %c2_185 = arith.constant 2 : index
    %c0_186 = arith.constant 0 : index
    %156 = vector.load %arg12[%c0_184, %c2_185, %c0_186] : memref<10x10x64xf32, #tpu.memory_space<vmem>>, vector<8x8x64xf32>
    %157 = vector.shape_cast %156 : vector<8x8x64xf32> to vector<64x64xf32>
    %c1_187 = arith.constant 1 : index
    %c0_188 = arith.constant 0 : index
    %c0_189 = arith.constant 0 : index
    %158 = vector.load %arg12[%c1_187, %c0_188, %c0_189] : memref<10x10x64xf32, #tpu.memory_space<vmem>>, vector<8x8x64xf32>
    %159 = vector.shape_cast %158 : vector<8x8x64xf32> to vector<64x64xf32>
    %160 = tpu.concatenate %157, %159 in 1 : vector<64x64xf32>, vector<64x64xf32> -> vector<64x128xf32>
    %c128_190 = arith.constant 128 : index
    %c0_191 = arith.constant 0 : index
    %161 = vector.load %arg6[%c128_190, %c0_191] : memref<576x128xf32, #tpu.memory_space<vmem>>, vector<128x128xf32>
    %cst_192 = arith.constant dense<0.000000e+00> : vector<64x128xf32>
    %162 = tpu.matmul %160, %161, %cst_192 {dimension_numbers = #tpu.dot_dimension_numbers<[1], [0], [0], [1], [0, 0, 1, 1], [], []>} : vector<64x128xf32>, vector<128x128xf32>, vector<64x128xf32> -> vector<64x128xf32>
    %163 = arith.addf %155, %162 : vector<64x128xf32>
    %c1_193 = arith.constant 1 : index
    %c1_194 = arith.constant 1 : index
    %c0_195 = arith.constant 0 : index
    %164 = vector.load %arg12[%c1_193, %c1_194, %c0_195] : memref<10x10x64xf32, #tpu.memory_space<vmem>>, vector<8x8x64xf32>
    %165 = vector.shape_cast %164 : vector<8x8x64xf32> to vector<64x64xf32>
    %c1_196 = arith.constant 1 : index
    %c2_197 = arith.constant 2 : index
    %c0_198 = arith.constant 0 : index
    %166 = vector.load %arg12[%c1_196, %c2_197, %c0_198] : memref<10x10x64xf32, #tpu.memory_space<vmem>>, vector<8x8x64xf32>
    %167 = vector.shape_cast %166 : vector<8x8x64xf32> to vector<64x64xf32>
    %168 = tpu.concatenate %165, %167 in 1 : vector<64x64xf32>, vector<64x64xf32> -> vector<64x128xf32>
    %c256_199 = arith.constant 256 : index
    %c0_200 = arith.constant 0 : index
    %169 = vector.load %arg6[%c256_199, %c0_200] : memref<576x128xf32, #tpu.memory_space<vmem>>, vector<128x128xf32>
    %cst_201 = arith.constant dense<0.000000e+00> : vector<64x128xf32>
    %170 = tpu.matmul %168, %169, %cst_201 {dimension_numbers = #tpu.dot_dimension_numbers<[1], [0], [0], [1], [0, 0, 1, 1], [], []>} : vector<64x128xf32>, vector<128x128xf32>, vector<64x128xf32> -> vector<64x128xf32>
    %171 = arith.addf %163, %170 : vector<64x128xf32>
    %c2_202 = arith.constant 2 : index
    %c0_203 = arith.constant 0 : index
    %c0_204 = arith.constant 0 : index
    %172 = vector.load %arg12[%c2_202, %c0_203, %c0_204] : memref<10x10x64xf32, #tpu.memory_space<vmem>>, vector<8x8x64xf32>
    %173 = vector.shape_cast %172 : vector<8x8x64xf32> to vector<64x64xf32>
    %c2_205 = arith.constant 2 : index
    %c1_206 = arith.constant 1 : index
    %c0_207 = arith.constant 0 : index
    %174 = vector.load %arg12[%c2_205, %c1_206, %c0_207] : memref<10x10x64xf32, #tpu.memory_space<vmem>>, vector<8x8x64xf32>
    %175 = vector.shape_cast %174 : vector<8x8x64xf32> to vector<64x64xf32>
    %176 = tpu.concatenate %173, %175 in 1 : vector<64x64xf32>, vector<64x64xf32> -> vector<64x128xf32>
    %c384_208 = arith.constant 384 : index
    %c0_209 = arith.constant 0 : index
    %177 = vector.load %arg6[%c384_208, %c0_209] : memref<576x128xf32, #tpu.memory_space<vmem>>, vector<128x128xf32>
    %cst_210 = arith.constant dense<0.000000e+00> : vector<64x128xf32>
    %178 = tpu.matmul %176, %177, %cst_210 {dimension_numbers = #tpu.dot_dimension_numbers<[1], [0], [0], [1], [0, 0, 1, 1], [], []>} : vector<64x128xf32>, vector<128x128xf32>, vector<64x128xf32> -> vector<64x128xf32>
    %179 = arith.addf %171, %178 : vector<64x128xf32>
    %c2_211 = arith.constant 2 : index
    %c2_212 = arith.constant 2 : index
    %c0_213 = arith.constant 0 : index
    %180 = vector.load %arg12[%c2_211, %c2_212, %c0_213] : memref<10x10x64xf32, #tpu.memory_space<vmem>>, vector<8x8x64xf32>
    %181 = vector.shape_cast %180 : vector<8x8x64xf32> to vector<64x64xf32>
    %c512_214 = arith.constant 512 : index
    %c0_215 = arith.constant 0 : index
    %182 = vector.load %arg6[%c512_214, %c0_215] : memref<576x128xf32, #tpu.memory_space<vmem>>, vector<64x128xf32>
    %cst_216 = arith.constant dense<0.000000e+00> : vector<64x128xf32>
    %183 = tpu.matmul %181, %182, %cst_216 {dimension_numbers = #tpu.dot_dimension_numbers<[1], [0], [0], [1], [0, 0, 1, 1], [], []>} : vector<64x64xf32>, vector<64x128xf32>, vector<64x128xf32> -> vector<64x128xf32>
    %184 = arith.addf %179, %183 : vector<64x128xf32>
    %cst_217 = arith.constant 0.000000e+00 : f32
    %185 = vector.broadcast %cst_217 : f32 to vector<64x128xf32>
    %186 = arith.maximumf %184, %185 : vector<64x128xf32>
    %187 = vector.shape_cast %186 : vector<64x128xf32> to vector<8x8x128xf32>
    %c0_218 = arith.constant 0 : index
    %c0_219 = arith.constant 0 : index
    %c0_220 = arith.constant 0 : index
    %c0_221 = arith.constant 0 : index
    %188 = vector.load %arg8[%c0_218, %c0_219, %c0_220, %c0_221] : memref<1x8x8x128xf32, #tpu.memory_space<vmem>>, vector<1x8x8x128xf32>
    %189 = vector.shape_cast %188 : vector<1x8x8x128xf32> to vector<8x8x128xf32>
    %190 = vector.shape_cast %187 : vector<8x8x128xf32> to vector<1x8x8x128xf32>
    tpu.vector_store %arg8[%c0_218, %c0_219, %c0_220, %c0_221], %190 {strides = array<i32>} : memref<1x8x8x128xf32, #tpu.memory_space<vmem>>, vector<1x8x8x128xf32>,
    return
  }
  func.func @transform_0(%arg0: i32) -> (i32, i32, i32, i32) {
    %c0_i32 = arith.constant 0 : i32
    %c0_i32_0 = arith.constant 0 : i32
    %c0_i32_1 = arith.constant 0 : i32
    %c0_i32_2 = arith.constant 0 : i32
    return %arg0, %c0_i32, %c0_i32_0, %c0_i32_1 : i32, i32, i32, i32
  }
  func.func @transform_1(%arg0: i32) -> (i32, i32, i32) {
    %c0_i32 = arith.constant 0 : i32
    %c0_i32_0 = arith.constant 0 : i32
    %c0_i32_1 = arith.constant 0 : i32
    %c0_i32_2 = arith.constant 0 : i32
    return %c0_i32, %c0_i32_0, %c0_i32_1 : i32, i32, i32
  }
  func.func @transform_2(%arg0: i32) -> (i32, i32) {
    %c0_i32 = arith.constant 0 : i32
    %c0_i32_0 = arith.constant 0 : i32
    %c0_i32_1 = arith.constant 0 : i32
    return %c0_i32, %c0_i32_0 : i32, i32
  }
  func.func @transform_3(%arg0: i32) -> (i32, i32) {
    %c0_i32 = arith.constant 0 : i32
    %c0_i32_0 = arith.constant 0 : i32
    %c0_i32_1 = arith.constant 0 : i32
    return %c0_i32, %c0_i32_0 : i32, i32
  }
  func.func @transform_4(%arg0: i32) -> (i32, i32) {
    %c0_i32 = arith.constant 0 : i32
    %c0_i32_0 = arith.constant 0 : i32
    %c0_i32_1 = arith.constant 0 : i32
    return %c0_i32, %c0_i32_0 : i32, i32
  }
  func.func @transform_5(%arg0: i32) -> (i32, i32) {
    %c0_i32 = arith.constant 0 : i32
    %c0_i32_0 = arith.constant 0 : i32
    %c0_i32_1 = arith.constant 0 : i32
    return %c0_i32, %c0_i32_0 : i32, i32
  }
  func.func @transform_6(%arg0: i32) -> (i32, i32) {
    %c0_i32 = arith.constant 0 : i32
    %c0_i32_0 = arith.constant 0 : i32
    %c0_i32_1 = arith.constant 0 : i32
    return %c0_i32, %c0_i32_0 : i32, i32
  }
  func.func @transform_7(%arg0: i32) -> (i32, i32, i32, i32) {
    %c0_i32 = arith.constant 0 : i32
    %c0_i32_0 = arith.constant 0 : i32
    %c0_i32_1 = arith.constant 0 : i32
    %c0_i32_2 = arith.constant 0 : i32
    return %arg0, %c0_i32, %c0_i32_0, %c0_i32_1 : i32, i32, i32, i32
  }
}

</mosaic_0001>

<bundles_post_ra>
// kernel: tpu_custom_call.1
= control target key start
LH: loop header
LB: loop body
LE: loop exit
PB: predicated region body
PF: predicated region fallthrough
CT: control target
= control target key end

     0   :  { %12 = vsyncpa [#allocation7], 0  ;;  %s13521_s0 = inlined_call_operand.vmem [shape: f32[2,16,16,3], index: 0, kind: input, shape index: {}]   ;;  %s13522_s1 = inlined_call_operand.vmem [shape: f32[9,3,64], index: 1, kind: input, shape index: {}]   ;;  %s13523_s2 = inlined_call_operand.vmem [shape: f32[1,64], index: 2, kind: input, shape index: {}]   ;;  %s13524_s3 = inlined_call_operand.vmem [shape: f32[576,64], index: 3, kind: input, shape index: {}]   ;;  %s13525_s4 = inlined_call_operand.vmem [shape: f32[1,64], index: 4, kind: input, shape index: {}]   ;;  %s13526_s5 = inlined_call_operand.vmem [shape: f32[576,128], index: 5, kind: input, shape index: {}]   ;;  %s13527_s6 = inlined_call_operand.vmem [shape: f32[1,128], index: 6, kind: input, shape index: {}]   ;;  %s13528_s7 = inlined_call_operand.hbm [shape: f32[2,8,8,128], index: 7, kind: output, shape index: {}]  }
   0x1   :  { %14 = vsyncpa [#allocation7 + $0x1], 0  ;;  %s11038_s24 = smov 0   ;;  %s11040_s25 = smov 0  }
   0x2   :  { %s11042_s26 = smov 0   ;;  %s11044_s27 = smov 0  }
   0x3 LB: > { %s11059_s28 = sadd.s32 4294967295, %s10992_s27   ;;  %s7671_s29 = sadd.s32 4294967294, %s10992_s27   ;;  %s10992_s27 = sphi %s11044_s27, %s13742_s27   ;;  %s10988_s26 = sphi %s11042_s26, %s13741_s26   ;;  %s10984_s25 = sphi %s11040_s25, %s13740_s25   ;;  %s10980_s24 = sphi %s11038_s24, %s13739_s24  }
   0x4   : > { %s11063_s30 = sadd.s32 1, %s10992_s27   ;;  %s179_s8 = sadd.s32 1, %s10988_s26 }
   0x5   : > { %s176_s9 = ssub.s32 %s10992_s27, %s11063_s30  ;;  %p189_p0 = scmp.ne.s32.totalorder %s10988_s26, %s10984_s25 }
   0x6   : > { %p177_p1 = scmp.eq.s32.totalorder %s176_s9, 0  ;;  %p190_p2 = scmp.eq.s32.totalorder %s11059_s28, 1 }
   0x7   : > { %p195_p3 = scmp.ne.s32.totalorder %s10984_s25, %s10980_s24  ;;  %p196_p4 = scmp.eq.s32.totalorder %s7671_s29, 1 }
   0x8   : > { %s11074_s10 = scalar_select %p177_p1, %s10988_s26, %s179_s8  }
   0x9   : > { %p11076_p5 = por %p190_p2, %p189_p0  ;;  %p11080_p6 = por %p196_p4, %p195_p3 }
   0xa   : > { %p7674_p7 = scmp.ge.s32.totalorder %s10992_s27, 1  ;;  %p240_p8 = scmp.lt.s32.totalorder %s10992_s27, 3 }
   0xc   : > { %p241_p9 = pnand %p7674_p7, %p240_p8 }
   0xe   : > { %244 = sbr.rel (%p241_p9) target bundleno = 1834 (0x72a), region = 48 }
  0x15   : > { %vm558_vm0 = vcmask 1042432   ;;  %v7712_v0 = vld [vmem:[%s13522_s1 + $0x4] sm:$0x7]  ;;  %p272_p10 = scmp.lt.s32.totalorder %s11059_s28, 1  ;;  %v11094_v1 = vld [vmem:[%s13522_s1 + $0x8] sm:$0x7] }
  0x16   : > { %8724 = vmatprep.subr.msk.mxu0 %vm558_vm0, %v7712_v0  ;;  %vm310_vm1 = vcmask 23552   ;;  %v11161_v29 = vld [vmem:[%s13522_s1 + $0xc] sm:$0x7]  ;;  %vm366_vm2 = vcmask 16384   ;;  %vm3973_vm3 = vcmask 523264   ;;  %vm4029_vm4 = vcmask 516096  }
  0x17   : > { %8725 = vmatpush3.msk.msra.mxu0 %vm558_vm0, %v7712_v0  ;;  %s273_s17 = scalar_select %p272_p10, %s11059_s28, 1 }
  0x18   : > { %8774 = vmatprep.subr.msk.mxu0 %vm558_vm0, %v11094_v1  ;;  %s8032_s23 = sshll.u32 %s11059_s28, 10  ;;  %s10995_s14 = smov [#allocation6]  }
  0x19   : > { %s8031_s18 = sshll.u32 %s273_s17, 8  ;;  %s269_s17 = sand.u32 1, %s10984_s25  }
  0x1a   : > { %s11103_s21 = scalar_lea.vmem %s13521_s0, %s8031_s18  ;;  %s10994_s18 = smov 64  }
  0x1b   : > { %v279_v2 = vld [vmem:[%s11103_s21 + $0x10] sm:$0xff]  ;;  %v280_v3 = vld [vmem:[%s11103_s21 + $0x18] sm:$0xff]  ;;  %v277_v4 = vld [vmem:[%s11103_s21] sm:$0xff]  ;;  %s13474_s9 = scalar_lea.hbm %s13528_s7, %s8032_s23  ;;  %s13480_s28 = scalar_lea.sflag [#allocation7], %s269_s17 }
  0x1c   : > { %313 = vst.msk [vmem:[#allocation2 + $0x31] sm:$0xff] %vm310_vm1, %v279_v2  ;;  %343 = vst.msk [vmem:[#allocation2 + $0x1] sm:$0xff] %vm310_vm1, %v279_v2  ;;  %v278_v5 = vld [vmem:[%s11103_s21 + $0x8] sm:$0xff]  ;;  %v281_v6 = vld [vmem:[%s11103_s21 + $0x20] sm:$0xff]  ;;  %s10934_s15 = sshll.u32 %s10995_s14, 4  ;;  %s10935_s15 = int_to_ptr.vmem [resolvable:$false] %s10934_s15 }
  0x1d   : > { %344 = vst.msk [vmem:[#allocation2 + $0x9] sm:$0xff] %vm310_vm1, %v280_v3  ;;  %314 = vst.msk [vmem:[#allocation2 + $0x39] sm:$0xff] %vm310_vm1, %v280_v3  ;;  %v282_v7 = vld [vmem:[%s11103_s21 + $0x28] sm:$0xff]  ;;  %v283_v8 = vld [vmem:[%s11103_s21 + $0x30] sm:$0xff]  ;;  %s10936_s16 = scalar_lea.vmem %s10935_s15, 2048 }
  0x1e   : > { %311 = vst.msk [vmem:[#allocation2 + $0x19] sm:$0xff] %vm310_vm1, %v277_v4  ;;  %312 = vst.msk [vmem:[#allocation2 + $0x21] sm:$0xff] %vm310_vm1, %v278_v5  ;;  %v284_v9 = vld [vmem:[%s11103_s21 + $0x38] sm:$0xff]  ;;  %v285_v10 = vld [vmem:[%s11103_s21 + $0x40] sm:$0xff] }
  0x1f   : > { %315 = vst.msk [vmem:[#allocation2 + $0x49] sm:$0xff] %vm310_vm1, %v281_v6  ;;  %316 = vst.msk [vmem:[#allocation2 + $0x51] sm:$0xff] %vm310_vm1, %v282_v7  ;;  %v286_v11 = vld [vmem:[%s11103_s21 + $0x48] sm:$0xff]  ;;  %v287_v12 = vld [vmem:[%s11103_s21 + $0x50] sm:$0xff] }
  0x20   : > { %317 = vst.msk [vmem:[#allocation2 + $0x61] sm:$0xff] %vm310_vm1, %v283_v8  ;;  %318 = vst.msk [vmem:[#allocation2 + $0x69] sm:$0xff] %vm310_vm1, %v284_v9  ;;  %v288_v13 = vld [vmem:[%s11103_s21 + $0x58] sm:$0xff]  ;;  %v289_v14 = vld [vmem:[%s11103_s21 + $0x60] sm:$0xff] }
  0x21   : > { %319 = vst.msk [vmem:[#allocation2 + $0x79] sm:$0xff] %vm310_vm1, %v285_v10  ;;  %320 = vst.msk [vmem:[#allocation2 + $0x81] sm:$0xff] %vm310_vm1, %v286_v11  ;;  %v290_v15 = vld [vmem:[%s11103_s21 + $0x68] sm:$0xff]  ;;  %v291_v16 = vld [vmem:[%s11103_s21 + $0x70] sm:$0xff] }
  0x22   : > { %321 = vst.msk [vmem:[#allocation2 + $0x91] sm:$0xff] %vm310_vm1, %v287_v12  ;;  %322 = vst.msk [vmem:[#allocation2 + $0x99] sm:$0xff] %vm310_vm1, %v288_v13  ;;  %v292_v17 = vld [vmem:[%s11103_s21 + $0x78] sm:$0xff]  ;;  %v293_v18 = vld [vmem:[%s11103_s21 + $0x80] sm:$0xff] }
  0x23   : > { %323 = vst.msk [vmem:[#allocation2 + $0xa9] sm:$0xff] %vm310_vm1, %v289_v14  ;;  %324 = vst.msk [vmem:[#allocation2 + $0xb1] sm:$0xff] %vm310_vm1, %v290_v15  ;;  %v294_v19 = vld [vmem:[%s11103_s21 + $0x88] sm:$0xff]  ;;  %v295_v20 = vld [vmem:[%s11103_s21 + $0x90] sm:$0xff] }
  0x24   : > { %325 = vst.msk [vmem:[#allocation2 + $0xc1] sm:$0xff] %vm310_vm1, %v291_v16  ;;  %326 = vst.msk [vmem:[#allocation2 + $0xc9] sm:$0xff] %vm310_vm1, %v292_v17  ;;  %v296_v21 = vld [vmem:[%s11103_s21 + $0x98] sm:$0xff]  ;;  %v297_v22 = vld [vmem:[%s11103_s21 + $0xa0] sm:$0xff] }
  0x25   : > { %327 = vst.msk [vmem:[#allocation2 + $0xd9] sm:$0xff] %vm310_vm1, %v293_v18  ;;  %328 = vst.msk [vmem:[#allocation2 + $0xe1] sm:$0xff] %vm310_vm1, %v294_v19  ;;  %v298_v23 = vld [vmem:[%s11103_s21 + $0xa8] sm:$0xff]  ;;  %v299_v24 = vld [vmem:[%s11103_s21 + $0xb0] sm:$0xff] }
  0x26   : > { %329 = vst.msk [vmem:[#allocation2 + $0xf1] sm:$0xff] %vm310_vm1, %v295_v20  ;;  %330 = vst.msk [vmem:[#allocation2 + $0xf9] sm:$0xff] %vm310_vm1, %v296_v21  ;;  %v300_v25 = vld [vmem:[%s11103_s21 + $0xb8] sm:$0xff]  ;;  %v819_v26 = vld [vmem:[#allocation2 + $0x1] sm:$0xff] }
  0x27   : > { %331 = vst.msk [vmem:[#allocation2 + $0x109] sm:$0xff] %vm310_vm1, %v297_v22  ;;  %v820_v27 = vld [vmem:[#allocation2 + $0x9] sm:$0xff]  ;;  %v11152_v28 = vld [vmem:[#allocation2 + $0x19] sm:$0xff]  ;;  %332 = vst.msk [vmem:[#allocation2 + $0x111] sm:$0xff] %vm310_vm1, %v298_v23  ;;  %8726 = vmatprep.mubr.msk.f32.mxu0 %vm310_vm1, %v819_v26 }
  0x28   : > { %333 = vst.msk [vmem:[#allocation2 + $0x121] sm:$0xff] %vm310_vm1, %v299_v24  ;;  %334 = vst.msk [vmem:[#allocation2 + $0x129] sm:$0xff] %vm310_vm1, %v300_v25  ;;  %8727 = vmatmul.mubr.msk.f32.vlgmr.msra.gmra.mrb[0].mxu0 %vm310_vm1, %v820_v27  ;;  %v11168_v30 = vld [vmem:[#allocation2 + $0x21] sm:$0xff]  ;;  %v11170_v31 = vld [vmem:[#allocation2 + $0x31] sm:$0xff] }
  0x29   : > { %8775 = vmatpush3.msk.msra.mxu0 %vm558_vm0, %v11094_v1  ;;  %8729 = vmatprep.mubr.msk.f32.mxu0 %vm310_vm1, %v11152_v28  ;;  %v11178_v32 = vld [vmem:[#allocation2 + $0x39] sm:$0xff]  ;;  %v11180_v33 = vld [vmem:[#allocation2 + $0x49] sm:$0xff]  ;;  %v11196_v40 = vld [vmem:[#allocation2 + $0x51] sm:$0xff] }
  0x2a   : > { %8824 = vmatprep.subr.msk.mxu0 %vm558_vm0, %v11161_v29  ;;  %v301_v34 = vld [vmem:[%s11103_s21 + $0xc0] sm:$0xff]  ;;  %v302_v35 = vld [vmem:[%s11103_s21 + $0xc8] sm:$0xff]  ;;  %v303_v36 = vld [vmem:[%s11103_s21 + $0xd0] sm:$0xff] }
  0x2b   : > { %335 = vst.msk [vmem:[#allocation2 + $0x139] sm:$0xff] %vm310_vm1, %v301_v34  ;;  %v304_v37 = vld [vmem:[%s11103_s21 + $0xd8] sm:$0xff]  ;;  %336 = vst.msk [vmem:[#allocation2 + $0x141] sm:$0xff] %vm310_vm1, %v302_v35  ;;  %v305_v38 = vld [vmem:[%s11103_s21 + $0xe0] sm:$0xff] }
  0x2c   : > { %8730 = vmatmul.mubr.msk.f32.gmra.mrb[2].mxu0 %vm310_vm1, %v11168_v30  ;;  %337 = vst.msk [vmem:[#allocation2 + $0x151] sm:$0xff] %vm310_vm1, %v303_v36  ;;  %338 = vst.msk [vmem:[#allocation2 + $0x159] sm:$0xff] %vm310_vm1, %v304_v37  ;;  %v306_v39 = vld [vmem:[%s11103_s21 + $0xe8] sm:$0xff]  ;;  %v386_v42 = vld [vmem:[#allocation2 + $0x27] sm:$0x1] }
  0x2d   : > { %8732 = vmatprep.mubr.msk.f32.mxu0 %vm310_vm1, %v11170_v31  ;;  %339 = vst.msk [vmem:[#allocation2 + $0x169] sm:$0xff] %vm310_vm1, %v305_v38  ;;  %346 = vst.msk [vmem:[#allocation2 + $0x199] sm:$0xff] %vm310_vm1, %v305_v38  ;;  %v385_v41 = vld [vmem:[#allocation2 + $0xf] sm:$0x1]  ;;  %v11202_v43 = vld [vmem:[#allocation2 + $0x61] sm:$0xff] }
  0x2e   : > { %340 = vst.msk [vmem:[#allocation2 + $0x171] sm:$0xff] %vm310_vm1, %v306_v39  ;;  %347 = vst.msk [vmem:[#allocation2 + $0x1a1] sm:$0xff] %vm310_vm1, %v306_v39  ;;  %v387_v44 = vld [vmem:[#allocation2 + $0x3f] sm:$0x1]  ;;  %v388_v45 = vld [vmem:[#allocation2 + $0x57] sm:$0x1] }
  0x2f   : > { %403 = vst.msk [vmem:[#allocation2 + $0x11] sm:$0x1] %vm366_vm2, %v385_v41  ;;  %404 = vst.msk [vmem:[#allocation2 + $0x29] sm:$0x1] %vm366_vm2, %v386_v42  ;;  %v389_v46 = vld [vmem:[#allocation2 + $0x6f] sm:$0x1] }
  0x30   : > { %8733 = vmatmul.mubr.msk.f32.gmra.mrb[4].mxu0 %vm310_vm1, %v11178_v32  ;;  %405 = vst.msk [vmem:[#allocation2 + $0x41] sm:$0x1] %vm366_vm2, %v387_v44  ;;  %406 = vst.msk [vmem:[#allocation2 + $0x59] sm:$0x1] %vm366_vm2, %v388_v45  ;;  %v390_v47 = vld [vmem:[#allocation2 + $0x87] sm:$0x1] }
  0x31   : > { %8735 = vmatprep.mubr.msk.f32.mxu0 %vm310_vm1, %v11180_v33  ;;  %407 = vst.msk [vmem:[#allocation2 + $0x71] sm:$0x1] %vm366_vm2, %v389_v46  ;;  %v11213_v48 = vld [vmem:[#allocation2 + $0x69] sm:$0xff]  ;;  %408 = vst.msk [vmem:[#allocation2 + $0x89] sm:$0x1] %vm366_vm2, %v390_v47  ;;  %v11216_v51 = vld [vmem:[#allocation2 + $0x79] sm:$0xff] }
  0x32   : > { %v391_v49 = vld [vmem:[#allocation2 + $0x9f] sm:$0x1]  ;;  %v392_v50 = vld [vmem:[#allocation2 + $0xb7] sm:$0x1]  ;;  %v393_v52 = vld [vmem:[#allocation2 + $0xcf] sm:$0x1] }
  0x33   : > { %409 = vst.msk [vmem:[#allocation2 + $0xa1] sm:$0x1] %vm366_vm2, %v391_v49  ;;  %410 = vst.msk [vmem:[#allocation2 + $0xb9] sm:$0x1] %vm366_vm2, %v392_v50  ;;  %v11225_v53 = vld [vmem:[#allocation2 + $0x81] sm:$0xff]  ;;  %v11227_v55 = vld [vmem:[#allocation2 + $0x91] sm:$0xff] }
  0x34   : > { %8736 = vmatmul.mubr.msk.f32.gmra.mrb[6].mxu0 %vm310_vm1, %v11196_v40  ;;  %411 = vst.msk [vmem:[#allocation2 + $0xd1] sm:$0x1] %vm366_vm2, %v393_v52  ;;  %v394_v54 = vld [vmem:[#allocation2 + $0xe7] sm:$0x1]  ;;  %v395_v56 = vld [vmem:[#allocation2 + $0xff] sm:$0x1] }
  0x35   : > { %8738 = vmatprep.mubr.msk.f32.mxu0 %vm310_vm1, %v11202_v43  ;;  %412 = vst.msk [vmem:[#allocation2 + $0xe9] sm:$0x1] %vm366_vm2, %v394_v54  ;;  %413 = vst.msk [vmem:[#allocation2 + $0x101] sm:$0x1] %vm366_vm2, %v395_v56  ;;  %v396_v57 = vld [vmem:[#allocation2 + $0x117] sm:$0x1] }
  0x36   : > { %v11235_v58 = vld [vmem:[#allocation2 + $0x99] sm:$0xff]  ;;  %414 = vst.msk [vmem:[#allocation2 + $0x119] sm:$0x1] %vm366_vm2, %v396_v57  ;;  %v397_v59 = vld [vmem:[#allocation2 + $0x12f] sm:$0x1]  ;;  %v11247_v1 = vld [vmem:[#allocation2 + $0xb1] sm:$0xff] }
  0x37   : > { %v11238_v60 = vld [vmem:[#allocation2 + $0xa9] sm:$0xff]  ;;  %415 = vst.msk [vmem:[#allocation2 + $0x131] sm:$0x1] %vm366_vm2, %v397_v59  ;;  %v398_v61 = vld [vmem:[#allocation2 + $0x147] sm:$0x1]  ;;  %v11263_v9 = vld [vmem:[#allocation2 + $0xd9] sm:$0xff] }
  0x38   : > { %8739 = vmatmul.mubr.msk.f32.gmra.mrb[8].mxu0 %vm310_vm1, %v11213_v48  ;;  %416 = vst.msk [vmem:[#allocation2 + $0x149] sm:$0x1] %vm366_vm2, %v398_v61  ;;  %v399_v62 = vld [vmem:[#allocation2 + $0x15f] sm:$0x1]  ;;  %v400_v63 = vld [vmem:[#allocation2 + $0x177] sm:$0x1] }
  0x39   : > { %8741 = vmatprep.mubr.msk.f32.mxu0 %vm310_vm1, %v11216_v51  ;;  %417 = vst.msk [vmem:[#allocation2 + $0x161] sm:$0x1] %vm366_vm2, %v399_v62  ;;  %v349_v0 = vld [vmem:[#allocation2 + $0x1a] sm:$0x1]  ;;  %418 = vst.msk [vmem:[#allocation2 + $0x179] sm:$0x1] %vm366_vm2, %v400_v63 }
  0x3a   : > { %368 = vst.msk [vmem:[#allocation2 + $0x18] sm:$0x1] %vm366_vm2, %v349_v0  ;;  %v350_v2 = vld [vmem:[#allocation2 + $0x32] sm:$0x1]  ;;  %v11251_v3 = vld [vmem:[#allocation2 + $0xc1] sm:$0xff]  ;;  %v11260_v7 = vld [vmem:[#allocation2 + $0xc9] sm:$0xff] }
  0x3b   : > { %369 = vst.msk [vmem:[#allocation2 + $0x30] sm:$0x1] %vm366_vm2, %v350_v2  ;;  %v351_v4 = vld [vmem:[#allocation2 + $0x4a] sm:$0x1]  ;;  %v352_v5 = vld [vmem:[#allocation2 + $0x62] sm:$0x1] }
  0x3c   : > { %8742 = vmatmul.mubr.msk.f32.gmra.mrb[10].mxu0 %vm310_vm1, %v11225_v53  ;;  %370 = vst.msk [vmem:[#allocation2 + $0x48] sm:$0x1] %vm366_vm2, %v351_v4  ;;  %371 = vst.msk [vmem:[#allocation2 + $0x60] sm:$0x1] %vm366_vm2, %v352_v5  ;;  %v353_v6 = vld [vmem:[#allocation2 + $0x7a] sm:$0x1] }
  0x3d   : > { %8744 = vmatprep.mubr.msk.f32.mxu0 %vm310_vm1, %v11227_v55  ;;  %372 = vst.msk [vmem:[#allocation2 + $0x78] sm:$0x1] %vm366_vm2, %v353_v6  ;;  %v354_v8 = vld [vmem:[#allocation2 + $0x92] sm:$0x1]  ;;  %v355_v10 = vld [vmem:[#allocation2 + $0xaa] sm:$0x1] }
  0x3e   : > { %373 = vst.msk [vmem:[#allocation2 + $0x90] sm:$0x1] %vm366_vm2, %v354_v8  ;;  %374 = vst.msk [vmem:[#allocation2 + $0xa8] sm:$0x1] %vm366_vm2, %v355_v10  ;;  %v356_v11 = vld [vmem:[#allocation2 + $0xc2] sm:$0x1] }
  0x3f   : > { %375 = vst.msk [vmem:[#allocation2 + $0xc0] sm:$0x1] %vm366_vm2, %v356_v11  ;;  %v357_v12 = vld [vmem:[#allocation2 + $0xda] sm:$0x1]  ;;  %v11272_v13 = vld [vmem:[#allocation2 + $0xe1] sm:$0xff]  ;;  %v11275_v15 = vld [vmem:[#allocation2 + $0xf1] sm:$0xff] }
  0x40   : > { %8745 = vmatmul.mubr.msk.f32.gmra.mrb[12].mxu0 %vm310_vm1, %v11235_v58  ;;  %376 = vst.msk [vmem:[#allocation2 + $0xd8] sm:$0x1] %vm366_vm2, %v357_v12  ;;  %v358_v14 = vld [vmem:[#allocation2 + $0xf2] sm:$0x1]  ;;  %v359_v16 = vld [vmem:[#allocation2 + $0x10a] sm:$0x1] }
  0x41   : > { %8747 = vmatprep.mubr.msk.f32.mxu0 %vm310_vm1, %v11238_v60  ;;  %377 = vst.msk [vmem:[#allocation2 + $0xf0] sm:$0x1] %vm366_vm2, %v358_v14  ;;  %378 = vst.msk [vmem:[#allocation2 + $0x108] sm:$0x1] %vm366_vm2, %v359_v16  ;;  %v360_v17 = vld [vmem:[#allocation2 + $0x122] sm:$0x1] }
  0x42   : > { %379 = vst.msk [vmem:[#allocation2 + $0x120] sm:$0x1] %vm366_vm2, %v360_v17  ;;  %v11284_v18 = vld [vmem:[#allocation2 + $0xf9] sm:$0xff]  ;;  %v11286_v19 = vld [vmem:[#allocation2 + $0x109] sm:$0xff]  ;;  %v11293_v21 = vld [vmem:[#allocation2 + $0x111] sm:$0xff] }
  0x43   : > { %v361_v20 = vld [vmem:[#allocation2 + $0x13a] sm:$0x1]  ;;  %v11295_v22 = vld [vmem:[#allocation2 + $0x121] sm:$0xff]  ;;  %v362_v23 = vld [vmem:[#allocation2 + $0x152] sm:$0x1] }
  0x44   : > { %8748 = vmatmul.mubr.msk.f32.gmra.mrb[14].mxu0 %vm310_vm1, %v11247_v1  ;;  %380 = vst.msk [vmem:[#allocation2 + $0x138] sm:$0x1] %vm366_vm2, %v361_v20  ;;  %v307_v24 = vld [vmem:[%s11103_s21 + $0xf0] sm:$0xff]  ;;  %381 = vst.msk [vmem:[#allocation2 + $0x150] sm:$0x1] %vm366_vm2, %v362_v23  ;;  %v11306_v26 = vld [vmem:[#allocation2 + $0x139] sm:$0xff] }
  0x45   : > { %8750 = vmatprep.mubr.msk.f32.mxu0 %vm310_vm1, %v11251_v3  ;;  %341 = vst.msk [vmem:[#allocation2 + $0x181] sm:$0xff] %vm310_vm1, %v307_v24  ;;  %v11304_v25 = vld [vmem:[#allocation2 + $0x129] sm:$0xff]  ;;  %v11313_v34 = vld [vmem:[#allocation2 + $0x141] sm:$0xff]  ;;  %v11315_v35 = vld [vmem:[#allocation2 + $0x151] sm:$0xff] }
  0x46   : > { %v363_v27 = vld [vmem:[#allocation2 + $0x16a] sm:$0x1]  ;;  %v308_v37 = vld [vmem:[%s11103_s21 + $0xf8] sm:$0xff]  ;;  %v1209_v42 = vld [vmem:[#allocation2 + $0x2] sm:$0xff]  ;;  %s7675_s21 = sshll.u32 %s269_s17, 6 }
  0x47   : > { %382 = vst.msk [vmem:[#allocation2 + $0x168] sm:$0x1] %vm366_vm2, %v363_v27  ;;  %v11324_v38 = vld [vmem:[#allocation2 + $0x159] sm:$0xff]  ;;  %v11326_v39 = vld [vmem:[#allocation2 + $0x169] sm:$0xff]  ;;  %v11332_v41 = vld [vmem:[#allocation2 + $0x171] sm:$0xff]  ;;  %s271_s22 = scalar_lea.vmem [#allocation6], %s7675_s21 }
  0x48   : > { %8751 = vmatmul.mubr.msk.f32.gmra.mrb[16].mxu0 %vm310_vm1, %v11260_v7  ;;  %342 = vst.msk [vmem:[#allocation2 + $0x189] sm:$0xff] %vm310_vm1, %v308_v37  ;;  %v1210_v44 = vld [vmem:[#allocation2 + $0xa] sm:$0xff]  ;;  %v11337_v45 = vld [vmem:[#allocation2 + $0x1a] sm:$0xff]  ;;  %v11349_v47 = vld [vmem:[#allocation2 + $0x22] sm:$0xff]  ;;  %s7609_s29 = sshll.u32 %s271_s22, 4  ;;  %s13476_s29 = int_to_ptr.vmem [resolvable:$true] %s7609_s29 }
  0x49   : > { %8753 = vmatprep.mubr.msk.f32.mxu0 %vm310_vm1, %v11263_v9  ;;  %v11342_v46 = vld [vmem:[%s13522_s1 + $0x10] sm:$0x7]  ;;  %v11359_v50 = vld [vmem:[#allocation2 + $0x3a] sm:$0xff]  ;;  %v11369_v54 = vld [vmem:[#allocation2 + $0x62] sm:$0xff]  ;;  %s10930_s13 = scalar_lea.vmem %s13476_s29, 1024  ;;  %p10937_p0 = scmp.lt.s32.totalorder %s13476_s29, %s10935_s15 }
  0x4a   : > { %v11351_v49 = vld [vmem:[#allocation2 + $0x32] sm:$0xff]  ;;  %v11361_v52 = vld [vmem:[#allocation2 + $0x4a] sm:$0xff]  ;;  %v11377_v57 = vld [vmem:[#allocation2 + $0x7a] sm:$0xff]  ;;  %p10931_p11 = scmp.ne.s32.totalorder %s13476_s29, %s10930_s13  ;;  %p10938_p1 = scmp.lt.s32.totalorder %s10936_s16, %s10930_s13 }
  0x4b   : > { %v11375_v56 = vld [vmem:[#allocation2 + $0x6a] sm:$0xff]  ;;  %v11383_v59 = vld [vmem:[#allocation2 + $0x82] sm:$0xff]  ;;  %v11385_v61 = vld [vmem:[#allocation2 + $0x92] sm:$0xff] }
  0x4c   : > { %8754 = vmatmul.mubr.msk.f32.gmra.mrb[18].mxu0 %vm310_vm1, %v11272_v13  ;;  %v364_v36 = vld [vmem:[#allocation2 + $0x182] sm:$0x1]  ;;  %v11391_v62 = vld [vmem:[#allocation2 + $0x9a] sm:$0xff]  ;;  %v11393_v63 = vld [vmem:[#allocation2 + $0xaa] sm:$0xff]  ;;  %p10932_p12 = pnand %p10931_p11, %p11076_p5  ;;  %p10939_p2 = por %p10938_p1, %p10937_p0 }
  0x4d   : > { %8756 = vmatprep.mubr.msk.f32.mxu0 %vm310_vm1, %v11275_v15  ;;  %383 = vst.msk [vmem:[#allocation2 + $0x180] sm:$0x1] %vm366_vm2, %v364_v36  ;;  %v11399_v0 = vld [vmem:[#allocation2 + $0xb2] sm:$0xff]  ;;  %v11401_v2 = vld [vmem:[#allocation2 + $0xc2] sm:$0xff]  ;;  %v11407_v4 = vld [vmem:[#allocation2 + $0xca] sm:$0xff] }
  0x4e   : > { %v11409_v5 = vld [vmem:[#allocation2 + $0xda] sm:$0xff]  ;;  %v11415_v6 = vld [vmem:[#allocation2 + $0xe2] sm:$0xff]  ;;  %v11417_v8 = vld [vmem:[#allocation2 + $0xf2] sm:$0xff]  ;;  %p10933_p13 = pneg %p10932_p12 }
  0x4f   : > { %v11423_v10 = vld [vmem:[#allocation2 + $0xfa] sm:$0xff]  ;;  %v11425_v11 = vld [vmem:[#allocation2 + $0x10a] sm:$0xff]  ;;  %v11431_v12 = vld [vmem:[#allocation2 + $0x112] sm:$0xff] }
  0x50   : > { %8757 = vmatmul.mubr.msk.f32.gmra.mrb[20].mxu0 %vm310_vm1, %v11284_v18  ;;  %v11433_v14 = vld [vmem:[#allocation2 + $0x122] sm:$0xff]  ;;  %v11439_v16 = vld [vmem:[#allocation2 + $0x12a] sm:$0xff]  ;;  %v11441_v17 = vld [vmem:[#allocation2 + $0x13a] sm:$0xff]  ;;  %p10940_p3 = pnand %p10939_p2, %p10933_p13 }
  0x51   : > { %8759 = vmatprep.mubr.msk.f32.mxu0 %vm310_vm1, %v11286_v19  ;;  %v11447_v20 = vld [vmem:[#allocation2 + $0x142] sm:$0xff]  ;;  %v11449_v23 = vld [vmem:[#allocation2 + $0x152] sm:$0xff]  ;;  %v11455_v24 = vld [vmem:[#allocation2 + $0x15a] sm:$0xff] }
  0x52   : > { %13618 = vst [vmem:[#allocation9_spill] sm:$0xff] %v11449_v23  ;;  %13619 = vst [vmem:[#allocation10_spill] sm:$0xff] %v11455_v24  ;;  %v11457_v27 = vld [vmem:[#allocation2 + $0x16a] sm:$0xff]  ;;  %v11463_v36 = vld [vmem:[#allocation2 + $0x172] sm:$0xff] }
  0x53   : > { %13620 = vst [vmem:[#allocation11_spill] sm:$0xff] %v11457_v27  ;;  %13621 = vst [vmem:[#allocation12_spill] sm:$0xff] %v11463_v36  ;;  %v11465_v37 = vld [vmem:[#allocation2 + $0x18] sm:$0xff] }
  0x54   : > { %8760 = vmatmul.mubr.msk.f32.gmra.mrb[22].mxu0 %vm310_vm1, %v11293_v21  ;;  %13622 = vst [vmem:[#allocation13_spill] sm:$0xff] %v11465_v37 }
  0x55   : > { %8762 = vmatprep.mubr.msk.f32.mxu0 %vm310_vm1, %v11295_v22 }
  0x58   : > { %8763 = vmatmul.mubr.msk.f32.gmra.mrb[24].mxu0 %vm310_vm1, %v11304_v25 }
  0x59   : > { %8765 = vmatprep.mubr.msk.f32.mxu0 %vm310_vm1, %v11306_v26 }
  0x5c   : > { %8766 = vmatmul.mubr.msk.f32.gmra.mrb[26].mxu0 %vm310_vm1, %v11313_v34 }
  0x5d   : > { %8768 = vmatprep.mubr.msk.f32.mxu0 %vm310_vm1, %v11315_v35 }
  0x60   : > { %8769 = vmatmul.mubr.msk.f32.gmra.mrb[28].mxu0 %vm310_vm1, %v11324_v38 }
  0x61   : > { %8771 = vmatprep.mubr.msk.f32.mxu0 %vm310_vm1, %v11326_v39 }
  0x64   : > { %8772 = vmatmul.mubr.msk.f32.gmra.mrb[30].mxu0 %vm310_vm1, %v11332_v41 }
  0x65   : > { %8776 = vmatprep.mubr.msk.f32.mxu0 %vm310_vm1, %v1209_v42  ;;  %v11471_v42 = vld [vmem:[#allocation2 + $0x20] sm:$0xff] }
  0x66   : > { %13623 = vst [vmem:[#allocation14_spill] sm:$0xff] %v11471_v42 }
  0x68   : > { %8777 = vmatmul.mubr.msk.f32.vlgmr.msra.gmra.mrb[0].mxu0 %vm310_vm1, %v1210_v44  ;;  %v11473_v44 = vld [vmem:[#allocation2 + $0x30] sm:$0xff] }
  0x69   : > { %8825 = vmatpush3.msk.msra.mxu0 %vm558_vm0, %v11161_v29  ;;  %8779 = vmatprep.mubr.msk.f32.mxu0 %vm310_vm1, %v11337_v45  ;;  %v11367_v29 = vld [vmem:[#allocation2 + $0x52] sm:$0xff]  ;;  %13624 = vst [vmem:[#allocation15_spill] sm:$0xff] %v11473_v44 }
  0x6a   : > { %8874 = vmatprep.subr.msk.mxu0 %vm558_vm0, %v11342_v46 }
  0x6c   : > { %8780 = vmatmul.mubr.msk.f32.gmra.mrb[2].mxu0 %vm310_vm1, %v11349_v47 }
  0x6d   : > { %8782 = vmatprep.mubr.msk.f32.mxu0 %vm310_vm1, %v11351_v49 }
  0x70   : > { %8783 = vmatmul.mubr.msk.f32.gmra.mrb[4].mxu0 %vm310_vm1, %v11359_v50 }
  0x71   : > { %8785 = vmatprep.mubr.msk.f32.mxu0 %vm310_vm1, %v11361_v52 }
  0x74   : > { %8786 = vmatmul.mubr.msk.f32.gmra.mrb[6].mxu0 %vm310_vm1, %v11367_v29 }
  0x75   : > { %8788 = vmatprep.mubr.msk.f32.mxu0 %vm310_vm1, %v11369_v54 }
  0x78   : > { %8789 = vmatmul.mubr.msk.f32.gmra.mrb[8].mxu0 %vm310_vm1, %v11375_v56 }
  0x79   : > { %8791 = vmatprep.mubr.msk.f32.mxu0 %vm310_vm1, %v11377_v57 }
  0x7c   : > { %8792 = vmatmul.mubr.msk.f32.gmra.mrb[10].mxu0 %vm310_vm1, %v11383_v59 }
  0x7d   : > { %8794 = vmatprep.mubr.msk.f32.mxu0 %vm310_vm1, %v11385_v61 }
  0x80   : > { %8795 = vmatmul.mubr.msk.f32.gmra.mrb[12].mxu0 %vm310_vm1, %v11391_v62 }
  0x81   : > { %8797 = vmatprep.mubr.msk.f32.mxu0 %vm310_vm1, %v11393_v63 }
  0x84   : > { %8798 = vmatmul.mubr.msk.f32.gmra.mrb[14].mxu0 %vm310_vm1, %v11399_v0 }
  0x85   : > { %8800 = vmatprep.mubr.msk.f32.mxu0 %vm310_vm1, %v11401_v2 }
  0x88   : > { %8801 = vmatmul.mubr.msk.f32.gmra.mrb[16].mxu0 %vm310_vm1, %v11407_v4 }
  0x89   : > { %8803 = vmatprep.mubr.msk.f32.mxu0 %vm310_vm1, %v11409_v5 }
  0x8c   : > { %8804 = vmatmul.mubr.msk.f32.gmra.mrb[18].mxu0 %vm310_vm1, %v11415_v6 }
  0x8d   : > { %8806 = vmatprep.mubr.msk.f32.mxu0 %vm310_vm1, %v11417_v8 }
  0x90   : > { %8807 = vmatmul.mubr.msk.f32.gmra.mrb[20].mxu0 %vm310_vm1, %v11423_v10 }
  0x91   : > { %8809 = vmatprep.mubr.msk.f32.mxu0 %vm310_vm1, %v11425_v11 }
  0x94   : > { %8810 = vmatmul.mubr.msk.f32.gmra.mrb[22].mxu0 %vm310_vm1, %v11431_v12 }
  0x95   : > { %8812 = vmatprep.mubr.msk.f32.mxu0 %vm310_vm1, %v11433_v14 }
  0x98   : > { %8813 = vmatmul.mubr.msk.f32.gmra.mrb[24].mxu0 %vm310_vm1, %v11439_v16 }
  0x99   : > { %8815 = vmatprep.mubr.msk.f32.mxu0 %vm310_vm1, %v11441_v17 }
  0x9c   : > { %8816 = vmatmul.mubr.msk.f32.gmra.mrb[26].mxu0 %vm310_vm1, %v11447_v20 }
  0x9d   : > { %8818 = vmatprep.mubr.msk.f32.mxu0 %vm310_vm1, %v11449_v23  ;;  %v401_v23 = vld [vmem:[#allocation2 + $0x18f] sm:$0x1] }
  0x9e   : > { %419 = vst.msk [vmem:[#allocation2 + $0x191] sm:$0x1] %vm366_vm2, %v401_v23  ;;  %v7882_v23 = vld [vmem:[%s13522_s1 + $0x18] sm:$0x7] }
  0xa0   : > { %8819 = vmatmul.mubr.msk.f32.gmra.mrb[28].mxu0 %vm310_vm1, %v11455_v24  ;;  %v11478_v24 = vld [vmem:[%s13522_s1 + $0x14] sm:$0x7] }
  0xa1   : > { %8821 = vmatprep.mubr.msk.f32.mxu0 %vm310_vm1, %v11457_v27  ;;  %v11498_v27 = vld [vmem:[#allocation2 + $0x60] sm:$0xff] }
  0xa2   : > { %13628 = vst [vmem:[#allocation19_spill] sm:$0xff] %v11498_v27 }
  0xa4   : > { %8822 = vmatmul.mubr.msk.f32.gmra.mrb[30].mxu0 %vm310_vm1, %v11463_v36  ;;  %v11486_v36 = vld [vmem:[#allocation2 + $0x38] sm:$0xff] }
  0xa5   : > { %8826 = vmatprep.mubr.msk.f32.mxu0 %vm310_vm1, %v11465_v37  ;;  %13625 = vst [vmem:[#allocation16_spill] sm:$0xff] %v11486_v36  ;;  %v11488_v37 = vld [vmem:[#allocation2 + $0x48] sm:$0xff] }
  0xa6   : > { %13626 = vst [vmem:[#allocation17_spill] sm:$0xff] %v11488_v37 }
  0xa8   : > { %8827 = vmatmul.mubr.msk.f32.vlgmr.msra.gmra.mrb[0].mxu0 %vm310_vm1, %v11471_v42  ;;  %v11496_v42 = vld [vmem:[#allocation2 + $0x50] sm:$0xff] }
  0xa9   : > { %8875 = vmatpush3.msk.msra.mxu0 %vm558_vm0, %v11342_v46  ;;  %8829 = vmatprep.mubr.msk.f32.mxu0 %vm310_vm1, %v11473_v44  ;;  %13627 = vst [vmem:[#allocation18_spill] sm:$0xff] %v11496_v42  ;;  %v11504_v46 = vld [vmem:[#allocation2 + $0x68] sm:$0xff]  ;;  %v11506_v44 = vld [vmem:[#allocation2 + $0x78] sm:$0xff] }
  0xaa   : > { %8924 = vmatprep.subr.msk.mxu0 %vm558_vm0, %v11478_v24  ;;  %13629 = vst [vmem:[#allocation20_spill] sm:$0xff] %v11504_v46  ;;  %13630 = vst [vmem:[#allocation21_spill] sm:$0xff] %v11506_v44 }
  0xac   : > { %8830 = vmatmul.mubr.msk.f32.gmra.mrb[2].mxu0 %vm310_vm1, %v11486_v36  ;;  %v11514_v36 = vld [vmem:[#allocation2 + $0x90] sm:$0xff] }
  0xad   : > { %8832 = vmatprep.mubr.msk.f32.mxu0 %vm310_vm1, %v11488_v37  ;;  %v11512_v37 = vld [vmem:[#allocation2 + $0x80] sm:$0xff]  ;;  %13632 = vst [vmem:[#allocation23_spill] sm:$0xff] %v11514_v36 }
  0xae   : > { %13631 = vst [vmem:[#allocation22_spill] sm:$0xff] %v11512_v37 }
  0xb0   : > { %8833 = vmatmul.mubr.msk.f32.gmra.mrb[4].mxu0 %vm310_vm1, %v11496_v42  ;;  %v11522_v42 = vld [vmem:[#allocation2 + $0xa8] sm:$0xff] }
  0xb1   : > { %8835 = vmatprep.mubr.msk.f32.mxu0 %vm310_vm1, %v11498_v27  ;;  %v11520_v27 = vld [vmem:[#allocation2 + $0x98] sm:$0xff]  ;;  %13634 = vst [vmem:[#allocation25_spill] sm:$0xff] %v11522_v42 }
  0xb2   : > { %13633 = vst [vmem:[#allocation24_spill] sm:$0xff] %v11520_v27 }
  0xb4   : > { %8836 = vmatmul.mubr.msk.f32.gmra.mrb[6].mxu0 %vm310_vm1, %v11504_v46  ;;  %v11530_v46 = vld [vmem:[#allocation2 + $0xc0] sm:$0xff] }
  0xb5   : > { %8838 = vmatprep.mubr.msk.f32.mxu0 %vm310_vm1, %v11506_v44  ;;  %v11528_v44 = vld [vmem:[#allocation2 + $0xb0] sm:$0xff]  ;;  %13636 = vst [vmem:[#allocation27_spill] sm:$0xff] %v11530_v46 }
  0xb6   : > { %13635 = vst [vmem:[#allocation26_spill] sm:$0xff] %v11528_v44 }
  0xb8   : > { %8839 = vmatmul.mubr.msk.f32.gmra.mrb[8].mxu0 %vm310_vm1, %v11512_v37  ;;  %v11538_v37 = vld [vmem:[#allocation2 + $0xd8] sm:$0xff] }
  0xb9   : > { %8841 = vmatprep.mubr.msk.f32.mxu0 %vm310_vm1, %v11514_v36  ;;  %v11536_v36 = vld [vmem:[#allocation2 + $0xc8] sm:$0xff]  ;;  %13638 = vst [vmem:[#allocation29_spill] sm:$0xff] %v11538_v37 }
  0xba   : > { %13637 = vst [vmem:[#allocation28_spill] sm:$0xff] %v11536_v36 }
  0xbc   : > { %8842 = vmatmul.mubr.msk.f32.gmra.mrb[10].mxu0 %vm310_vm1, %v11520_v27  ;;  %v11546_v27 = vld [vmem:[#allocation2 + $0xf0] sm:$0xff] }
  0xbd   : > { %8844 = vmatprep.mubr.msk.f32.mxu0 %vm310_vm1, %v11522_v42  ;;  %v11544_v42 = vld [vmem:[#allocation2 + $0xe0] sm:$0xff]  ;;  %13640 = vst [vmem:[#allocation31_spill] sm:$0xff] %v11546_v27 }
  0xbe   : > { %13639 = vst [vmem:[#allocation30_spill] sm:$0xff] %v11544_v42 }
  0xc0   : > { %8845 = vmatmul.mubr.msk.f32.gmra.mrb[12].mxu0 %vm310_vm1, %v11528_v44  ;;  %v11554_v44 = vld [vmem:[#allocation2 + $0x108] sm:$0xff] }
  0xc1   : > { %8847 = vmatprep.mubr.msk.f32.mxu0 %vm310_vm1, %v11530_v46  ;;  %v11552_v46 = vld [vmem:[#allocation2 + $0xf8] sm:$0xff]  ;;  %13642 = vst [vmem:[#allocation33_spill] sm:$0xff] %v11554_v44 }
  0xc2   : > { %13641 = vst [vmem:[#allocation32_spill] sm:$0xff] %v11552_v46 }
  0xc4   : > { %8848 = vmatmul.mubr.msk.f32.gmra.mrb[14].mxu0 %vm310_vm1, %v11536_v36  ;;  %v11562_v36 = vld [vmem:[#allocation2 + $0x120] sm:$0xff] }
  0xc5   : > { %8850 = vmatprep.mubr.msk.f32.mxu0 %vm310_vm1, %v11538_v37  ;;  %v11560_v37 = vld [vmem:[#allocation2 + $0x110] sm:$0xff]  ;;  %13644 = vst [vmem:[#allocation35_spill] sm:$0xff] %v11562_v36 }
  0xc6   : > { %13643 = vst [vmem:[#allocation34_spill] sm:$0xff] %v11560_v37 }
  0xc8   : > { %8851 = vmatmul.mubr.msk.f32.gmra.mrb[16].mxu0 %vm310_vm1, %v11544_v42  ;;  %v11570_v42 = vld [vmem:[#allocation2 + $0x138] sm:$0xff] }
  0xc9   : > { %8853 = vmatprep.mubr.msk.f32.mxu0 %vm310_vm1, %v11546_v27  ;;  %v11568_v27 = vld [vmem:[#allocation2 + $0x128] sm:$0xff]  ;;  %13646 = vst [vmem:[#allocation37_spill] sm:$0xff] %v11570_v42 }
  0xca   : > { %13645 = vst [vmem:[#allocation36_spill] sm:$0xff] %v11568_v27 }
  0xcc   : > { %8854 = vmatmul.mubr.msk.f32.gmra.mrb[18].mxu0 %vm310_vm1, %v11552_v46  ;;  %v11578_v46 = vld [vmem:[#allocation2 + $0x150] sm:$0xff] }
  0xcd   : > { %8856 = vmatprep.mubr.msk.f32.mxu0 %vm310_vm1, %v11554_v44  ;;  %v11576_v44 = vld [vmem:[#allocation2 + $0x140] sm:$0xff]  ;;  %13647 = vst [vmem:[#allocation38_spill] sm:$0xff] %v11578_v46 }
  0xd0   : > { %8857 = vmatmul.mubr.msk.f32.gmra.mrb[20].mxu0 %vm310_vm1, %v11560_v37  ;;  %v11586_v37 = vld [vmem:[#allocation2 + $0x168] sm:$0xff] }
  0xd1   : > { %8859 = vmatprep.mubr.msk.f32.mxu0 %vm310_vm1, %v11562_v36  ;;  %v11584_v36 = vld [vmem:[#allocation2 + $0x158] sm:$0xff] }
  0xd4   : > { %8860 = vmatmul.mubr.msk.f32.gmra.mrb[22].mxu0 %vm310_vm1, %v11568_v27  ;;  %v11595_v27 = vld [vmem:[#allocation2 + $0x180] sm:$0xff] }
  0xd5   : > { %8862 = vmatprep.mubr.msk.f32.mxu0 %vm310_vm1, %v11570_v42  ;;  %v11593_v42 = vld [vmem:[#allocation2 + $0x170] sm:$0xff] }
  0xd8   : > { %8863 = vmatmul.mubr.msk.f32.gmra.mrb[24].mxu0 %vm310_vm1, %v11576_v44 }
  0xd9   : > { %8865 = vmatprep.mubr.msk.f32.mxu0 %vm310_vm1, %v11578_v46  ;;  %v11601_v46 = vld [vmem:[#allocation2 + $0x188] sm:$0xff] }
  0xdc   : > { %8866 = vmatmul.mubr.msk.f32.gmra.mrb[26].mxu0 %vm310_vm1, %v11584_v36 }
  0xdd   : > { %8868 = vmatprep.mubr.msk.f32.mxu0 %vm310_vm1, %v11586_v37 }
  0xe0   : > { %8869 = vmatmul.mubr.msk.f32.gmra.mrb[28].mxu0 %vm310_vm1, %v11593_v42 }
  0xe1   : > { %8871 = vmatprep.mubr.msk.f32.mxu0 %vm310_vm1, %v11595_v27 }
  0xe4   : > { %8872 = vmatmul.mubr.msk.f32.gmra.mrb[30].mxu0 %vm310_vm1, %v11601_v46 }
  0xe5   : > { %8876 = vmatprep.mubr.msk.f32.mxu0 %vm310_vm1, %v11152_v28  ;;  %v365_v28 = vld [vmem:[#allocation2 + $0x19a] sm:$0x1] }
  0xe6   : > { %384 = vst.msk [vmem:[#allocation2 + $0x198] sm:$0x1] %vm366_vm2, %v365_v28 }
  0xe8   : > { %8877 = vmatmul.mubr.msk.f32.vlgmr.msra.gmra.mrb[0].mxu0 %vm310_vm1, %v11168_v30  ;;  %v11670_v30 = vld [vmem:[#allocation2 + $0x181] sm:$0xff] }
  0xe9   : > { %8925 = vmatpush3.msk.msra.mxu0 %vm558_vm0, %v11478_v24  ;;  %8879 = vmatprep.mubr.msk.f32.mxu0 %vm310_vm1, %v11170_v31  ;;  %v11676_v31 = vld [vmem:[#allocation2 + $0x189] sm:$0xff]  ;;  %v461_v24 = vld [vmem:[%s13522_s1] sm:$0x7] }
  0xea   : > { %8974 = vmatprep.subr.msk.mxu0 %vm558_vm0, %v7882_v23  ;;  %8674 = vmatprep.subr.msk.mxu1 %vm558_vm0, %v461_v24 }
  0xeb   : > { %8675 = vmatpush3.msk.msra.mxu1 %vm558_vm0, %v461_v24  ;;  %v13656_v24 = vld [vmem:[#allocation16_spill] sm:$0xff] }
  0xec   : > { %8880 = vmatmul.mubr.msk.f32.gmra.mrb[2].mxu0 %vm310_vm1, %v11178_v32  ;;  %v7916_v32 = vld [vmem:[%s13522_s1 + $0x1c] sm:$0x7] }
  0xed   : > { %8882 = vmatprep.mubr.msk.f32.mxu0 %vm310_vm1, %v11180_v33  ;;  %v13648_v33 = vld [vmem:[#allocation9_spill] sm:$0xff] }
  0xf0   : > { %8883 = vmatmul.mubr.msk.f32.gmra.mrb[4].mxu0 %vm310_vm1, %v11196_v40  ;;  %v348_v40 = vld [vmem:[#allocation2 + $0x2] sm:$0x1] }
  0xf1   : > { %8885 = vmatprep.mubr.msk.f32.mxu0 %vm310_vm1, %v11202_v43  ;;  %v13649_v43 = vld [vmem:[#allocation10_spill] sm:$0xff]  ;;  %367 = vst.msk [vmem:[#allocation2] sm:$0x1] %vm366_vm2, %v348_v40 }
  0xf2   : > { %v430_v40 = vld [vmem:[#allocation2 + $0x8] sm:$0xff] }
  0xf4   : > { %8886 = vmatmul.mubr.msk.f32.gmra.mrb[6].mxu0 %vm310_vm1, %v11213_v48  ;;  %v13650_v48 = vld [vmem:[#allocation11_spill] sm:$0xff] }
  0xf5   : > { %8888 = vmatprep.mubr.msk.f32.mxu0 %vm310_vm1, %v11216_v51 }
  0xf8   : > { %8889 = vmatmul.mubr.msk.f32.gmra.mrb[8].mxu0 %vm310_vm1, %v11225_v53  ;;  %v429_v28 = vld [vmem:[#allocation2] sm:$0xff] }
  0xf9   : > { %8891 = vmatprep.mubr.msk.f32.mxu0 %vm310_vm1, %v11227_v55  ;;  %8676 = vmatprep.mubr.msk.f32.mxu1 %vm310_vm1, %v429_v28  ;;  %v13657_v28 = vld [vmem:[#allocation17_spill] sm:$0xff] }
  0xfa   : > { %8677 = vmatmul.mubr.msk.f32.vlgmr.msra.gmra.mrb[0].mxu1 %vm310_vm1, %v430_v40  ;;  %v13658_v40 = vld [vmem:[#allocation14_spill] sm:$0xff] }
  0xfc   : > { %8892 = vmatmul.mubr.msk.f32.gmra.mrb[10].mxu0 %vm310_vm1, %v11235_v58 }
  0xfd   : > { %8894 = vmatprep.mubr.msk.f32.mxu0 %vm310_vm1, %v11238_v60 }
 0x100   : > { %8895 = vmatmul.mubr.msk.f32.gmra.mrb[12].mxu0 %vm310_vm1, %v11247_v1 }
 0x101   : > { %8897 = vmatprep.mubr.msk.f32.mxu0 %vm310_vm1, %v11251_v3 }
 0x104   : > { %8898 = vmatmul.mubr.msk.f32.gmra.mrb[14].mxu0 %vm310_vm1, %v11260_v7 }
 0x105   : > { %8900 = vmatprep.mubr.msk.f32.mxu0 %vm310_vm1, %v11263_v9 }
 0x108   : > { %8901 = vmatmul.mubr.msk.f32.gmra.mrb[16].mxu0 %vm310_vm1, %v11272_v13 }
 0x109   : > { %8903 = vmatprep.mubr.msk.f32.mxu0 %vm310_vm1, %v11275_v15 }
 0x10c   : > { %8904 = vmatmul.mubr.msk.f32.gmra.mrb[18].mxu0 %vm310_vm1, %v11284_v18 }
 0x10d   : > { %8906 = vmatprep.mubr.msk.f32.mxu0 %vm310_vm1, %v11286_v19 }
 0x110   : > { %8907 = vmatmul.mubr.msk.f32.gmra.mrb[20].mxu0 %vm310_vm1, %v11293_v21 }
 0x111   : > { %8909 = vmatprep.mubr.msk.f32.mxu0 %vm310_vm1, %v11295_v22 }
 0x114   : > { %8910 = vmatmul.mubr.msk.f32.gmra.mrb[22].mxu0 %vm310_vm1, %v11304_v25 }
 0x115   : > { %8912 = vmatprep.mubr.msk.f32.mxu0 %vm310_vm1, %v11306_v26 }
 0x118   : > { %8913 = vmatmul.mubr.msk.f32.gmra.mrb[24].mxu0 %vm310_vm1, %v11313_v34 }
 0x119   : > { %8915 = vmatprep.mubr.msk.f32.mxu0 %vm310_vm1, %v11315_v35 }
 0x11c   : > { %8916 = vmatmul.mubr.msk.f32.gmra.mrb[26].mxu0 %vm310_vm1, %v11324_v38 }
 0x11d   : > { %8918 = vmatprep.mubr.msk.f32.mxu0 %vm310_vm1, %v11326_v39 }
 0x120   : > { %8919 = vmatmul.mubr.msk.f32.gmra.mrb[28].mxu0 %vm310_vm1, %v11332_v41 }
 0x121   : > { %8921 = vmatprep.mubr.msk.f32.mxu0 %vm310_vm1, %v11670_v30 }
 0x124   : > { %8922 = vmatmul.mubr.msk.f32.gmra.mrb[30].mxu0 %vm310_vm1, %v11676_v31 }
 0x125   : > { %8926 = vmatprep.mubr.msk.f32.mxu0 %vm310_vm1, %v11337_v45  ;;  %v11744_v45 = vld [vmem:[#allocation2 + $0x182] sm:$0xff] }
 0x126   : > { %13651 = vst [vmem:[#allocation9_spill] sm:$0xff] %v11744_v45 }
 0x128   : > { %8927 = vmatmul.mubr.msk.f32.vlgmr.msra.gmra.mrb[0].mxu0 %vm310_vm1, %v11349_v47  ;;  %v13652_v47 = vld [vmem:[#allocation12_spill] sm:$0xff] }
 0x129   : > { %8975 = vmatpush3.msk.msra.mxu0 %vm558_vm0, %v7882_v23  ;;  %8929 = vmatprep.mubr.msk.f32.mxu0 %vm310_vm1, %v11351_v49  ;;  %v11753_v23 = vld [vmem:[#allocation2 + $0x18a] sm:$0xff] }
 0x12a   : > { %9024 = vmatprep.subr.msk.mxu0 %vm558_vm0, %v7916_v32  ;;  %13653 = vst [vmem:[#allocation39_spill] sm:$0xff] %v11753_v23 }
 0x12c   : > { %8930 = vmatmul.mubr.msk.f32.gmra.mrb[2].mxu0 %vm310_vm1, %v11359_v50 }
 0x12d   : > { %8932 = vmatprep.mubr.msk.f32.mxu0 %vm310_vm1, %v11361_v52 }
 0x130   : > { %8933 = vmatmul.mubr.msk.f32.gmra.mrb[4].mxu0 %vm310_vm1, %v11367_v29 }
 0x131   : > { %8935 = vmatprep.mubr.msk.f32.mxu0 %vm310_vm1, %v11369_v54 }
 0x134   : > { %8936 = vmatmul.mubr.msk.f32.gmra.mrb[6].mxu0 %vm310_vm1, %v11375_v56 }
 0x135   : > { %8938 = vmatprep.mubr.msk.f32.mxu0 %vm310_vm1, %v11377_v57 }
 0x138   : > { %8939 = vmatmul.mubr.msk.f32.gmra.mrb[8].mxu0 %vm310_vm1, %v11383_v59 }
 0x139   : > { %8941 = vmatprep.mubr.msk.f32.mxu0 %vm310_vm1, %v11385_v61 }
 0x13c   : > { %8942 = vmatmul.mubr.msk.f32.gmra.mrb[10].mxu0 %vm310_vm1, %v11391_v62 }
 0x13d   : > { %8944 = vmatprep.mubr.msk.f32.mxu0 %vm310_vm1, %v11393_v63 }
 0x140   : > { %8945 = vmatmul.mubr.msk.f32.gmra.mrb[12].mxu0 %vm310_vm1, %v11399_v0 }
 0x141   : > { %8947 = vmatprep.mubr.msk.f32.mxu0 %vm310_vm1, %v11401_v2 }
 0x144   : > { %8948 = vmatmul.mubr.msk.f32.gmra.mrb[14].mxu0 %vm310_vm1, %v11407_v4 }
 0x145   : > { %8950 = vmatprep.mubr.msk.f32.mxu0 %vm310_vm1, %v11409_v5 }
 0x148   : > { %8951 = vmatmul.mubr.msk.f32.gmra.mrb[16].mxu0 %vm310_vm1, %v11415_v6 }
 0x149   : > { %8953 = vmatprep.mubr.msk.f32.mxu0 %vm310_vm1, %v11417_v8 }
 0x14c   : > { %8954 = vmatmul.mubr.msk.f32.gmra.mrb[18].mxu0 %vm310_vm1, %v11423_v10 }
 0x14d   : > { %8956 = vmatprep.mubr.msk.f32.mxu0 %vm310_vm1, %v11425_v11 }
 0x150   : > { %8957 = vmatmul.mubr.msk.f32.gmra.mrb[20].mxu0 %vm310_vm1, %v11431_v12 }
 0x151   : > { %8959 = vmatprep.mubr.msk.f32.mxu0 %vm310_vm1, %v11433_v14 }
 0x154   : > { %8960 = vmatmul.mubr.msk.f32.gmra.mrb[22].mxu0 %vm310_vm1, %v11439_v16 }
 0x155   : > { %8962 = vmatprep.mubr.msk.f32.mxu0 %vm310_vm1, %v11441_v17 }
 0x158   : > { %8963 = vmatmul.mubr.msk.f32.gmra.mrb[24].mxu0 %vm310_vm1, %v11447_v20 }
 0x159   : > { %8965 = vmatprep.mubr.msk.f32.mxu0 %vm310_vm1, %v13648_v33 }
 0x15c   : > { %8966 = vmatmul.mubr.msk.f32.gmra.mrb[26].mxu0 %vm310_vm1, %v13649_v43  ;;  %v13662_v43 = vld [vmem:[#allocation21_spill] sm:$0xff] }
 0x15d   : > { %8968 = vmatprep.mubr.msk.f32.mxu0 %vm310_vm1, %v13650_v48  ;;  %v13655_v48 = vld [vmem:[#allocation13_spill] sm:$0xff] }
 0x15e   : > { %8679 = vmatprep.mubr.msk.f32.mxu1 %vm310_vm1, %v13655_v48  ;;  %v13659_v48 = vld [vmem:[#allocation18_spill] sm:$0xff] }
 0x15f   : > { %8680 = vmatmul.mubr.msk.f32.gmra.mrb[2].mxu1 %vm310_vm1, %v13658_v40  ;;  %v13664_v40 = vld [vmem:[#allocation23_spill] sm:$0xff] }
 0x160   : > { %8969 = vmatmul.mubr.msk.f32.gmra.mrb[28].mxu0 %vm310_vm1, %v13652_v47  ;;  %v13654_v47 = vld [vmem:[#allocation15_spill] sm:$0xff] }
 0x161   : > { %8971 = vmatprep.mubr.msk.f32.mxu0 %vm310_vm1, %v11744_v45  ;;  %v11768_v45 = vld [vmem:[%s13522_s1 + $0x20] sm:$0x7]  ;;  %8682 = vmatprep.mubr.msk.f32.mxu1 %vm310_vm1, %v13654_v47 }
 0x163   : > { %8683 = vmatmul.mubr.msk.f32.gmra.mrb[4].mxu1 %vm310_vm1, %v13656_v24 }
 0x164   : > { %8972 = vmatmul.mubr.msk.f32.gmra.mrb[30].mxu0 %vm310_vm1, %v11753_v23  ;;  %v13660_v23 = vld [vmem:[#allocation19_spill] sm:$0xff]  ;;  %8685 = vmatprep.mubr.msk.f32.mxu1 %vm310_vm1, %v13657_v28 }
 0x165   : > { %8976 = vmatprep.mubr.msk.f32.mxu0 %vm310_vm1, %v13654_v47  ;;  %v13663_v47 = vld [vmem:[#allocation22_spill] sm:$0xff] }
 0x167   : > { %8686 = vmatmul.mubr.msk.f32.gmra.mrb[6].mxu1 %vm310_vm1, %v13659_v48 }
 0x168   : > { %8977 = vmatmul.mubr.msk.f32.vlgmr.msra.gmra.mrb[0].mxu0 %vm310_vm1, %v13656_v24  ;;  %8688 = vmatprep.mubr.msk.f32.mxu1 %vm310_vm1, %v13660_v23  ;;  %v13665_v24 = vld [vmem:[#allocation24_spill] sm:$0xff] }
 0x169   : > { %9025 = vmatpush3.msk.msra.mxu0 %vm558_vm0, %v7916_v32  ;;  %8979 = vmatprep.mubr.msk.f32.mxu0 %vm310_vm1, %v13657_v28  ;;  %v13661_v32 = vld [vmem:[#allocation20_spill] sm:$0xff]  ;;  %v13666_v28 = vld [vmem:[#allocation25_spill] sm:$0xff] }
 0x16a   : > { %9074 = vmatprep.subr.msk.mxu0 %vm558_vm0, %v11768_v45 }
 0x16b   : > { %8689 = vmatmul.mubr.msk.f32.gmra.mrb[8].mxu1 %vm310_vm1, %v13661_v32 }
 0x16c   : > { %8980 = vmatmul.mubr.msk.f32.gmra.mrb[2].mxu0 %vm310_vm1, %v13659_v48  ;;  %8691 = vmatprep.mubr.msk.f32.mxu1 %vm310_vm1, %v13662_v43  ;;  %v13668_v48 = vld [vmem:[#allocation27_spill] sm:$0xff] }
 0x16d   : > { %8982 = vmatprep.mubr.msk.f32.mxu0 %vm310_vm1, %v13660_v23  ;;  %v13667_v23 = vld [vmem:[#allocation26_spill] sm:$0xff] }
 0x16f   : > { %8692 = vmatmul.mubr.msk.f32.gmra.mrb[10].mxu1 %vm310_vm1, %v13663_v47 }
 0x170   : > { %8983 = vmatmul.mubr.msk.f32.gmra.mrb[4].mxu0 %vm310_vm1, %v13661_v32  ;;  %8694 = vmatprep.mubr.msk.f32.mxu1 %vm310_vm1, %v13664_v40  ;;  %v13670_v32 = vld [vmem:[#allocation29_spill] sm:$0xff] }
 0x171   : > { %8985 = vmatprep.mubr.msk.f32.mxu0 %vm310_vm1, %v13662_v43  ;;  %v13669_v43 = vld [vmem:[#allocation28_spill] sm:$0xff] }
 0x173   : > { %8695 = vmatmul.mubr.msk.f32.gmra.mrb[12].mxu1 %vm310_vm1, %v13665_v24 }
 0x174   : > { %8986 = vmatmul.mubr.msk.f32.gmra.mrb[6].mxu0 %vm310_vm1, %v13663_v47  ;;  %8697 = vmatprep.mubr.msk.f32.mxu1 %vm310_vm1, %v13666_v28  ;;  %v13671_v47 = vld [vmem:[#allocation30_spill] sm:$0xff] }
 0x175   : > { %8988 = vmatprep.mubr.msk.f32.mxu0 %vm310_vm1, %v13664_v40  ;;  %v13672_v40 = vld [vmem:[#allocation31_spill] sm:$0xff] }
 0x177   : > { %8698 = vmatmul.mubr.msk.f32.gmra.mrb[14].mxu1 %vm310_vm1, %v13667_v23 }
 0x178   : > { %8989 = vmatmul.mubr.msk.f32.gmra.mrb[8].mxu0 %vm310_vm1, %v13665_v24  ;;  %8700 = vmatprep.mubr.msk.f32.mxu1 %vm310_vm1, %v13668_v48  ;;  %v13673_v24 = vld [vmem:[#allocation32_spill] sm:$0xff] }
 0x179   : > { %8991 = vmatprep.mubr.msk.f32.mxu0 %vm310_vm1, %v13666_v28  ;;  %v13674_v28 = vld [vmem:[#allocation33_spill] sm:$0xff] }
 0x17b   : > { %8701 = vmatmul.mubr.msk.f32.gmra.mrb[16].mxu1 %vm310_vm1, %v13669_v43 }
 0x17c   : > { %8992 = vmatmul.mubr.msk.f32.gmra.mrb[10].mxu0 %vm310_vm1, %v13667_v23  ;;  %8703 = vmatprep.mubr.msk.f32.mxu1 %vm310_vm1, %v13670_v32  ;;  %v13675_v23 = vld [vmem:[#allocation34_spill] sm:$0xff] }
 0x17d   : > { %8994 = vmatprep.mubr.msk.f32.mxu0 %vm310_vm1, %v13668_v48  ;;  %v13676_v48 = vld [vmem:[#allocation35_spill] sm:$0xff] }
 0x17f   : > { %8704 = vmatmul.mubr.msk.f32.gmra.mrb[18].mxu1 %vm310_vm1, %v13671_v47 }
 0x180   : > { %8995 = vmatmul.mubr.msk.f32.gmra.mrb[12].mxu0 %vm310_vm1, %v13669_v43  ;;  %8706 = vmatprep.mubr.msk.f32.mxu1 %vm310_vm1, %v13672_v40  ;;  %v13677_v43 = vld [vmem:[#allocation36_spill] sm:$0xff] }
 0x181   : > { %8997 = vmatprep.mubr.msk.f32.mxu0 %vm310_vm1, %v13670_v32  ;;  %v13678_v32 = vld [vmem:[#allocation37_spill] sm:$0xff] }
 0x183   : > { %8707 = vmatmul.mubr.msk.f32.gmra.mrb[20].mxu1 %vm310_vm1, %v13673_v24 }
 0x184   : > { %8998 = vmatmul.mubr.msk.f32.gmra.mrb[14].mxu0 %vm310_vm1, %v13671_v47  ;;  %8709 = vmatprep.mubr.msk.f32.mxu1 %vm310_vm1, %v13674_v28  ;;  %v13679_v47 = vld [vmem:[#allocation38_spill] sm:$0xff] }
 0x185   : > { %9000 = vmatprep.mubr.msk.f32.mxu0 %vm310_vm1, %v13672_v40  ;;  %v402_v40 = vld [vmem:[#allocation2 + $0x1a7] sm:$0x1] }
 0x186   : > { %420 = vst.msk [vmem:[#allocation2 + $0x1a9] sm:$0x1] %vm366_vm2, %v402_v40 }
 0x187   : > { %8710 = vmatmul.mubr.msk.f32.gmra.mrb[22].mxu1 %vm310_vm1, %v13675_v23 }
 0x188   : > { %9001 = vmatmul.mubr.msk.f32.gmra.mrb[16].mxu0 %vm310_vm1, %v13673_v24  ;;  %8712 = vmatprep.mubr.msk.f32.mxu1 %vm310_vm1, %v13676_v48  ;;  %v2800_v24 = vld [vmem:[#allocation2 + $0x198] sm:$0xff] }
 0x189   : > { %9003 = vmatprep.mubr.msk.f32.mxu0 %vm310_vm1, %v13674_v28  ;;  %v3160_v28 = vld [vmem:[#allocation2 + $0x31] sm:$0xff] }
 0x18b   : > { %8713 = vmatmul.mubr.msk.f32.gmra.mrb[24].mxu1 %vm310_vm1, %v13677_v43 }
 0x18c   : > { %9004 = vmatmul.mubr.msk.f32.gmra.mrb[18].mxu0 %vm310_vm1, %v13675_v23  ;;  %8715 = vmatprep.mubr.msk.f32.mxu1 %vm310_vm1, %v13678_v32  ;;  %v3162_v23 = vld [vmem:[#allocation2 + $0x49] sm:$0xff] }
 0x18d   : > { %9006 = vmatprep.mubr.msk.f32.mxu0 %vm310_vm1, %v13676_v48  ;;  %v4323_v48 = vld [vmem:[%s13524_s3 + $0x38] sm:$0xff] }
 0x18f   : > { %8716 = vmatmul.mubr.msk.f32.gmra.mrb[26].mxu1 %vm310_vm1, %v11576_v44 }
 0x190   : > { %9007 = vmatmul.mubr.msk.f32.gmra.mrb[20].mxu0 %vm310_vm1, %v13677_v43  ;;  %8718 = vmatprep.mubr.msk.f32.mxu1 %vm310_vm1, %v13679_v47 }
 0x191   : > { %9009 = vmatprep.mubr.msk.f32.mxu0 %vm310_vm1, %v13678_v32  ;;  %v4324_v32 = vld [vmem:[%s13524_s3 + $0x40] sm:$0xff] }
 0x193   : > { %8719 = vmatmul.mubr.msk.f32.gmra.mrb[28].mxu1 %vm310_vm1, %v11584_v36 }
 0x194   : > { %9010 = vmatmul.mubr.msk.f32.gmra.mrb[22].mxu0 %vm310_vm1, %v11576_v44  ;;  %8721 = vmatprep.mubr.msk.f32.mxu1 %vm310_vm1, %v11586_v37  ;;  %v2801_v44 = vld [vmem:[#allocation2 + $0x1a0] sm:$0xff] }
 0x195   : > { %9012 = vmatprep.mubr.msk.f32.mxu0 %vm310_vm1, %v13679_v47  ;;  %v4325_v47 = vld [vmem:[%s13524_s3 + $0x48] sm:$0xff] }
 0x196   : > { %v9728_v40 = vpack.c.bf16 %v4325_v47, %v4324_v32 }
 0x197   : > { %8722 = vmatmul.mubr.msk.f32.gmra.mrb[30].mxu1 %vm310_vm1, %v11593_v42 }
 0x198   : > { %9013 = vmatmul.mubr.msk.f32.gmra.mrb[24].mxu0 %vm310_vm1, %v11584_v36  ;;  %v3163_v36 = vld [vmem:[#allocation2 + $0x51] sm:$0xff] }
 0x199   : > { %9015 = vmatprep.mubr.msk.f32.mxu0 %vm310_vm1, %v11586_v37  ;;  %v3164_v37 = vld [vmem:[#allocation2 + $0x61] sm:$0xff] }
 0x19c   : > { %9016 = vmatmul.mubr.msk.f32.gmra.mrb[26].mxu0 %vm310_vm1, %v11593_v42  ;;  %v3165_v42 = vld [vmem:[#allocation2 + $0x69] sm:$0xff] }
 0x19d   : > { %9018 = vmatprep.mubr.msk.f32.mxu0 %vm310_vm1, %v11595_v27  ;;  %v3161_v27 = vld [vmem:[#allocation2 + $0x39] sm:$0xff] }
 0x1a0   : > { %9019 = vmatmul.mubr.msk.f32.gmra.mrb[28].mxu0 %vm310_vm1, %v11601_v46 }
 0x1a1   : > { %9021 = vmatprep.mubr.msk.f32.mxu0 %vm310_vm1, %v2800_v24  ;;  %v4326_v24 = vld [vmem:[%s13524_s3 + $0x50] sm:$0xff] }
 0x1a4   : > { %9022 = vmatmul.mubr.msk.f32.gmra.mrb[30].mxu0 %vm310_vm1, %v2801_v44  ;;  %v4327_v44 = vld [vmem:[%s13524_s3 + $0x58] sm:$0xff] }
 0x1a5   : > { %9026 = vmatprep.mubr.msk.f32.mxu0 %vm310_vm1, %v3160_v28  ;;  %v9732_v28 = vpack.c.bf16 %v4327_v44, %v4326_v24  ;;  %v4813_v24 = vld [vmem:[%s13524_s3 + $0x80] sm:$0xff] }
 0x1a8   : > { %9027 = vmatmul.mubr.msk.f32.vlgmr.msra.gmra.mrb[0].mxu0 %vm310_vm1, %v3161_v27  ;;  %v4328_v27 = vld [vmem:[%s13524_s3 + $0x60] sm:$0xff] }
 0x1a9   : > { %9075 = vmatpush3.msk.msra.mxu0 %vm558_vm0, %v11768_v45  ;;  %9029 = vmatprep.mubr.msk.f32.mxu0 %vm310_vm1, %v3162_v23  ;;  %v4322_v45 = vld [vmem:[%s13524_s3 + $0x30] sm:$0xff]  ;;  %v4329_v23 = vld [vmem:[%s13524_s3 + $0x68] sm:$0xff] }
 0x1aa   : > { %v9724_v43 = vpack.c.bf16 %v4323_v48, %v4322_v45 }
 0x1ac   : > { %9030 = vmatmul.mubr.msk.f32.gmra.mrb[2].mxu0 %vm310_vm1, %v3163_v36  ;;  %v9736_v36 = vpack.c.bf16 %v4329_v23, %v4328_v27 }
 0x1ad   : > { %9032 = vmatprep.mubr.msk.f32.mxu0 %vm310_vm1, %v3164_v37  ;;  %v12121_v37 = vld [vmem:[%s13523_s2] ss:$0 sm:$0xff] }
 0x1b0   : > { %9033 = vmatmul.mubr.msk.f32.gmra.mrb[4].mxu0 %vm310_vm1, %v3165_v42 }
 0x1b1   : > { %9035 = vmatprep.mubr.msk.f32.mxu0 %vm310_vm1, %v11216_v51  ;;  %v3190_v51 = vld [vmem:[#allocation2 + $0x199] sm:$0xff] }
 0x1b4   : > { %9036 = vmatmul.mubr.msk.f32.gmra.mrb[6].mxu0 %vm310_vm1, %v11225_v53  ;;  %v3191_v53 = vld [vmem:[#allocation2 + $0x1a1] sm:$0xff] }
 0x1b5   : > { %9038 = vmatprep.mubr.msk.f32.mxu0 %vm310_vm1, %v11227_v55  ;;  %v13680_v55 = vld [vmem:[#allocation10_spill] sm:$0xff] }
 0x1b8   : > { %9039 = vmatmul.mubr.msk.f32.gmra.mrb[8].mxu0 %vm310_vm1, %v11235_v58  ;;  %v13681_v58 = vld [vmem:[#allocation11_spill] sm:$0xff] }
 0x1b9   : > { %9041 = vmatprep.mubr.msk.f32.mxu0 %vm310_vm1, %v11238_v60  ;;  %v13682_v60 = vld [vmem:[#allocation12_spill] sm:$0xff] }
 0x1bc   : > { %9042 = vmatmul.mubr.msk.f32.gmra.mrb[10].mxu0 %vm310_vm1, %v11247_v1  ;;  %v13683_v1 = vld [vmem:[#allocation9_spill] sm:$0xff] }
 0x1bd   : > { %9044 = vmatprep.mubr.msk.f32.mxu0 %vm310_vm1, %v11251_v3  ;;  %v3580_v3 = vld [vmem:[#allocation2 + $0x19a] sm:$0xff] }
 0x1c0   : > { %9045 = vmatmul.mubr.msk.f32.gmra.mrb[12].mxu0 %vm310_vm1, %v11260_v7  ;;  %v13684_v7 = vld [vmem:[#allocation39_spill] sm:$0xff] }
 0x1c1   : > { %9047 = vmatprep.mubr.msk.f32.mxu0 %vm310_vm1, %v11263_v9  ;;  %v3581_v9 = vld [vmem:[#allocation2 + $0x1a2] sm:$0xff] }
 0x1c4   : > { %9048 = vmatmul.mubr.msk.f32.gmra.mrb[14].mxu0 %vm310_vm1, %v11272_v13 }
 0x1c5   : > { %9050 = vmatprep.mubr.msk.f32.mxu0 %vm310_vm1, %v11275_v15 }
 0x1c8   : > { %9051 = vmatmul.mubr.msk.f32.gmra.mrb[16].mxu0 %vm310_vm1, %v11284_v18 }
 0x1c9   : > { %9053 = vmatprep.mubr.msk.f32.mxu0 %vm310_vm1, %v11286_v19 }
 0x1cc   : > { %9054 = vmatmul.mubr.msk.f32.gmra.mrb[18].mxu0 %vm310_vm1, %v11293_v21 }
 0x1cd   : > { %9056 = vmatprep.mubr.msk.f32.mxu0 %vm310_vm1, %v11295_v22  ;;  %v12012_v13 = vpop.f32.mrb[0].mxu1 }
 0x1ce   : > { %v12014_v15 = vpop.f32.mrb[1].mxu1  ;;  %v788_v42 = vadd.f32 %v12012_v13, %v12121_v37 }
 0x1d0   : > { %9057 = vmatmul.mubr.msk.f32.gmra.mrb[20].mxu0 %vm310_vm1, %v11304_v25 }
 0x1d1   : > { %9059 = vmatprep.mubr.msk.f32.mxu0 %vm310_vm1, %v11306_v26 }
 0x1d4   : > { %9060 = vmatmul.mubr.msk.f32.gmra.mrb[22].mxu0 %vm310_vm1, %v11313_v34 }
 0x1d5   : > { %9062 = vmatprep.mubr.msk.f32.mxu0 %vm310_vm1, %v11315_v35 }
 0x1d8   : > { %9063 = vmatmul.mubr.msk.f32.gmra.mrb[24].mxu0 %vm310_vm1, %v11324_v38 }
 0x1d9   : > { %9065 = vmatprep.mubr.msk.f32.mxu0 %vm310_vm1, %v11326_v39 }
 0x1dc   : > { %9066 = vmatmul.mubr.msk.f32.gmra.mrb[26].mxu0 %vm310_vm1, %v11332_v41 }
 0x1dd   : > { %9068 = vmatprep.mubr.msk.f32.mxu0 %vm310_vm1, %v11670_v30  ;;  %v4320_v30 = vld [vmem:[%s13524_s3 + $0x20] sm:$0xff] }
 0x1e0   : > { %9069 = vmatmul.mubr.msk.f32.gmra.mrb[28].mxu0 %vm310_vm1, %v11676_v31  ;;  %v4321_v31 = vld [vmem:[%s13524_s3 + $0x28] sm:$0xff] }
 0x1e1   : > { %9071 = vmatprep.mubr.msk.f32.mxu0 %vm310_vm1, %v3190_v51  ;;  %v787_v51 = vadd.f32 %v12121_v37, %v12014_v15 }
 0x1e4   : > { %9072 = vmatmul.mubr.msk.f32.gmra.mrb[30].mxu0 %vm310_vm1, %v3191_v53 }
 0x1e5   : > { %9076 = vmatprep.mubr.msk.f32.mxu0 %vm310_vm1, %v11351_v49 }
 0x1e8   : > { %9077 = vmatmul.mubr.msk.f32.vlgmr.msra.gmra.mrb[0].mxu0 %vm310_vm1, %v11359_v50 }
 0x1e9   : > { %9079 = vmatprep.mubr.msk.f32.mxu0 %vm310_vm1, %v11361_v52 }
 0x1ec   : > { %9080 = vmatmul.mubr.msk.f32.gmra.mrb[2].mxu0 %vm310_vm1, %v11367_v29 }
 0x1ed   : > { %9082 = vmatprep.mubr.msk.f32.mxu0 %vm310_vm1, %v11369_v54 }
 0x1f0   : > { %9083 = vmatmul.mubr.msk.f32.gmra.mrb[4].mxu0 %vm310_vm1, %v11375_v56 }
 0x1f1   : > { %9085 = vmatprep.mubr.msk.f32.mxu0 %vm310_vm1, %v11377_v57 }
 0x1f4   : > { %9086 = vmatmul.mubr.msk.f32.gmra.mrb[6].mxu0 %vm310_vm1, %v11383_v59 }
 0x1f5   : > { %9088 = vmatprep.mubr.msk.f32.mxu0 %vm310_vm1, %v11385_v61 }
 0x1f8   : > { %9089 = vmatmul.mubr.msk.f32.gmra.mrb[8].mxu0 %vm310_vm1, %v11391_v62 }
 0x1f9   : > { %9091 = vmatprep.mubr.msk.f32.mxu0 %vm310_vm1, %v11393_v63 }
 0x1fc   : > { %9092 = vmatmul.mubr.msk.f32.gmra.mrb[10].mxu0 %vm310_vm1, %v11399_v0 }
 0x1fd   : > { %9094 = vmatprep.mubr.msk.f32.mxu0 %vm310_vm1, %v11401_v2 }
 0x200   : > { %9095 = vmatmul.mubr.msk.f32.gmra.mrb[12].mxu0 %vm310_vm1, %v11407_v4 }
 0x201   : > { %9097 = vmatprep.mubr.msk.f32.mxu0 %vm310_vm1, %v11409_v5 }
 0x204   : > { %9098 = vmatmul.mubr.msk.f32.gmra.mrb[14].mxu0 %vm310_vm1, %v11415_v6 }
 0x205   : > { %9100 = vmatprep.mubr.msk.f32.mxu0 %vm310_vm1, %v11417_v8 }
 0x208   : > { %9101 = vmatmul.mubr.msk.f32.gmra.mrb[16].mxu0 %vm310_vm1, %v11423_v10 }
 0x209   : > { %9103 = vmatprep.mubr.msk.f32.mxu0 %vm310_vm1, %v11425_v11 }
 0x20c   : > { %9104 = vmatmul.mubr.msk.f32.gmra.mrb[18].mxu0 %vm310_vm1, %v11431_v12  ;;  %v4316_v12 = vld [vmem:[%s13524_s3] sm:$0xff] }
 0x20d   : > { %9106 = vmatprep.mubr.msk.f32.mxu0 %vm310_vm1, %v11433_v14  ;;  %v4317_v14 = vld [vmem:[%s13524_s3 + $0x8] sm:$0xff] }
 0x210   : > { %9107 = vmatmul.mubr.msk.f32.gmra.mrb[20].mxu0 %vm310_vm1, %v11439_v16  ;;  %v9712_v16 = vpack.c.bf16 %v4317_v14, %v4316_v12 }
 0x211   : > { %9109 = vmatprep.mubr.msk.f32.mxu0 %vm310_vm1, %v11441_v17  ;;  %v4318_v17 = vld [vmem:[%s13524_s3 + $0x10] sm:$0xff] }
 0x212   : > { %9713 = vmatprep.subr.bf16.mxu1 %v9712_v16 }
 0x213   : > { %9715 = vmatpush3.bf16.msra.mxu1 %v9712_v16 }
 0x214   : > { %9110 = vmatmul.mubr.msk.f32.gmra.mrb[22].mxu0 %vm310_vm1, %v11447_v20  ;;  %v4319_v20 = vld [vmem:[%s13524_s3 + $0x18] sm:$0xff] }
 0x215   : > { %9112 = vmatprep.mubr.msk.f32.mxu0 %vm310_vm1, %v13648_v33  ;;  %v9716_v46 = vpack.c.bf16 %v4319_v20, %v4318_v17  ;;  %v9720_v33 = vpack.c.bf16 %v4321_v31, %v4320_v30 }
 0x217   : > { %9717 = vmatprep.subr.bf16.mxu1 %v9716_v46 }
 0x218   : > { %9113 = vmatmul.mubr.msk.f32.gmra.mrb[24].mxu0 %vm310_vm1, %v13680_v55  ;;  %9719 = vmatpush3.bf16.msra.mxu1 %v9716_v46  ;;  %v4330_v55 = vld [vmem:[%s13524_s3 + $0x70] sm:$0xff] }
 0x219   : > { %9115 = vmatprep.mubr.msk.f32.mxu0 %vm310_vm1, %v13681_v58  ;;  %9721 = vmatprep.subr.bf16.mxu1 %v9720_v33  ;;  %v4331_v58 = vld [vmem:[%s13524_s3 + $0x78] sm:$0xff] }
 0x21c   : > { %9116 = vmatmul.mubr.msk.f32.gmra.mrb[26].mxu0 %vm310_vm1, %v13682_v60  ;;  %9723 = vmatpush3.bf16.msra.mxu1 %v9720_v33 }
 0x21d   : > { %9118 = vmatprep.mubr.msk.f32.mxu0 %vm310_vm1, %v13683_v1  ;;  %9725 = vmatprep.subr.bf16.mxu1 %v9724_v43 }
 0x220   : > { %9119 = vmatmul.mubr.msk.f32.gmra.mrb[28].mxu0 %vm310_vm1, %v13684_v7  ;;  %9727 = vmatpush3.bf16.msra.mxu1 %v9724_v43  ;;  %v9740_v7 = vpack.c.bf16 %v4331_v58, %v4330_v55 }
 0x221   : > { %9121 = vmatprep.mubr.msk.f32.mxu0 %vm310_vm1, %v3580_v3  ;;  %9729 = vmatprep.subr.bf16.mxu1 %v9728_v40 }
 0x224   : > { %9122 = vmatmul.mubr.msk.f32.gmra.mrb[30].mxu0 %vm310_vm1, %v3581_v9  ;;  %9731 = vmatpush3.bf16.msra.mxu1 %v9728_v40 }
 0x225   : > { %9733 = vmatprep.subr.bf16.mxu1 %v9732_v28 }
 0x228   : > { %9735 = vmatpush3.bf16.msra.mxu1 %v9732_v28 }
 0x229   : > { %9737 = vmatprep.subr.bf16.mxu1 %v9736_v36 }
 0x22c   : > { %9739 = vmatpush3.bf16.msra.mxu1 %v9736_v36  ;;  %v4814_v36 = vld [vmem:[%s13524_s3 + $0x88] sm:$0xff] }
 0x22d   : > { %9741 = vmatprep.subr.bf16.mxu1 %v9740_v7 }
 0x230   : > { %9743 = vmatpush3.bf16.msra.mxu1 %v9740_v7 }
 0x232   : > { %v12016_v18 = vpop.f32.mrb[2].mxu1 }
 0x233   : > { %v12018_v19 = vpop.f32.mrb[3].mxu1  ;;  %v790_v1 = vadd.f32 %v12016_v18, %v12121_v37 }
 0x234   : > { %v789_v13 = vadd.f32 %v12121_v37, %v12018_v19 }
 0x236   : > { %v12020_v21 = vpop.f32.mrb[4].mxu1 }
 0x237   : > { %v12022_v22 = vpop.f32.mrb[5].mxu1  ;;  %v792_v20 = vadd.f32 %v12020_v21, %v12121_v37 }
 0x238   : > { %v791_v46 = vadd.f32 %v12121_v37, %v12022_v22 }
 0x23a   : > { %v12024_v25 = vpop.f32.mrb[6].mxu1 }
 0x23b   : > { %v12026_v26 = vpop.f32.mrb[7].mxu1  ;;  %v794_v48 = vadd.f32 %v12024_v25, %v12121_v37 }
 0x23c   : > { %v793_v22 = vadd.f32 %v12121_v37, %v12026_v26 }
 0x23e   : > { %v12028_v34 = vpop.f32.mrb[8].mxu1 }
 0x23f   : > { %v12030_v35 = vpop.f32.mrb[9].mxu1  ;;  %v796_v27 = vadd.f32 %v12028_v34, %v12121_v37 }
 0x240   : > { %v795_v23 = vadd.f32 %v12121_v37, %v12030_v35 }
 0x242   : > { %v12032_v38 = vpop.f32.mrb[10].mxu1 }
 0x243   : > { %v12034_v39 = vpop.f32.mrb[11].mxu1  ;;  %v798_v7 = vadd.f32 %v12032_v38, %v12121_v37 }
 0x246   : > { %v12036_v41 = vpop.f32.mrb[12].mxu1 }
 0x247   : > { %v12038_v49 = vpop.f32.mrb[13].mxu1 }
 0x24a   : > { %v12040_v50 = vpop.f32.mrb[14].mxu1 }
 0x24b   : > { %v12042_v52 = vpop.f32.mrb[15].mxu1 }
 0x24e   : > { %v12044_v29 = vpop.f32.mrb[16].mxu1 }
 0x24f   : > { %v12046_v54 = vpop.f32.mrb[17].mxu1 }
 0x252   : > { %v12048_v56 = vpop.f32.mrb[18].mxu1 }
 0x253   : > { %v12050_v57 = vpop.f32.mrb[19].mxu1 }
 0x256   : > { %v12052_v59 = vpop.f32.mrb[20].mxu1 }
 0x257   : > { %v12054_v61 = vpop.f32.mrb[21].mxu1 }
 0x25a   : > { %v12056_v62 = vpop.f32.mrb[22].mxu1 }
 0x25b   : > { %v12058_v63 = vpop.f32.mrb[23].mxu1 }
 0x25e   : > { %v12060_v0 = vpop.f32.mrb[24].mxu1 }
 0x25f   : > { %v12062_v2 = vpop.f32.mrb[25].mxu1 }
 0x262   : > { %v12064_v4 = vpop.f32.mrb[26].mxu1 }
 0x263   : > { %v12066_v5 = vpop.f32.mrb[27].mxu1 }
 0x266   : > { %v12068_v6 = vpop.f32.mrb[28].mxu1 }
 0x267   : > { %v12070_v8 = vpop.f32.mrb[29].mxu1 }
 0x26a   : > { %v12072_v10 = vpop.f32.mrb[30].mxu1 }
 0x26b   : > { %v12074_v11 = vpop.f32.mrb[31].mxu1 }
 0x2bb   : > { %v9078_v53 = vpop.f32.mrb[0].mxu0 }
 0x2bc   : > { %v10001_v60 = vadd.f32 %v9078_v53, %v788_v42  ;;  %v3749_v3 = vpop.f32.mrb[1].mxu0 }
 0x2bd   : > { %v10003_v9 = vadd.f32 %v3749_v3, %v787_v51  ;;  %v12165_v51 = vpack.c.bf16 %v4814_v36, %v4813_v24 }
 0x2be   : > { %v3941_v15 = vmax.f32 %v10001_v60, 0.0 }
 0x2bf   : > { %v3940_v12 = vmax.f32 %v10003_v9, 0.0  ;;  %v9081_v14 = vpop.f32.mrb[2].mxu0  ;;  %9745 = vmatprep.subr.bf16.mxu1 %v12165_v51 }
 0x2c0   : > { %3975 = vst.msk [vmem:[#allocation3 + $0x21] sm:$0xff] %vm3973_vm3, %v3941_v15  ;;  %v10005_v16 = vadd.f32 %v9081_v14, %v790_v1  ;;  %v3759_v17 = vpop.f32.mrb[3].mxu0  ;;  %v797_v15 = vadd.f32 %v12121_v37, %v12034_v39 }
 0x2c1   : > { %3974 = vst.msk [vmem:[#allocation3 + $0x19] sm:$0xff] %vm3973_vm3, %v3940_v12  ;;  %v10007_v18 = vadd.f32 %v3759_v17, %v789_v13 }
 0x2c2   : > { %v3943_v30 = vmax.f32 %v10005_v16, 0.0 }
 0x2c3   : > { %v3942_v19 = vmax.f32 %v10007_v18, 0.0  ;;  %v9084_v31 = vpop.f32.mrb[4].mxu0 }
 0x2c4   : > { %3977 = vst.msk [vmem:[#allocation3 + $0x39] sm:$0xff] %vm3973_vm3, %v3943_v30  ;;  %4007 = vst.msk [vmem:[#allocation3 + $0x9] sm:$0xff] %vm3973_vm3, %v3943_v30  ;;  %v10009_v33 = vadd.f32 %v9084_v31, %v792_v20  ;;  %v3769_v45 = vpop.f32.mrb[5].mxu0 }
 0x2c5   : > { %3976 = vst.msk [vmem:[#allocation3 + $0x31] sm:$0xff] %vm3973_vm3, %v3942_v19  ;;  %4006 = vst.msk [vmem:[#allocation3 + $0x1] sm:$0xff] %vm3973_vm3, %v3942_v19  ;;  %v10011_v21 = vadd.f32 %v3769_v45, %v791_v46 }
 0x2c6   : > { %v3945_v43 = vmax.f32 %v10009_v33, 0.0 }
 0x2c7   : > { %v4049_v32 = vld [vmem:[#allocation3 + $0x27] sm:$0x1]  ;;  %v3944_v47 = vmax.f32 %v10011_v21, 0.0  ;;  %v9087_v40 = vpop.f32.mrb[6].mxu0  ;;  %v800_v21 = vadd.f32 %v12036_v41, %v12121_v37 }
 0x2c8   : > { %4067 = vst.msk [vmem:[#allocation3 + $0x29] sm:$0x1] %vm4029_vm4, %v4049_v32  ;;  %v4012_v25 = vld [vmem:[#allocation3 + $0x1a] sm:$0x1]  ;;  %v10013_v44 = vadd.f32 %v9087_v40, %v794_v48  ;;  %v3779_v28 = vpop.f32.mrb[7].mxu0  ;;  %v4127_v38 = vld [vmem:[#allocation3 + $0x21] sm:$0xff]  ;;  %v799_v32 = vadd.f32 %v12121_v37, %v12038_v49 }
 0x2c9   : > { %3979 = vst.msk [vmem:[#allocation3 + $0x51] sm:$0xff] %vm3973_vm3, %v3945_v43  ;;  %3978 = vst.msk [vmem:[#allocation3 + $0x49] sm:$0xff] %vm3973_vm3, %v3944_v47  ;;  %v10015_v26 = vadd.f32 %v3779_v28, %v793_v22  ;;  %v4126_v31 = vld [vmem:[#allocation3 + $0x19] sm:$0xff] }
 0x2ca   : > { %4031 = vst.msk [vmem:[#allocation3 + $0x18] sm:$0x1] %vm4029_vm4, %v4012_v25  ;;  %v3947_v42 = vmax.f32 %v10013_v44, 0.0  ;;  %v10535_v24 = vpack.i.bf16 %v4127_v38, %v4126_v31 }
 0x2cb   : > { %v4048_v53 = vld [vmem:[#allocation3 + $0xf] sm:$0x1]  ;;  %v4050_v55 = vld [vmem:[#allocation3 + $0x3f] sm:$0x1]  ;;  %v3946_v58 = vmax.f32 %v10015_v26, 0.0  ;;  %v9090_v60 = vpop.f32.mrb[8].mxu0 }
 0x2cc   : > { %4066 = vst.msk [vmem:[#allocation3 + $0x11] sm:$0x1] %vm4029_vm4, %v4048_v53  ;;  %4068 = vst.msk [vmem:[#allocation3 + $0x41] sm:$0x1] %vm4029_vm4, %v4050_v55  ;;  %v4011_v34 = vld [vmem:[#allocation3 + $0x2] sm:$0x1]  ;;  %v10017_v35 = vadd.f32 %v9090_v60, %v796_v27  ;;  %v801_v53 = vadd.f32 %v12121_v37, %v12042_v52  ;;  %v804_v52 = vadd.f32 %v12044_v29, %v12121_v37 }
 0x2cd   : > { %v4013_v1 = vld [vmem:[#allocation3 + $0x32] sm:$0x1]  ;;  %3981 = vst.msk [vmem:[#allocation3 + $0x69] sm:$0xff] %vm3973_vm3, %v3947_v42  ;;  %v3789_v3 = vpop.f32.mrb[9].mxu0  ;;  %v4124_v9 = vld [vmem:[#allocation3 + $0x1] sm:$0xff]  ;;  %3980 = vst.msk [vmem:[#allocation3 + $0x61] sm:$0xff] %vm3973_vm3, %v3946_v58 }
 0x2ce   : > { %4032 = vst.msk [vmem:[#allocation3 + $0x30] sm:$0x1] %vm4029_vm4, %v4013_v1  ;;  %4030 = vst.msk [vmem:[#allocation3] sm:$0x1] %vm4029_vm4, %v4011_v34  ;;  %v10019_v13 = vadd.f32 %v3789_v3, %v795_v23  ;;  %v4125_v12 = vld [vmem:[#allocation3 + $0x9] sm:$0xff]  ;;  %v4128_v14 = vld [vmem:[#allocation3 + $0x31] sm:$0xff]  ;;  %v802_v23 = vadd.f32 %v12040_v50, %v12121_v37 }
 0x2cf   : > { %v4129_v16 = vld [vmem:[#allocation3 + $0x39] sm:$0xff]  ;;  %v3949_v17 = vmax.f32 %v10017_v35, 0.0  ;;  %v10530_v20 = vpack.i.bf16 %v4125_v12, %v4124_v9  ;;  %v9093_v19 = vpop.f32.mrb[10].mxu0 }
 0x2d0   : > { %v12178_v18 = vpack.i.bf16 %v4129_v16, %v4128_v14  ;;  %v4051_v46 = vld [vmem:[#allocation3 + $0x57] sm:$0x1]  ;;  %v3948_v30 = vmax.f32 %v10019_v13, 0.0  ;;  %v4014_v45 = vld [vmem:[#allocation3 + $0x4a] sm:$0x1]  ;;  %v10021_v48 = vadd.f32 %v9093_v19, %v798_v7  ;;  %v3799_v39 = vpop.f32.mrb[11].mxu0 }
 0x2d1   : > { %v4131_v33 = vld [vmem:[#allocation3 + $0x51] sm:$0xff]  ;;  %4069 = vst.msk [vmem:[#allocation3 + $0x59] sm:$0x1] %vm4029_vm4, %v4051_v46  ;;  %10531 = vrot.lane.b32.xlu0 %v10530_v20, %s10994_s18  ;;  %v4130_v22 = vld [vmem:[#allocation3 + $0x49] sm:$0xff]  ;;  %4033 = vst.msk [vmem:[#allocation3 + $0x48] sm:$0x1] %vm4029_vm4, %v4014_v45  ;;  %v10023_v43 = vadd.f32 %v3799_v39, %v797_v15  ;;  %v803_v15 = vadd.f32 %v12121_v37, %v12046_v54  ;;  %v806_v54 = vadd.f32 %v12048_v56, %v12121_v37 }
 0x2d2   : > { %3983 = vst.msk [vmem:[#allocation3 + $0x81] sm:$0xff] %vm3973_vm3, %v3949_v17  ;;  %10541 = vrot.lane.b32.xlu1 %v12178_v18, %s10994_s18  ;;  %3982 = vst.msk [vmem:[#allocation3 + $0x79] sm:$0xff] %vm3973_vm3, %v3948_v30  ;;  %v12191_v47 = vpack.i.bf16 %v4131_v33, %v4130_v22  ;;  %v3951_v40 = vmax.f32 %v10021_v48, 0.0  ;;  %v805_v33 = vadd.f32 %v12121_v37, %v12050_v57 }
 0x2d3   : > { %v3950_v44 = vmax.f32 %v10023_v43, 0.0  ;;  %v9096_v28 = vpop.f32.mrb[12].mxu0  ;;  %v808_v57 = vadd.f32 %v12052_v59, %v12121_v37 }
 0x2d4   : > { %v4052_v25 = vld [vmem:[#allocation3 + $0x6f] sm:$0x1]  ;;  %v4015_v41 = vld [vmem:[#allocation3 + $0x62] sm:$0x1]  ;;  %3985 = vst.msk [vmem:[#allocation3 + $0x99] sm:$0xff] %vm3973_vm3, %v3951_v40  ;;  %v10025_v26 = vadd.f32 %v9096_v28, %v800_v21  ;;  %v3809_v49 = vpop.f32.mrb[13].mxu0 }
 0x2d5   : > { %v4133_v27 = vld [vmem:[#allocation3 + $0x69] sm:$0xff]  ;;  %4070 = vst.msk [vmem:[#allocation3 + $0x71] sm:$0x1] %vm4029_vm4, %v4052_v25  ;;  %10536 = vrot.lane.b32.xlu0 %v10535_v24, %s10994_s18  ;;  %v4132_v36 = vld [vmem:[#allocation3 + $0x61] sm:$0xff]  ;;  %4034 = vst.msk [vmem:[#allocation3 + $0x60] sm:$0x1] %vm4029_vm4, %v4015_v41  ;;  %v10027_v42 = vadd.f32 %v3809_v49, %v799_v32 }
 0x2d6   : > { %10546 = vrot.lane.b32.xlu1 %v12191_v47, %s10994_s18  ;;  %3984 = vst.msk [vmem:[#allocation3 + $0x91] sm:$0xff] %vm3973_vm3, %v3950_v44  ;;  %v12204_v55 = vpack.i.bf16 %v4133_v27, %v4132_v36  ;;  %v3953_v58 = vmax.f32 %v10025_v26, 0.0  ;;  %v807_v44 = vadd.f32 %v12121_v37, %v12054_v61  ;;  %v810_v61 = vadd.f32 %v12056_v62, %v12121_v37 }
 0x2d7   : > { %v3952_v34 = vmax.f32 %v10027_v42, 0.0  ;;  %v9099_v1 = vpop.f32.mrb[14].mxu0 }
 0x2d8   : > { %3987 = vst.msk [vmem:[#allocation3 + $0xb1] sm:$0xff] %vm3973_vm3, %v3953_v58  ;;  %v10029_v50 = vadd.f32 %v9099_v1, %v802_v23  ;;  %v3819_v7 = vpop.f32.mrb[15].mxu0 }
 0x2d9   : > { %v4053_v60 = vld [vmem:[#allocation3 + $0x87] sm:$0x1]  ;;  %v4016_v3 = vld [vmem:[#allocation3 + $0x7a] sm:$0x1]  ;;  %10551 = vrot.lane.b32.xlu0 %v12204_v55, %s10994_s18  ;;  %3986 = vst.msk [vmem:[#allocation3 + $0xa9] sm:$0xff] %vm3973_vm3, %v3952_v34  ;;  %v10031_v13 = vadd.f32 %v3819_v7, %v801_v53 }
 0x2da   : > { %v4135_v35 = vld [vmem:[#allocation3 + $0x81] sm:$0xff]  ;;  %4071 = vst.msk [vmem:[#allocation3 + $0x89] sm:$0x1] %vm4029_vm4, %v4053_v60  ;;  %v4134_v9 = vld [vmem:[#allocation3 + $0x79] sm:$0xff]  ;;  %4035 = vst.msk [vmem:[#allocation3 + $0x78] sm:$0x1] %vm4029_vm4, %v4016_v3  ;;  %v809_v60 = vadd.f32 %v12121_v37, %v12058_v63  ;;  %v812_v63 = vadd.f32 %v12060_v0, %v12121_v37 }
 0x2db   : > { %v12216_v12 = vpack.i.bf16 %v4135_v35, %v4134_v9  ;;  %v3955_v14 = vmax.f32 %v10029_v50, 0.0  ;;  %v4054_v16 = vld [vmem:[#allocation3 + $0x9f] sm:$0x1]  ;;  %v3954_v17 = vmax.f32 %v10031_v13, 0.0  ;;  %v9102_v20 = vpop.f32.mrb[16].mxu0 }
 0x2dc   : > { %v4137_v38 = vld [vmem:[#allocation3 + $0x99] sm:$0xff]  ;;  %4072 = vst.msk [vmem:[#allocation3 + $0xa1] sm:$0x1] %vm4029_vm4, %v4054_v16  ;;  %v10033_v46 = vadd.f32 %v9102_v20, %v804_v52  ;;  %v3829_v30 = vpop.f32.mrb[17].mxu0 }
 0x2dd   : > { %10556 = vrot.lane.b32.xlu1 %v12216_v12, %s10994_s18  ;;  %v4017_v29 = vld [vmem:[#allocation3 + $0x92] sm:$0x1]  ;;  %3989 = vst.msk [vmem:[#allocation3 + $0xc9] sm:$0xff] %vm3973_vm3, %v3955_v14  ;;  %3988 = vst.msk [vmem:[#allocation3 + $0xc1] sm:$0xff] %vm3973_vm3, %v3954_v17  ;;  %v10035_v31 = vadd.f32 %v3829_v30, %v803_v15  ;;  %v811_v14 = vadd.f32 %v12121_v37, %v12062_v2  ;;  %v814_v2 = vadd.f32 %v12064_v4, %v12121_v37 }
 0x2de   : > { %v4136_v19 = vld [vmem:[#allocation3 + $0x91] sm:$0xff]  ;;  %4036 = vst.msk [vmem:[#allocation3 + $0x90] sm:$0x1] %vm4029_vm4, %v4017_v29  ;;  %v3957_v48 = vmax.f32 %v10033_v46, 0.0 }
 0x2df   : > { %v12228_v45 = vpack.i.bf16 %v4137_v38, %v4136_v19  ;;  %v4055_v39 = vld [vmem:[#allocation3 + $0xb7] sm:$0x1]  ;;  %v3956_v21 = vmax.f32 %v10035_v31, 0.0  ;;  %v9105_v22 = vpop.f32.mrb[18].mxu0 }
 0x2e0   : > { %v4139_v43 = vld [vmem:[#allocation3 + $0xb1] sm:$0xff]  ;;  %4073 = vst.msk [vmem:[#allocation3 + $0xb9] sm:$0x1] %vm4029_vm4, %v4055_v39  ;;  %v4018_v56 = vld [vmem:[#allocation3 + $0xaa] sm:$0x1]  ;;  %v10037_v32 = vadd.f32 %v9105_v22, %v806_v54  ;;  %v3839_v40 = vpop.f32.mrb[19].mxu0 }
 0x2e1   : > { %10561 = vrot.lane.b32.xlu0 %v12228_v45, %s10994_s18  ;;  %3991 = vst.msk [vmem:[#allocation3 + $0xe1] sm:$0xff] %vm3973_vm3, %v3957_v48  ;;  %v4138_v24 = vld [vmem:[#allocation3 + $0xa9] sm:$0xff]  ;;  %3990 = vst.msk [vmem:[#allocation3 + $0xd9] sm:$0xff] %vm3973_vm3, %v3956_v21  ;;  %v10039_v25 = vadd.f32 %v3839_v40, %v805_v33  ;;  %v813_v33 = vadd.f32 %v12121_v37, %v12066_v5  ;;  %v816_v5 = vadd.f32 %v12068_v6, %v12121_v37 }
 0x2e2   : > { %4037 = vst.msk [vmem:[#allocation3 + $0xa8] sm:$0x1] %vm4029_vm4, %v4018_v56  ;;  %v12240_v28 = vpack.i.bf16 %v4139_v43, %v4138_v24  ;;  %v3959_v27 = vmax.f32 %v10037_v32, 0.0 }
 0x2e3   : > { %v3958_v26 = vmax.f32 %v10039_v25, 0.0  ;;  %v9108_v49 = vpop.f32.mrb[20].mxu0  ;;  %v815_v25 = vadd.f32 %v12121_v37, %v12070_v8  ;;  %v818_v8 = vadd.f32 %v12072_v10, %v12121_v37 }
 0x2e4   : > { %v4056_v41 = vld [vmem:[#allocation3 + $0xcf] sm:$0x1]  ;;  %10566 = vrot.lane.b32.xlu1 %v12240_v28, %s10994_s18  ;;  %v4019_v59 = vld [vmem:[#allocation3 + $0xc2] sm:$0x1]  ;;  %3993 = vst.msk [vmem:[#allocation3 + $0xf9] sm:$0xff] %vm3973_vm3, %v3959_v27  ;;  %v10041_v36 = vadd.f32 %v9108_v49, %v808_v57  ;;  %v3849_v42 = vpop.f32.mrb[21].mxu0 }
 0x2e5   : > { %v4141_v23 = vld [vmem:[#allocation3 + $0xc9] sm:$0xff]  ;;  %4074 = vst.msk [vmem:[#allocation3 + $0xd1] sm:$0x1] %vm4029_vm4, %v4056_v41  ;;  %v4140_v53 = vld [vmem:[#allocation3 + $0xc1] sm:$0xff]  ;;  %4038 = vst.msk [vmem:[#allocation3 + $0xc0] sm:$0x1] %vm4029_vm4, %v4019_v59  ;;  %v10043_v58 = vadd.f32 %v3849_v42, %v807_v44 }
 0x2e6   : > { %3992 = vst.msk [vmem:[#allocation3 + $0xf1] sm:$0xff] %vm3973_vm3, %v3958_v26  ;;  %v12252_v34 = vpack.i.bf16 %v4141_v23, %v4140_v53  ;;  %v3961_v1 = vmax.f32 %v10041_v36, 0.0  ;;  %v817_v53 = vadd.f32 %v12121_v37, %v12074_v11 }
 0x2e7   : > { %v3960_v3 = vmax.f32 %v10043_v58, 0.0  ;;  %v9111_v50 = vpop.f32.mrb[22].mxu0 }
 0x2e8   : > { %v4057_v35 = vld [vmem:[#allocation3 + $0xe7] sm:$0x1]  ;;  %10571 = vrot.lane.b32.xlu0 %v12252_v34, %s10994_s18  ;;  %v4020_v62 = vld [vmem:[#allocation3 + $0xda] sm:$0x1]  ;;  %3995 = vst.msk [vmem:[#allocation3 + $0x111] sm:$0xff] %vm3973_vm3, %v3961_v1  ;;  %v10045_v52 = vadd.f32 %v9111_v50, %v810_v61  ;;  %v3859_v9 = vpop.f32.mrb[23].mxu0 }
 0x2e9   : > { %v4143_v7 = vld [vmem:[#allocation3 + $0xe1] sm:$0xff]  ;;  %4075 = vst.msk [vmem:[#allocation3 + $0xe9] sm:$0x1] %vm4029_vm4, %v4057_v35  ;;  %v4142_v13 = vld [vmem:[#allocation3 + $0xd9] sm:$0xff]  ;;  %4039 = vst.msk [vmem:[#allocation3 + $0xd8] sm:$0x1] %vm4029_vm4, %v4020_v62  ;;  %v10047_v15 = vadd.f32 %v3859_v9, %v809_v60 }
 0x2ea   : > { %3994 = vst.msk [vmem:[#allocation3 + $0x109] sm:$0xff] %vm3973_vm3, %v3960_v3  ;;  %v12264_v16 = vpack.i.bf16 %v4143_v7, %v4142_v13  ;;  %v3963_v17 = vmax.f32 %v10045_v52, 0.0 }
 0x2eb   : > { %v4058_v20 = vld [vmem:[#allocation3 + $0xff] sm:$0x1]  ;;  %v3962_v38 = vmax.f32 %v10047_v15, 0.0  ;;  %v9114_v29 = vpop.f32.mrb[24].mxu0 }
 0x2ec   : > { %10576 = vrot.lane.b32.xlu1 %v12264_v16, %s10994_s18  ;;  %v4145_v46 = vld [vmem:[#allocation3 + $0xf9] sm:$0xff]  ;;  %4076 = vst.msk [vmem:[#allocation3 + $0x101] sm:$0x1] %vm4029_vm4, %v4058_v20  ;;  %v10049_v30 = vadd.f32 %v9114_v29, %v812_v63  ;;  %v3869_v54 = vpop.f32.mrb[25].mxu0 }
 0x2ed   : > { %v4021_v0 = vld [vmem:[#allocation3 + $0xf2] sm:$0x1]  ;;  %3997 = vst.msk [vmem:[#allocation3 + $0x129] sm:$0xff] %vm3973_vm3, %v3963_v17  ;;  %3996 = vst.msk [vmem:[#allocation3 + $0x121] sm:$0xff] %vm3973_vm3, %v3962_v38  ;;  %v10051_v31 = vadd.f32 %v3869_v54, %v811_v14  ;;  %v12320_v38 = vld [vmem:[#allocation3 + $0x18] sm:$0xff] }
 0x2ee   : > { %v4144_v19 = vld [vmem:[#allocation3 + $0xf1] sm:$0xff]  ;;  %4040 = vst.msk [vmem:[#allocation3 + $0xf0] sm:$0x1] %vm4029_vm4, %v4021_v0  ;;  %v3965_v39 = vmax.f32 %v10049_v30, 0.0  ;;  %v12322_v29 = vld [vmem:[#allocation3 + $0x20] sm:$0xff] }
 0x2ef   : > { %v12276_v48 = vpack.i.bf16 %v4145_v46, %v4144_v19  ;;  %v4059_v21 = vld [vmem:[#allocation3 + $0x117] sm:$0x1]  ;;  %v3964_v22 = vmax.f32 %v10051_v31, 0.0  ;;  %v9117_v43 = vpop.f32.mrb[26].mxu0  ;;  %v10610_v31 = vpack.i.bf16 %v12322_v29, %v12320_v38 }
 0x2f0   : > { %v4147_v56 = vld [vmem:[#allocation3 + $0x111] sm:$0xff]  ;;  %4077 = vst.msk [vmem:[#allocation3 + $0x119] sm:$0x1] %vm4029_vm4, %v4059_v21  ;;  %v10053_v32 = vadd.f32 %v9117_v43, %v814_v2  ;;  %v3879_v40 = vpop.f32.mrb[27].mxu0 }
 0x2f1   : > { %10581 = vrot.lane.b32.xlu0 %v12276_v48, %s10994_s18  ;;  %v4022_v4 = vld [vmem:[#allocation3 + $0x10a] sm:$0x1]  ;;  %3999 = vst.msk [vmem:[#allocation3 + $0x141] sm:$0xff] %vm3973_vm3, %v3965_v39  ;;  %3998 = vst.msk [vmem:[#allocation3 + $0x139] sm:$0xff] %vm3973_vm3, %v3964_v22  ;;  %v10055_v24 = vadd.f32 %v3879_v40, %v813_v33  ;;  %v12336_v21 = vld [vmem:[#allocation3 + $0x30] sm:$0xff] }
 0x2f2   : > { %v4146_v57 = vld [vmem:[#allocation3 + $0x109] sm:$0xff]  ;;  %4041 = vst.msk [vmem:[#allocation3 + $0x108] sm:$0x1] %vm4029_vm4, %v4022_v4  ;;  %v3967_v27 = vmax.f32 %v10053_v32, 0.0  ;;  %v12344_v4 = vld [vmem:[#allocation3 + $0x38] sm:$0xff] }
 0x2f3   : > { %v12288_v44 = vpack.i.bf16 %v4147_v56, %v4146_v57  ;;  %v3966_v26 = vmax.f32 %v10055_v24, 0.0  ;;  %v9120_v49 = vpop.f32.mrb[28].mxu0  ;;  %v12334_v39 = vld [vmem:[#allocation3 + $0x48] sm:$0xff]  ;;  %v12342_v56 = vld [vmem:[#allocation3 + $0x50] sm:$0xff]  ;;  %v10615_v40 = vpack.i.bf16 %v12344_v4, %v12336_v21  ;;  %v12353_v57 = vld [vmem:[#allocation3 + $0x60] sm:$0xff] }
 0x2f4   : > { %v4060_v41 = vld [vmem:[#allocation3 + $0x12f] sm:$0x1]  ;;  %v4023_v6 = vld [vmem:[#allocation3 + $0x122] sm:$0x1]  ;;  %4001 = vst.msk [vmem:[#allocation3 + $0x159] sm:$0xff] %vm3973_vm3, %v3967_v27  ;;  %v10057_v59 = vadd.f32 %v9120_v49, %v816_v5  ;;  %v3889_v36 = vpop.f32.mrb[29].mxu0  ;;  %v10620_v32 = vpack.i.bf16 %v12342_v56, %v12334_v39 }
 0x2f5   : > { %10586 = vrot.lane.b32.xlu1 %v12288_v44, %s10994_s18  ;;  %v4149_v23 = vld [vmem:[#allocation3 + $0x129] sm:$0xff]  ;;  %4078 = vst.msk [vmem:[#allocation3 + $0x131] sm:$0x1] %vm4029_vm4, %v4060_v41  ;;  %v4148_v42 = vld [vmem:[#allocation3 + $0x121] sm:$0xff]  ;;  %4042 = vst.msk [vmem:[#allocation3 + $0x120] sm:$0x1] %vm4029_vm4, %v4023_v6  ;;  %v10059_v61 = vadd.f32 %v3889_v36, %v815_v25 }
 0x2f6   : > { %4000 = vst.msk [vmem:[#allocation3 + $0x151] sm:$0xff] %vm3973_vm3, %v3966_v26  ;;  %v12300_v58 = vpack.i.bf16 %v4149_v23, %v4148_v42  ;;  %v3969_v60 = vmax.f32 %v10057_v59, 0.0  ;;  %v12351_v5 = vld [vmem:[#allocation3 + $0x78] sm:$0xff]  ;;  %v12357_v24 = vld [vmem:[#allocation3 + $0x80] sm:$0xff]  ;;  %v12359_v25 = vld [vmem:[#allocation3 + $0x68] sm:$0xff] }
 0x2f7   : > { %v3968_v35 = vmax.f32 %v10059_v61, 0.0  ;;  %v9123_v3 = vpop.f32.mrb[30].mxu0  ;;  %v10630_v27 = vpack.i.bf16 %v12357_v24, %v12351_v5  ;;  %v10625_v41 = vpack.i.bf16 %v12359_v25, %v12353_v57  ;;  %v12365_v26 = vld [vmem:[#allocation3 + $0xa8] sm:$0xff]  ;;  %v12367_v49 = vld [vmem:[#allocation3 + $0x90] sm:$0xff]  ;;  %v12373_v6 = vld [vmem:[#allocation3 + $0x98] sm:$0xff] }
 0x2f8   : > { %v4061_v1 = vld [vmem:[#allocation3 + $0x147] sm:$0x1]  ;;  %10591 = vrot.lane.b32.xlu0 %v12300_v58, %s10994_s18  ;;  %v4024_v10 = vld [vmem:[#allocation3 + $0x13a] sm:$0x1]  ;;  %4003 = vst.msk [vmem:[#allocation3 + $0x171] sm:$0xff] %vm3973_vm3, %v3969_v60  ;;  %4010 = vst.msk [vmem:[#allocation3 + $0x1a1] sm:$0xff] %vm3973_vm3, %v3969_v60  ;;  %v10061_v7 = vadd.f32 %v9123_v3, %v818_v8  ;;  %v10635_v36 = vpack.i.bf16 %v12373_v6, %v12367_v49 }
 0x2f9   : > { %v4151_v50 = vld [vmem:[#allocation3 + $0x141] sm:$0xff]  ;;  %4079 = vst.msk [vmem:[#allocation3 + $0x149] sm:$0x1] %vm4029_vm4, %v4061_v1  ;;  %v3899_v62 = vpop.f32.mrb[31].mxu0  ;;  %v4150_v11 = vld [vmem:[#allocation3 + $0x139] sm:$0xff]  ;;  %v12371_v23 = vld [vmem:[#allocation3 + $0xb0] sm:$0xff] }
 0x2fa   : > { %4043 = vst.msk [vmem:[#allocation3 + $0x138] sm:$0x1] %vm4029_vm4, %v4024_v10  ;;  %v10063_v37 = vadd.f32 %v3899_v62, %v817_v53  ;;  %v12310_v52 = vpack.i.bf16 %v4151_v50, %v4150_v11  ;;  %v3971_v9 = vmax.f32 %v10061_v7, 0.0  ;;  %v10640_v59 = vpack.i.bf16 %v12371_v23, %v12365_v26  ;;  %v12379_v8 = vld [vmem:[#allocation3 + $0xd8] sm:$0xff]  ;;  %v12381_v42 = vld [vmem:[#allocation3 + $0xc0] sm:$0xff]  ;;  %v12387_v53 = vld [vmem:[#allocation3 + $0xc8] sm:$0xff] }
 0x2fb   : > { %4002 = vst.msk [vmem:[#allocation3 + $0x169] sm:$0xff] %vm3973_vm3, %v3968_v35  ;;  %4009 = vst.msk [vmem:[#allocation3 + $0x199] sm:$0xff] %vm3973_vm3, %v3968_v35  ;;  %v4062_v63 = vld [vmem:[#allocation3 + $0x15f] sm:$0x1]  ;;  %v12385_v61 = vld [vmem:[#allocation3 + $0xe0] sm:$0xff]  ;;  %v10645_v1 = vpack.i.bf16 %v12387_v53, %v12381_v42 }
 0x2fc   : > { %v3970_v13 = vmax.f32 %v10063_v37, 0.0  ;;  %10596 = vrot.lane.b32.xlu1 %v12310_v52, %s10994_s18  ;;  %v4153_v15 = vld [vmem:[#allocation3 + $0x159] sm:$0xff]  ;;  %4080 = vst.msk [vmem:[#allocation3 + $0x161] sm:$0x1] %vm4029_vm4, %v4062_v63  ;;  %v10650_v60 = vpack.i.bf16 %v12385_v61, %v12379_v8  ;;  %v12393_v35 = vld [vmem:[#allocation3 + $0x108] sm:$0xff]  ;;  %v12395_v3 = vld [vmem:[#allocation3 + $0xf0] sm:$0xff] }
 0x2fd   : > { %v4025_v14 = vld [vmem:[#allocation3 + $0x152] sm:$0x1]  ;;  %4005 = vst.msk [vmem:[#allocation3 + $0x189] sm:$0xff] %vm3973_vm3, %v3971_v9  ;;  %v12401_v10 = vld [vmem:[#allocation3 + $0xf8] sm:$0xff]  ;;  %v12409_v37 = vld [vmem:[#allocation3 + $0x120] sm:$0xff] }
 0x2fe   : > { %v4152_v17 = vld [vmem:[#allocation3 + $0x151] sm:$0xff]  ;;  %4044 = vst.msk [vmem:[#allocation3 + $0x150] sm:$0x1] %vm4029_vm4, %v4025_v14  ;;  %v10655_v62 = vpack.i.bf16 %v12401_v10, %v12395_v3  ;;  %v12413_v9 = vld [vmem:[#allocation3 + $0x140] sm:$0xff]  ;;  %v12415_v63 = vld [vmem:[#allocation3 + $0x128] sm:$0xff] }
 0x2ff   : > { %4004 = vst.msk [vmem:[#allocation3 + $0x181] sm:$0xff] %vm3973_vm3, %v3970_v13  ;;  %v12318_v20 = vpack.i.bf16 %v4153_v15, %v4152_v17  ;;  %v4063_v46 = vld [vmem:[#allocation3 + $0x177] sm:$0x1]  ;;  %v4065_v0 = vld [vmem:[#allocation3 + $0x1a7] sm:$0x1]  ;;  %v10665_v15 = vpack.i.bf16 %v12415_v63, %v12409_v37 }
 0x300   : > { %v4155_v30 = vld [vmem:[#allocation3 + $0x171] sm:$0xff]  ;;  %4081 = vst.msk [vmem:[#allocation3 + $0x179] sm:$0x1] %vm4029_vm4, %v4063_v46  ;;  %4083 = vst.msk [vmem:[#allocation3 + $0x1a9] sm:$0x1] %vm4029_vm4, %v4065_v0 }
 0x301   : > { %10601 = vrot.lane.b32.xlu0 %v12318_v20, %s10994_s18  ;;  %v12399_v50 = vld [vmem:[#allocation3 + $0x110] sm:$0xff]  ;;  %v12407_v11 = vld [vmem:[#allocation3 + $0x138] sm:$0xff] }
 0x302   : > { %v4026_v54 = vld [vmem:[#allocation3 + $0x16a] sm:$0x1]  ;;  %v4028_v2 = vld [vmem:[#allocation3 + $0x19a] sm:$0x1]  ;;  %v10660_v7 = vpack.i.bf16 %v12399_v50, %v12393_v35  ;;  %v10670_v13 = vpack.i.bf16 %v12413_v9, %v12407_v11  ;;  %v12429_v0 = vld [vmem:[#allocation3 + $0x170] sm:$0xff] }
 0x303   : > { %v4154_v19 = vld [vmem:[#allocation3 + $0x169] sm:$0xff]  ;;  %4045 = vst.msk [vmem:[#allocation3 + $0x168] sm:$0x1] %vm4029_vm4, %v4026_v54  ;;  %4047 = vst.msk [vmem:[#allocation3 + $0x198] sm:$0x1] %vm4029_vm4, %v4028_v2  ;;  %v12427_v46 = vld [vmem:[#allocation3 + $0x158] sm:$0xff] }
 0x304   : > { %v12332_v33 = vpack.i.bf16 %v4155_v30, %v4154_v19  ;;  %v4064_v22 = vld [vmem:[#allocation3 + $0x18f] sm:$0x1]  ;;  %v12435_v2 = vld [vmem:[#allocation3 + $0x22] sm:$0xff] }
 0x305   : > { %10611 = vrot.lane.b32.xlu0 %v10610_v31, %s10994_s18  ;;  %4082 = vst.msk [vmem:[#allocation3 + $0x191] sm:$0x1] %vm4029_vm4, %v4064_v22  ;;  %v12421_v14 = vld [vmem:[#allocation3 + $0x150] sm:$0xff]  ;;  %v12439_v31 = vld [vmem:[#allocation3 + $0x1a] sm:$0xff] }
 0x306   : > { %10606 = vrot.lane.b32.xlu1 %v12332_v33, %s10994_s18  ;;  %v4027_v43 = vld [vmem:[#allocation3 + $0x182] sm:$0x1]  ;;  %v10675_v30 = vpack.i.bf16 %v12427_v46, %v12421_v14  ;;  %v4652_v22 = vld [vmem:[#allocation3 + $0x188] sm:$0xff] }
 0x307   : > { %4046 = vst.msk [vmem:[#allocation3 + $0x180] sm:$0x1] %vm4029_vm4, %v4027_v43  ;;  %v10690_v43 = vpack.i.bf16 %v12435_v2, %v12439_v31 }
 0x309   : > { %10621 = vrot.lane.b32.xlu0 %v10620_v32, %s10994_s18 }
 0x30a   : > { %10616 = vrot.lane.b32.xlu1 %v10615_v40, %s10994_s18  ;;  %v12423_v17 = vld [vmem:[#allocation3 + $0x168] sm:$0xff]  ;;  %v12443_v40 = vld [vmem:[#allocation3 + $0x52] sm:$0xff] }
 0x30b   : > { %v10680_v54 = vpack.i.bf16 %v12429_v0, %v12423_v17  ;;  %13685 = vst [vmem:[#allocation15_spill] sm:$0xff] %v12443_v40 }
 0x30d   : > { %10631 = vrot.lane.b32.xlu0 %v10630_v27, %s10994_s18  ;;  %v12445_v27 = vld [vmem:[#allocation3 + $0x3a] sm:$0xff] }
 0x30e   : > { %10626 = vrot.lane.b32.xlu1 %v10625_v41, %s10994_s18  ;;  %v4651_v19 = vld [vmem:[#allocation3 + $0x180] sm:$0xff]  ;;  %13686 = vst [vmem:[#allocation13_spill] sm:$0xff] %v12445_v27  ;;  %v12449_v41 = vld [vmem:[#allocation3 + $0x4a] sm:$0xff] }
 0x30f   : > { %v10685_v32 = vpack.i.bf16 %v4652_v22, %v4651_v19  ;;  %13687 = vst [vmem:[#allocation16_spill] sm:$0xff] %v12449_v41  ;;  %v12473_v19 = vld [vmem:[#allocation3 + $0x9a] sm:$0xff]  ;;  %v12477_v22 = vld [vmem:[#allocation3 + $0xaa] sm:$0xff] }
 0x310   : > { %13693 = vst [vmem:[#allocation21_spill] sm:$0xff] %v12473_v19  ;;  %13694 = vst [vmem:[#allocation22_spill] sm:$0xff] %v12477_v22 }
 0x311   : > { %10641 = vrot.lane.b32.xlu0 %v10640_v59, %s10994_s18  ;;  %v12451_v59 = vld [vmem:[#allocation3 + $0x32] sm:$0xff] }
 0x312   : > { %10636 = vrot.lane.b32.xlu1 %v10635_v36, %s10994_s18  ;;  %v10700_v36 = vpack.i.bf16 %v12443_v40, %v12449_v41 }
 0x315   : > { %10651 = vrot.lane.b32.xlu0 %v10650_v60, %s10994_s18  ;;  %v10695_v60 = vpack.i.bf16 %v12445_v27, %v12451_v59 }
 0x316   : > { %10646 = vrot.lane.b32.xlu1 %v10645_v1, %s10994_s18  ;;  %v12457_v1 = vld [vmem:[#allocation3 + $0x82] sm:$0xff] }
 0x317   : > { %13688 = vst [vmem:[#allocation17_spill] sm:$0xff] %v12457_v1 }
 0x319   : > { %10661 = vrot.lane.b32.xlu0 %v10660_v7, %s10994_s18  ;;  %v12459_v7 = vld [vmem:[#allocation3 + $0x6a] sm:$0xff] }
 0x31a   : > { %10656 = vrot.lane.b32.xlu1 %v10655_v62, %s10994_s18  ;;  %13689 = vst [vmem:[#allocation14_spill] sm:$0xff] %v12459_v7  ;;  %v12463_v62 = vld [vmem:[#allocation3 + $0x7a] sm:$0xff] }
 0x31b   : > { %13690 = vst [vmem:[#allocation18_spill] sm:$0xff] %v12463_v62 }
 0x31d   : > { %10671 = vrot.lane.b32.xlu0 %v10670_v13, %s10994_s18  ;;  %v12465_v13 = vld [vmem:[#allocation3 + $0x62] sm:$0xff] }
 0x31e   : > { %10666 = vrot.lane.b32.xlu1 %v10665_v15, %s10994_s18  ;;  %13691 = vst [vmem:[#allocation19_spill] sm:$0xff] %v12465_v13  ;;  %v10710_v15 = vpack.i.bf16 %v12457_v1, %v12463_v62  ;;  %v12487_v1 = vld [vmem:[#allocation3 + $0xca] sm:$0xff] }
 0x31f   : > { %13697 = vst [vmem:[#allocation25_spill] sm:$0xff] %v12487_v1 }
 0x321   : > { %10681 = vrot.lane.b32.xlu0 %v10680_v54, %s10994_s18  ;;  %v12471_v54 = vld [vmem:[#allocation3 + $0xb2] sm:$0xff] }
 0x322   : > { %10676 = vrot.lane.b32.xlu1 %v10675_v30, %s10994_s18  ;;  %v10705_v30 = vpack.i.bf16 %v12459_v7, %v12465_v13  ;;  %13692 = vst [vmem:[#allocation20_spill] sm:$0xff] %v12471_v54 }
 0x325   : > { %10691 = vrot.lane.b32.xlu0 %v10690_v43, %s10994_s18  ;;  %v12479_v43 = vld [vmem:[#allocation3 + $0x92] sm:$0xff] }
 0x326   : > { %10686 = vrot.lane.b32.xlu1 %v10685_v32, %s10994_s18  ;;  %13695 = vst [vmem:[#allocation23_spill] sm:$0xff] %v12479_v43  ;;  %v10720_v32 = vpack.i.bf16 %v12471_v54, %v12477_v22  ;;  %v12499_v22 = vld [vmem:[#allocation3 + $0x112] sm:$0xff] }
 0x327   : > { %13700 = vst [vmem:[#allocation28_spill] sm:$0xff] %v12499_v22 }
 0x329   : > { %10701 = vrot.lane.b32.xlu0 %v10700_v36, %s10994_s18  ;;  %v10715_v36 = vpack.i.bf16 %v12473_v19, %v12479_v43  ;;  %v12501_v19 = vld [vmem:[#allocation3 + $0xfa] sm:$0xff] }
 0x32a   : > { %10696 = vrot.lane.b32.xlu1 %v10695_v60, %s10994_s18  ;;  %v12485_v60 = vld [vmem:[#allocation3 + $0xe2] sm:$0xff]  ;;  %13701 = vst [vmem:[#allocation29_spill] sm:$0xff] %v12501_v19 }
 0x32b   : > { %13696 = vst [vmem:[#allocation24_spill] sm:$0xff] %v12485_v60 }
 0x32d   : > { %10711 = vrot.lane.b32.xlu0 %v10710_v15, %s10994_s18  ;;  %v12491_v15 = vld [vmem:[#allocation3 + $0xda] sm:$0xff] }
 0x32e   : > { %10706 = vrot.lane.b32.xlu1 %v10705_v30, %s10994_s18  ;;  %13698 = vst [vmem:[#allocation26_spill] sm:$0xff] %v12491_v15  ;;  %v12493_v30 = vld [vmem:[#allocation3 + $0xc2] sm:$0xff]  ;;  %v10730_v62 = vpack.i.bf16 %v12485_v60, %v12491_v15 }
 0x32f   : > { %13699 = vst [vmem:[#allocation27_spill] sm:$0xff] %v12493_v30  ;;  %v10725_v54 = vpack.i.bf16 %v12487_v1, %v12493_v30  ;;  %v12513_v15 = vld [vmem:[#allocation3 + $0x142] sm:$0xff]  ;;  %v12515_v1 = vld [vmem:[#allocation3 + $0x12a] sm:$0xff] }
 0x330   : > { %13704 = vst [vmem:[#allocation32_spill] sm:$0xff] %v12513_v15  ;;  %13705 = vst [vmem:[#allocation33_spill] sm:$0xff] %v12515_v1 }
 0x331   : > { %10721 = vrot.lane.b32.xlu0 %v10720_v32, %s10994_s18  ;;  %v12505_v32 = vld [vmem:[#allocation3 + $0x10a] sm:$0xff] }
 0x332   : > { %10716 = vrot.lane.b32.xlu1 %v10715_v36, %s10994_s18  ;;  %13702 = vst [vmem:[#allocation30_spill] sm:$0xff] %v12505_v32  ;;  %v12507_v36 = vld [vmem:[#allocation3 + $0xf2] sm:$0xff]  ;;  %v10740_v43 = vpack.i.bf16 %v12499_v22, %v12505_v32 }
 0x333   : > { %13703 = vst [vmem:[#allocation31_spill] sm:$0xff] %v12507_v36  ;;  %v10735_v60 = vpack.i.bf16 %v12501_v19, %v12507_v36  ;;  %v12527_v32 = vld [vmem:[#allocation3 + $0x172] sm:$0xff]  ;;  %v12529_v19 = vld [vmem:[#allocation3 + $0x15a] sm:$0xff] }
 0x334   : > { %13708 = vst [vmem:[#allocation36_spill] sm:$0xff] %v12527_v32  ;;  %13709 = vst [vmem:[#allocation37_spill] sm:$0xff] %v12529_v19 }
 0x335   : > { %10731 = vrot.lane.b32.xlu0 %v10730_v62, %s10994_s18  ;;  %v12519_v62 = vld [vmem:[#allocation3 + $0x13a] sm:$0xff] }
 0x336   : > { %10726 = vrot.lane.b32.xlu1 %v10725_v54, %s10994_s18  ;;  %13706 = vst [vmem:[#allocation34_spill] sm:$0xff] %v12519_v62  ;;  %v12521_v54 = vld [vmem:[#allocation3 + $0x122] sm:$0xff]  ;;  %v10750_v30 = vpack.i.bf16 %v12513_v15, %v12519_v62  ;;  %v5149_v62 = vld [vmem:[#allocation3 + $0x18a] sm:$0xff] }
 0x337   : > { %13707 = vst [vmem:[#allocation35_spill] sm:$0xff] %v12521_v54  ;;  %v10745_v22 = vpack.i.bf16 %v12515_v1, %v12521_v54  ;;  %v5148_v1 = vld [vmem:[#allocation3 + $0x182] sm:$0xff] }
 0x338   : > { %v10765_v54 = vpack.i.bf16 %v5149_v62, %v5148_v1 }
 0x339   : > { %10741 = vrot.lane.b32.xlu0 %v10740_v43, %s10994_s18  ;;  %v12533_v43 = vld [vmem:[#allocation3 + $0x16a] sm:$0xff] }
 0x33a   : > { %10736 = vrot.lane.b32.xlu1 %v10735_v60, %s10994_s18  ;;  %13710 = vst [vmem:[#allocation38_spill] sm:$0xff] %v12533_v43  ;;  %v12535_v60 = vld [vmem:[#allocation3 + $0x152] sm:$0xff]  ;;  %v10760_v36 = vpack.i.bf16 %v12527_v32, %v12533_v43  ;;  %v4816_v32 = vld [vmem:[%s13524_s3 + $0x98] sm:$0xff] }
 0x33b   : > { %13711 = vst [vmem:[#allocation10_spill] sm:$0xff] %v12535_v60  ;;  %v10755_v15 = vpack.i.bf16 %v12529_v19, %v12535_v60 }
 0x33d   : > { %10751 = vrot.lane.b32.xlu0 %v10750_v30, %s10994_s18 }
 0x33e   : > { %10746 = vrot.lane.b32.xlu1 %v10745_v22, %s10994_s18  ;;  %v4815_v22 = vld [vmem:[%s13524_s3 + $0x90] sm:$0xff] }
 0x33f   : > { %v9748_v19 = vpack.c.bf16 %v4816_v32, %v4815_v22 }
 0x341   : > { %10761 = vrot.lane.b32.xlu0 %v10760_v36, %s10994_s18  ;;  %v4093_v36 = vld [vmem:[#allocation3 + $0x8] sm:$0xff] }
 0x342   : > { %10756 = vrot.lane.b32.xlu1 %v10755_v15, %s10994_s18  ;;  %v4092_v15 = vld [vmem:[#allocation3] sm:$0xff] }
 0x343   : > { %v10532_v30 = vpop.permute.xlu0 %10531 }
 0x344   : > { %v10542_v7 = vpop.permute.xlu1 %10541  ;;  %v10534_v43 = vunpack.i.h.bf16 %v10532_v30  ;;  %v10533_v13 = vunpack.i.l.bf16 %v10532_v30 }
 0x345   : > { %10771 = vrot.lane.b32.xlu0 %v12178_v18, %s10994_s18  ;;  %v10543_v40 = vunpack.i.l.bf16 %v10542_v7  ;;  %v4817_v18 = vld [vmem:[%s13524_s3 + $0xa0] sm:$0xff] }
 0x346   : > { %10766 = vrot.lane.b32.xlu1 %v10765_v54, %s10994_s18  ;;  %v4284_v1 = vsel %vm3973_vm3, %v4092_v15, %v10533_v13  ;;  %v4285_v62 = vsel %vm3973_vm3, %v4093_v36, %v10534_v43  ;;  %v4818_v13 = vld [vmem:[%s13524_s3 + $0xa8] sm:$0xff]  ;;  %v10544_v43 = vunpack.i.h.bf16 %v10542_v7  ;;  %v4823_v36 = vld [vmem:[%s13524_s3 + $0xd0] sm:$0xff] }
 0x347   : > { %v10537_v60 = vpop.permute.xlu0 %10536  ;;  %9156 = vmatprep.mubr.f32.mxu1 %v4284_v1  ;;  %v4288_v22 = vsel %vm3973_vm3, %v12336_v21, %v10543_v40 }
 0x348   : > { %v10539_v41 = vunpack.i.h.bf16 %v10537_v60  ;;  %v10538_v27 = vunpack.i.l.bf16 %v10537_v60  ;;  %9157 = vmatmul.mubr.f32.vlgmr.msra.gmra.mrb[32].mxu1 %v4285_v62  ;;  %v10547_v54 = vpop.permute.xlu1 %10546  ;;  %v9752_v60 = vpack.c.bf16 %v4818_v13, %v4817_v18  ;;  %v4289_v21 = vsel %vm3973_vm3, %v12344_v4, %v10544_v43  ;;  %v4825_v13 = vld [vmem:[%s13524_s3 + $0xe0] sm:$0xff] }
 0x349   : > { %10781 = vrot.lane.b32.xlu0 %v12204_v55, %s10994_s18  ;;  %9747 = vmatpush3.bf16.msra.mxu1 %v12165_v51  ;;  %v10548_v30 = vunpack.i.l.bf16 %v10547_v54  ;;  %v4819_v51 = vld [vmem:[%s13524_s3 + $0xb0] sm:$0xff] }
 0x34a   : > { %10776 = vrot.lane.b32.xlu1 %v12191_v47, %s10994_s18  ;;  %v4286_v32 = vsel %vm3973_vm3, %v12320_v38, %v10538_v27  ;;  %v4287_v55 = vsel %vm3973_vm3, %v12322_v29, %v10539_v41  ;;  %9749 = vmatprep.subr.bf16.mxu1 %v9748_v19  ;;  %v4820_v47 = vld [vmem:[%s13524_s3 + $0xb8] sm:$0xff]  ;;  %v10549_v29 = vunpack.i.h.bf16 %v10547_v54  ;;  %v4821_v41 = vld [vmem:[%s13524_s3 + $0xc0] sm:$0xff] }
 0x34b   : > { %9159 = vmatprep.mubr.f32.mxu1 %v4286_v32  ;;  %v10552_v38 = vpop.permute.xlu0 %10551  ;;  %v4290_v27 = vsel %vm3973_vm3, %v12334_v39, %v10548_v30  ;;  %v12625_v32 = vld [vmem:[#allocation3 + $0x181] sm:$0xff] }
 0x34c   : > { %9160 = vmatmul.mubr.f32.gmra.mrb[34].mxu1 %v4287_v55  ;;  %v10553_v40 = vunpack.i.l.bf16 %v10552_v38  ;;  %v10554_v4 = vunpack.i.h.bf16 %v10552_v38  ;;  %v4291_v39 = vsel %vm3973_vm3, %v12342_v56, %v10549_v29 }
 0x34d   : > { %10791 = vrot.lane.b32.xlu0 %v12228_v45, %s10994_s18  ;;  %9162 = vmatprep.mubr.f32.mxu1 %v4288_v22  ;;  %v9756_v45 = vpack.c.bf16 %v4820_v47, %v4819_v51  ;;  %v5646_v51 = vld [vmem:[#allocation3 + $0x199] sm:$0xff] }
 0x34e   : > { %10786 = vrot.lane.b32.xlu1 %v12216_v12, %s10994_s18  ;;  %9751 = vmatpush3.bf16.msra.mxu1 %v9748_v19  ;;  %v4822_v12 = vld [vmem:[%s13524_s3 + $0xc8] sm:$0xff]  ;;  %v4292_v15 = vsel %vm3973_vm3, %v12353_v57, %v10553_v40  ;;  %v4293_v57 = vsel %vm3973_vm3, %v12359_v25, %v10554_v4 }
 0x34f   : > { %9753 = vmatprep.subr.bf16.mxu1 %v9752_v60  ;;  %v10557_v7 = vpop.permute.xlu1 %10556 }
 0x350   : > { %9163 = vmatmul.mubr.f32.gmra.mrb[36].mxu1 %v4289_v21  ;;  %v10558_v19 = vunpack.i.l.bf16 %v10557_v7  ;;  %v10559_v56 = vunpack.i.h.bf16 %v10557_v7  ;;  %v5647_v21 = vld [vmem:[#allocation3 + $0x1a1] sm:$0xff] }
 0x351   : > { %10801 = vrot.lane.b32.xlu0 %v12252_v34, %s10994_s18  ;;  %9165 = vmatprep.mubr.f32.mxu1 %v4290_v27  ;;  %v9760_v34 = vpack.c.bf16 %v4822_v12, %v4821_v41  ;;  %v10845_v27 = vpack.i.bf16 %v5647_v21, %v5646_v51 }
 0x352   : > { %10796 = vrot.lane.b32.xlu1 %v12240_v28, %s10994_s18  ;;  %9755 = vmatpush3.bf16.msra.mxu1 %v9752_v60  ;;  %v4824_v28 = vld [vmem:[%s13524_s3 + $0xd8] sm:$0xff]  ;;  %v4294_v18 = vsel %vm3973_vm3, %v12351_v5, %v10558_v19  ;;  %v4295_v5 = vsel %vm3973_vm3, %v12357_v24, %v10559_v56 }
 0x353   : > { %9757 = vmatprep.subr.bf16.mxu1 %v9756_v45  ;;  %v10562_v1 = vpop.permute.xlu0 %10561  ;;  %v4828_v24 = vld [vmem:[%s13524_s3 + $0xf8] sm:$0xff] }
 0x354   : > { %9166 = vmatmul.mubr.f32.gmra.mrb[38].mxu1 %v4291_v39  ;;  %v10563_v62 = vunpack.i.l.bf16 %v10562_v1  ;;  %v10564_v25 = vunpack.i.h.bf16 %v10562_v1 }
 0x355   : > { %10811 = vrot.lane.b32.xlu0 %v12276_v48, %s10994_s18  ;;  %9168 = vmatprep.mubr.f32.mxu1 %v4292_v15  ;;  %v9764_v48 = vpack.c.bf16 %v4824_v28, %v4823_v36 }
 0x356   : > { %10806 = vrot.lane.b32.xlu1 %v12264_v16, %s10994_s18  ;;  %9759 = vmatpush3.bf16.msra.mxu1 %v9756_v45  ;;  %v4826_v16 = vld [vmem:[%s13524_s3 + $0xe8] sm:$0xff]  ;;  %v10567_v54 = vpop.permute.xlu1 %10566  ;;  %v4296_v60 = vsel %vm3973_vm3, %v12367_v49, %v10563_v62 }
 0x357   : > { %9761 = vmatprep.subr.bf16.mxu1 %v9760_v34  ;;  %v9768_v55 = vpack.c.bf16 %v4826_v16, %v4825_v13  ;;  %v10568_v43 = vunpack.i.l.bf16 %v10567_v54  ;;  %v10569_v49 = vunpack.i.h.bf16 %v10567_v54  ;;  %v5311_v45 = vld [vmem:[%s13524_s3 + $0x108] sm:$0xff] }
 0x358   : > { %9169 = vmatmul.mubr.f32.gmra.mrb[40].mxu1 %v4293_v57 }
 0x359   : > { %10821 = vrot.lane.b32.xlu0 %v12300_v58, %s10994_s18  ;;  %9171 = vmatprep.mubr.f32.mxu1 %v4294_v18  ;;  %v5645_v58 = vld [vmem:[#allocation3 + $0x189] sm:$0xff]  ;;  %v4298_v29 = vsel %vm3973_vm3, %v12365_v26, %v10568_v43  ;;  %v4299_v26 = vsel %vm3973_vm3, %v12371_v23, %v10569_v49 }
 0x35a   : > { %10816 = vrot.lane.b32.xlu1 %v12288_v44, %s10994_s18  ;;  %9763 = vmatpush3.bf16.msra.mxu1 %v9760_v34  ;;  %v4827_v44 = vld [vmem:[%s13524_s3 + $0xf0] sm:$0xff]  ;;  %v10572_v30 = vpop.permute.xlu0 %10571  ;;  %v10840_v22 = vpack.i.bf16 %v5645_v58, %v12625_v32 }
 0x35b   : > { %9765 = vmatprep.subr.bf16.mxu1 %v9764_v48  ;;  %v9772_v47 = vpack.c.bf16 %v4828_v24, %v4827_v44  ;;  %v10573_v38 = vunpack.i.l.bf16 %v10572_v30  ;;  %v10574_v40 = vunpack.i.h.bf16 %v10572_v30  ;;  %v4589_v30 = vld [vmem:[#allocation3 + $0x2] sm:$0xff] }
 0x35c   : > { %9172 = vmatmul.mubr.f32.gmra.mrb[42].mxu1 %v4295_v5 }
 0x35d   : > { %10831 = vrot.lane.b32.xlu0 %v12318_v20, %s10994_s18  ;;  %9174 = vmatprep.mubr.f32.mxu1 %v4296_v60  ;;  %v4297_v20 = vsel %vm3973_vm3, %v12373_v6, %v10564_v25  ;;  %v4300_v7 = vsel %vm3973_vm3, %v12381_v42, %v10573_v38  ;;  %v4301_v39 = vsel %vm3973_vm3, %v12387_v53, %v10574_v40  ;;  %v5314_v38 = vld [vmem:[%s13524_s3 + $0x120] sm:$0xff] }
 0x35e   : > { %10826 = vrot.lane.b32.xlu1 %v12310_v52, %s10994_s18  ;;  %9767 = vmatpush3.bf16.msra.mxu1 %v9764_v48  ;;  %v5310_v52 = vld [vmem:[%s13524_s3 + $0x100] sm:$0xff]  ;;  %v10577_v6 = vpop.permute.xlu1 %10576 }
 0x35f   : > { %9769 = vmatprep.subr.bf16.mxu1 %v9768_v55  ;;  %v12655_v41 = vpack.c.bf16 %v5311_v45, %v5310_v52  ;;  %v10578_v12 = vunpack.i.l.bf16 %v10577_v6 }
 0x360   : > { %9175 = vmatmul.mubr.f32.gmra.mrb[44].mxu1 %v4297_v20  ;;  %v4590_v20 = vld [vmem:[#allocation3 + $0xa] sm:$0xff] }
 0x361   : > { %10841 = vrot.lane.b32.xlu0 %v10840_v22, %s10994_s18  ;;  %9177 = vmatprep.mubr.f32.mxu1 %v4298_v29  ;;  %v4302_v34 = vsel %vm3973_vm3, %v12379_v8, %v10578_v12  ;;  %v5315_v29 = vld [vmem:[%s13524_s3 + $0x128] sm:$0xff]  ;;  %v5317_v12 = vld [vmem:[%s13524_s3 + $0x138] sm:$0xff] }
 0x362   : > { %10836 = vrot.lane.b32.xlu1 %v12332_v33, %s10994_s18  ;;  %9771 = vmatpush3.bf16.msra.mxu1 %v9768_v55  ;;  %v10579_v33 = vunpack.i.h.bf16 %v10577_v6  ;;  %v9784_v6 = vpack.c.bf16 %v5315_v29, %v5314_v38 }
 0x363   : > { %9773 = vmatprep.subr.bf16.mxu1 %v9772_v47  ;;  %v10582_v4 = vpop.permute.xlu0 %10581 }
 0x364   : > { %9178 = vmatmul.mubr.f32.gmra.mrb[46].mxu1 %v4299_v26  ;;  %v10583_v23 = vunpack.i.l.bf16 %v10582_v4  ;;  %v10584_v15 = vunpack.i.h.bf16 %v10582_v4  ;;  %v4303_v42 = vsel %vm3973_vm3, %v12385_v61, %v10579_v33 }
 0x365   : > { %9180 = vmatprep.mubr.f32.mxu1 %v4300_v7 }
 0x366   : > { %10846 = vrot.lane.b32.xlu1 %v10845_v27, %s10994_s18  ;;  %9775 = vmatpush3.bf16.msra.mxu1 %v9772_v47  ;;  %v4304_v28 = vsel %vm3973_vm3, %v12395_v3, %v10583_v23  ;;  %v4305_v56 = vsel %vm3973_vm3, %v12401_v10, %v10584_v15  ;;  %v5316_v27 = vld [vmem:[%s13524_s3 + $0x130] sm:$0xff]  ;;  %v5318_v23 = vld [vmem:[%s13524_s3 + $0x140] sm:$0xff] }
 0x367   : > { %9777 = vmatprep.subr.bf16.mxu1 %v12655_v41  ;;  %v10587_v19 = vpop.permute.xlu1 %10586  ;;  %v9788_v4 = vpack.c.bf16 %v5317_v12, %v5316_v27  ;;  %v13724_v12 = vld [vmem:[#allocation25_spill] sm:$0xff] }
 0x368   : > { %9181 = vmatmul.mubr.f32.gmra.mrb[48].mxu1 %v4301_v39  ;;  %v10588_v36 = vunpack.i.l.bf16 %v10587_v19  ;;  %v10589_v53 = vunpack.i.h.bf16 %v10587_v19 }
 0x369   : > { %9183 = vmatprep.mubr.f32.mxu1 %v4302_v34  ;;  %v5319_v34 = vld [vmem:[%s13524_s3 + $0x148] sm:$0xff] }
 0x36a   : > { %v10592_v1 = vpop.permute.xlu0 %10591  ;;  %v4306_v8 = vsel %vm3973_vm3, %v12393_v35, %v10588_v36  ;;  %v4307_v61 = vsel %vm3973_vm3, %v12399_v50, %v10589_v53  ;;  %v9792_v36 = vpack.c.bf16 %v5319_v34, %v5318_v23 }
 0x36b   : > { %v10593_v57 = vunpack.i.l.bf16 %v10592_v1  ;;  %v10594_v62 = vunpack.i.h.bf16 %v10592_v1  ;;  %v13714_v1 = vld [vmem:[#allocation15_spill] sm:$0xff] }
 0x36c   : > { %9184 = vmatmul.mubr.f32.gmra.mrb[50].mxu1 %v4303_v42 }
 0x36d   : > { %9186 = vmatprep.mubr.f32.mxu1 %v4304_v28  ;;  %v4308_v3 = vsel %vm3973_vm3, %v12409_v37, %v10593_v57  ;;  %v4309_v10 = vsel %vm3973_vm3, %v12415_v63, %v10594_v62  ;;  %v5321_v57 = vld [vmem:[%s13524_s3 + $0x158] sm:$0xff] }
 0x36e   : > { %v10597_v48 = vpop.permute.xlu1 %10596 }
 0x36f   : > { %v10598_v18 = vunpack.i.l.bf16 %v10597_v48  ;;  %v10599_v16 = vunpack.i.h.bf16 %v10597_v48  ;;  %v13715_v48 = vld [vmem:[#allocation19_spill] sm:$0xff] }
 0x370   : > { %9187 = vmatmul.mubr.f32.gmra.mrb[52].mxu1 %v4305_v56  ;;  %v5320_v56 = vld [vmem:[%s13524_s3 + $0x150] sm:$0xff] }
 0x371   : > { %9189 = vmatprep.mubr.f32.mxu1 %v4306_v8  ;;  %v4310_v35 = vsel %vm3973_vm3, %v12407_v11, %v10598_v18  ;;  %v4311_v50 = vsel %vm3973_vm3, %v12413_v9, %v10599_v16  ;;  %v9796_v18 = vpack.c.bf16 %v5321_v57, %v5320_v56 }
 0x373   : > { %v10602_v13 = vpop.permute.xlu0 %10601 }
 0x374   : > { %9190 = vmatmul.mubr.f32.gmra.mrb[54].mxu1 %v4307_v61  ;;  %v10603_v54 = vunpack.i.l.bf16 %v10602_v13  ;;  %v10604_v5 = vunpack.i.h.bf16 %v10602_v13  ;;  %v13716_v13 = vld [vmem:[#allocation14_spill] sm:$0xff] }
 0x375   : > { %9192 = vmatprep.mubr.f32.mxu1 %v4308_v3 }
 0x376   : > { %v4312_v37 = vsel %vm3973_vm3, %v12421_v14, %v10603_v54  ;;  %v4313_v63 = vsel %vm3973_vm3, %v12427_v46, %v10604_v5  ;;  %v5312_v14 = vld [vmem:[%s13524_s3 + $0x110] sm:$0xff]  ;;  %v5313_v46 = vld [vmem:[%s13524_s3 + $0x118] sm:$0xff]  ;;  %v5323_v54 = vld [vmem:[%s13524_s3 + $0x168] sm:$0xff] }
 0x377   : > { %v10612_v55 = vpop.permute.xlu0 %10611  ;;  %v9780_v51 = vpack.c.bf16 %v5313_v46, %v5312_v14  ;;  %v13720_v46 = vld [vmem:[#allocation21_spill] sm:$0xff] }
 0x378   : > { %9193 = vmatmul.mubr.f32.gmra.mrb[56].mxu1 %v4309_v10  ;;  %v10607_v25 = vpop.permute.xlu1 %10606  ;;  %v10613_v60 = vunpack.i.l.bf16 %v10612_v55  ;;  %v10614_v24 = vunpack.i.h.bf16 %v10612_v55  ;;  %v5322_v10 = vld [vmem:[%s13524_s3 + $0x160] sm:$0xff] }
 0x379   : > { %9195 = vmatprep.mubr.f32.mxu1 %v4310_v35  ;;  %v10608_v58 = vunpack.i.l.bf16 %v10607_v25  ;;  %v10609_v43 = vunpack.i.h.bf16 %v10607_v25  ;;  %v13717_v25 = vld [vmem:[#allocation18_spill] sm:$0xff]  ;;  %v13718_v55 = vld [vmem:[#allocation17_spill] sm:$0xff] }
 0x37a   : > { %v4781_v49 = vsel %vm3973_vm3, %v4589_v30, %v10613_v60  ;;  %v5325_v60 = vld [vmem:[%s13524_s3 + $0x178] sm:$0xff] }
 0x37b   : > { %v4314_v11 = vsel %vm3973_vm3, %v12423_v17, %v10608_v58  ;;  %v4315_v9 = vsel %vm3973_vm3, %v12429_v0, %v10609_v43  ;;  %v10622_v17 = vpop.permute.xlu0 %10621  ;;  %v4782_v0 = vsel %vm3973_vm3, %v4590_v20, %v10614_v24  ;;  %v9800_v58 = vpack.c.bf16 %v5323_v54, %v5322_v10  ;;  %v13732_v10 = vld [vmem:[#allocation33_spill] sm:$0xff] }
 0x37c   : > { %9196 = vmatmul.mubr.f32.gmra.mrb[58].mxu1 %v4311_v50  ;;  %v10617_v44 = vpop.permute.xlu1 %10616  ;;  %v10623_v21 = vunpack.i.l.bf16 %v10622_v17  ;;  %v10624_v40 = vunpack.i.h.bf16 %v10622_v17  ;;  %v5809_v17 = vld [vmem:[%s13524_s3 + $0x188] sm:$0xff] }
 0x37d   : > { %9198 = vmatprep.mubr.f32.mxu1 %v4312_v37  ;;  %v10618_v22 = vunpack.i.l.bf16 %v10617_v44  ;;  %v10619_v47 = vunpack.i.h.bf16 %v10617_v44  ;;  %v13719_v44 = vld [vmem:[#allocation23_spill] sm:$0xff] }
 0x37f   : > { %v4783_v52 = vsel %vm3973_vm3, %v12439_v31, %v10618_v22  ;;  %v4784_v26 = vsel %vm3973_vm3, %v12435_v2, %v10619_v47  ;;  %v4785_v31 = vsel %vm3973_vm3, %v12451_v59, %v10623_v21  ;;  %v13712_v2 = vld [vmem:[#allocation13_spill] sm:$0xff]  ;;  %v13713_v59 = vld [vmem:[#allocation16_spill] sm:$0xff] }
 0x380   : > { %9199 = vmatmul.mubr.f32.gmra.mrb[60].mxu1 %v4313_v63  ;;  %v10627_v45 = vpop.permute.xlu1 %10626  ;;  %v4786_v39 = vsel %vm3973_vm3, %v13712_v2, %v10624_v40  ;;  %v5324_v63 = vld [vmem:[%s13524_s3 + $0x170] sm:$0xff]  ;;  %v13722_v21 = vld [vmem:[#allocation20_spill] sm:$0xff] }
 0x381   : > { %9201 = vmatprep.mubr.f32.mxu1 %v4314_v11  ;;  %v10628_v7 = vunpack.i.l.bf16 %v10627_v45  ;;  %v10629_v33 = vunpack.i.h.bf16 %v10627_v45  ;;  %v9804_v30 = vpack.c.bf16 %v5325_v60, %v5324_v63  ;;  %v13735_v63 = vld [vmem:[#allocation10_spill] sm:$0xff] }
 0x383   : > { %v4787_v15 = vsel %vm3973_vm3, %v13713_v59, %v10628_v7  ;;  %v4788_v53 = vsel %vm3973_vm3, %v13714_v1, %v10629_v33 }
 0x384   : > { %9202 = vmatmul.mubr.f32.gmra.mrb[62].mxu1 %v4315_v9  ;;  %v10637_v42 = vpop.permute.xlu1 %10636 }
 0x385   : > { %9236 = vmatprep.mubr.f32.mxu1 %v4781_v49  ;;  %v10638_v8 = vunpack.i.l.bf16 %v10637_v42  ;;  %v10639_v3 = vunpack.i.h.bf16 %v10637_v42  ;;  %v5808_v49 = vld [vmem:[%s13524_s3 + $0x180] sm:$0xff] }
 0x386   : > { %v12768_v38 = vpack.c.bf16 %v5809_v17, %v5808_v49  ;;  %v13738_v17 = vld [vmem:[#allocation36_spill] sm:$0xff] }
 0x387   : > { %v4791_v5 = vsel %vm3973_vm3, %v13717_v25, %v10638_v8  ;;  %v4792_v43 = vsel %vm3973_vm3, %v13718_v55, %v10639_v3  ;;  %v13733_v25 = vld [vmem:[#allocation34_spill] sm:$0xff] }
 0x388   : > { %9237 = vmatmul.mubr.f32.vlgmr.msra.gmra.mrb[32].mxu1 %v4782_v0  ;;  %v10647_v50 = vpop.permute.xlu1 %10646 }
 0x389   : > { %9239 = vmatprep.mubr.f32.mxu1 %v4783_v52  ;;  %9779 = vmatpush3.bf16.msra.mxu1 %v12655_v41  ;;  %v10632_v41 = vpop.permute.xlu0 %10631  ;;  %v10648_v11 = vunpack.i.l.bf16 %v10647_v50  ;;  %v10649_v14 = vunpack.i.h.bf16 %v10647_v50 }
 0x38a   : > { %9781 = vmatprep.subr.bf16.mxu1 %v9780_v51  ;;  %v10633_v19 = vunpack.i.l.bf16 %v10632_v41  ;;  %v10634_v28 = vunpack.i.h.bf16 %v10632_v41  ;;  %v13725_v41 = vld [vmem:[#allocation26_spill] sm:$0xff] }
 0x38b   : > { %v4796_v52 = vsel %vm3973_vm3, %v13722_v21, %v10649_v14  ;;  %v13737_v14 = vld [vmem:[#allocation38_spill] sm:$0xff] }
 0x38c   : > { %9240 = vmatmul.mubr.f32.gmra.mrb[34].mxu1 %v4784_v26  ;;  %v4789_v62 = vsel %vm3973_vm3, %v13715_v48, %v10633_v19  ;;  %v4790_v16 = vsel %vm3973_vm3, %v13716_v13, %v10634_v28  ;;  %v10657_v0 = vpop.permute.xlu1 %10656  ;;  %v13727_v19 = vld [vmem:[#allocation31_spill] sm:$0xff]  ;;  %v13730_v48 = vld [vmem:[#allocation28_spill] sm:$0xff] }
 0x38d   : > { %9242 = vmatprep.mubr.f32.mxu1 %v4785_v31  ;;  %9783 = vmatpush3.bf16.msra.mxu1 %v9780_v51  ;;  %v10642_v61 = vpop.permute.xlu0 %10641  ;;  %v13721_v51 = vld [vmem:[#allocation22_spill] sm:$0xff]  ;;  %v10658_v45 = vunpack.i.l.bf16 %v10657_v0  ;;  %v10659_v27 = vunpack.i.h.bf16 %v10657_v0  ;;  %v5811_v0 = vld [vmem:[%s13524_s3 + $0x198] sm:$0xff] }
 0x38e   : > { %9785 = vmatprep.subr.bf16.mxu1 %v9784_v6  ;;  %v10643_v35 = vunpack.i.l.bf16 %v10642_v61  ;;  %v10644_v37 = vunpack.i.h.bf16 %v10642_v61  ;;  %v4795_v47 = vsel %vm3973_vm3, %v13721_v51, %v10648_v11  ;;  %v5086_v51 = vld [vmem:[#allocation3 + $0x19] sm:$0xff] }
 0x390   : > { %9243 = vmatmul.mubr.f32.gmra.mrb[36].mxu1 %v4786_v39  ;;  %v4793_v24 = vsel %vm3973_vm3, %v13719_v44, %v10643_v35  ;;  %v4794_v22 = vsel %vm3973_vm3, %v13720_v46, %v10644_v37  ;;  %v10667_v33 = vpop.permute.xlu1 %10666  ;;  %v13726_v39 = vld [vmem:[#allocation24_spill] sm:$0xff] }
 0x391   : > { %9245 = vmatprep.mubr.f32.mxu1 %v4787_v15  ;;  %9787 = vmatpush3.bf16.msra.mxu1 %v9784_v6  ;;  %v10652_v9 = vpop.permute.xlu0 %10651  ;;  %v13723_v6 = vld [vmem:[#allocation27_spill] sm:$0xff]  ;;  %v4800_v23 = vsel %vm3973_vm3, %v13726_v39, %v10659_v27  ;;  %v10668_v34 = vunpack.i.l.bf16 %v10667_v33  ;;  %v10669_v42 = vunpack.i.h.bf16 %v10667_v33  ;;  %v13734_v37 = vld [vmem:[#allocation32_spill] sm:$0xff]  ;;  %v5088_v27 = vld [vmem:[#allocation3 + $0x31] sm:$0xff] }
 0x392   : > { %9789 = vmatprep.subr.bf16.mxu1 %v9788_v4  ;;  %v10653_v20 = vunpack.i.l.bf16 %v10652_v9  ;;  %v10654_v29 = vunpack.i.h.bf16 %v10652_v9  ;;  %v5089_v33 = vld [vmem:[#allocation3 + $0x39] sm:$0xff] }
 0x394   : > { %9246 = vmatmul.mubr.f32.gmra.mrb[38].mxu1 %v4788_v53  ;;  %v4797_v40 = vsel %vm3973_vm3, %v13723_v6, %v10653_v20  ;;  %v4798_v7 = vsel %vm3973_vm3, %v13724_v12, %v10654_v29  ;;  %v13729_v53 = vld [vmem:[#allocation30_spill] sm:$0xff]  ;;  %v10677_v57 = vpop.permute.xlu1 %10676  ;;  %v5812_v12 = vld [vmem:[%s13524_s3 + $0x1a0] sm:$0xff] }
 0x395   : > { %9248 = vmatprep.mubr.f32.mxu1 %v4789_v62  ;;  %9791 = vmatpush3.bf16.msra.mxu1 %v9788_v4  ;;  %v10662_v26 = vpop.permute.xlu0 %10661  ;;  %v4799_v4 = vsel %vm3973_vm3, %v13725_v41, %v10658_v45  ;;  %v4803_v56 = vsel %vm3973_vm3, %v13729_v53, %v10668_v34  ;;  %v4804_v62 = vsel %vm3973_vm3, %v13730_v48, %v10669_v42  ;;  %v10678_v61 = vunpack.i.l.bf16 %v10677_v57  ;;  %v5087_v45 = vld [vmem:[#allocation3 + $0x21] sm:$0xff]  ;;  %v5090_v34 = vld [vmem:[#allocation3 + $0x49] sm:$0xff] }
 0x396   : > { %9793 = vmatprep.subr.bf16.mxu1 %v9792_v36  ;;  %v10663_v31 = vunpack.i.l.bf16 %v10662_v26  ;;  %v10664_v2 = vunpack.i.h.bf16 %v10662_v26 }
 0x398   : > { %9249 = vmatmul.mubr.f32.gmra.mrb[40].mxu1 %v4790_v16  ;;  %v4801_v59 = vsel %vm3973_vm3, %v13727_v19, %v10663_v31  ;;  %v10679_v16 = vunpack.i.h.bf16 %v10677_v57  ;;  %v10687_v50 = vpop.permute.xlu1 %10686  ;;  %v5814_v19 = vld [vmem:[%s13524_s3 + $0x1b0] sm:$0xff]  ;;  %v5816_v57 = vld [vmem:[%s13524_s3 + $0x1c0] sm:$0xff] }
 0x399   : > { %9251 = vmatprep.mubr.f32.mxu1 %v4791_v5  ;;  %9795 = vmatpush3.bf16.msra.mxu1 %v9792_v36  ;;  %v10672_v15 = vpop.permute.xlu0 %10671  ;;  %v13728_v36 = vld [vmem:[#allocation29_spill] sm:$0xff]  ;;  %v4807_v5 = vsel %vm3973_vm3, %v13733_v25, %v10678_v61  ;;  %v10689_v44 = vunpack.i.h.bf16 %v10687_v50 }
 0x39a   : > { %9797 = vmatprep.subr.bf16.mxu1 %v9796_v18  ;;  %v4802_v28 = vsel %vm3973_vm3, %v13728_v36, %v10664_v2  ;;  %v10673_v1 = vunpack.i.l.bf16 %v10672_v15  ;;  %v10674_v8 = vunpack.i.h.bf16 %v10672_v15  ;;  %v4808_v55 = vsel %vm3973_vm3, %v13734_v37, %v10679_v16  ;;  %v5091_v36 = vld [vmem:[#allocation3 + $0x51] sm:$0xff] }
 0x39b   : > { %v4812_v20 = vsel %vm3973_vm3, %v13738_v17, %v10689_v44  ;;  %v5822_v17 = vld [vmem:[%s13524_s3 + $0x1f0] sm:$0xff] }
 0x39c   : > { %9252 = vmatmul.mubr.f32.gmra.mrb[42].mxu1 %v4792_v43  ;;  %v4806_v54 = vsel %vm3973_vm3, %v13732_v10, %v10674_v8  ;;  %v10688_v43 = vunpack.i.l.bf16 %v10687_v50  ;;  %v5817_v8 = vld [vmem:[%s13524_s3 + $0x1c8] sm:$0xff] }
 0x39d   : > { %9254 = vmatprep.mubr.f32.mxu1 %v4793_v24  ;;  %9799 = vmatpush3.bf16.msra.mxu1 %v9796_v18  ;;  %v13731_v18 = vld [vmem:[#allocation35_spill] sm:$0xff]  ;;  %v10682_v13 = vpop.permute.xlu0 %10681  ;;  %v13736_v24 = vld [vmem:[#allocation37_spill] sm:$0xff] }
 0x39e   : > { %9801 = vmatprep.subr.bf16.mxu1 %v9800_v58  ;;  %v4805_v3 = vsel %vm3973_vm3, %v13731_v18, %v10673_v1  ;;  %v10683_v35 = vunpack.i.l.bf16 %v10682_v13  ;;  %v4811_v46 = vsel %vm3973_vm3, %v13737_v14, %v10688_v43  ;;  %v5093_v18 = vld [vmem:[#allocation3 + $0x69] sm:$0xff]  ;;  %v5094_v10 = vld [vmem:[#allocation3 + $0x79] sm:$0xff] }
 0x3a0   : > { %9255 = vmatmul.mubr.f32.gmra.mrb[44].mxu1 %v4794_v22  ;;  %v4809_v60 = vsel %vm3973_vm3, %v13735_v63, %v10683_v35  ;;  %v10697_v22 = vpop.permute.xlu1 %10696  ;;  %v5819_v35 = vld [vmem:[%s13524_s3 + $0x1d8] sm:$0xff]  ;;  %v5096_v63 = vld [vmem:[#allocation3 + $0x91] sm:$0xff] }
 0x3a1   : > { %9257 = vmatprep.mubr.f32.mxu1 %v4795_v47  ;;  %9803 = vmatpush3.bf16.msra.mxu1 %v9800_v58  ;;  %v10684_v58 = vunpack.i.h.bf16 %v10682_v13  ;;  %v10692_v11 = vpop.permute.xlu0 %10691  ;;  %v5810_v47 = vld [vmem:[%s13524_s3 + $0x190] sm:$0xff]  ;;  %v10698_v29 = vunpack.i.l.bf16 %v10697_v22 }
 0x3a2   : > { %9805 = vmatprep.subr.bf16.mxu1 %v9804_v30  ;;  %v10694_v49 = vunpack.i.h.bf16 %v10692_v11  ;;  %v9812_v6 = vpack.c.bf16 %v5811_v0, %v5810_v47 }
 0x3a3   : > { %v4810_v9 = vsel %vm3973_vm3, %v13736_v24, %v10684_v58  ;;  %v5280_v41 = vsel %vm3973_vm3, %v5088_v27, %v10698_v29  ;;  %v5095_v58 = vld [vmem:[#allocation3 + $0x81] sm:$0xff]  ;;  %v5099_v29 = vld [vmem:[#allocation3 + $0xb1] sm:$0xff] }
 0x3a4   : > { %9258 = vmatmul.mubr.f32.gmra.mrb[46].mxu1 %v4796_v52  ;;  %v5279_v26 = vsel %vm3973_vm3, %v5087_v45, %v10694_v49  ;;  %v5098_v49 = vld [vmem:[#allocation3 + $0xa9] sm:$0xff] }
 0x3a5   : > { %9260 = vmatprep.mubr.f32.mxu1 %v4797_v40  ;;  %9807 = vmatpush3.bf16.msra.mxu1 %v9804_v30  ;;  %v10693_v30 = vunpack.i.l.bf16 %v10692_v11  ;;  %v10702_v52 = vpop.permute.xlu0 %10701  ;;  %v10699_v40 = vunpack.i.h.bf16 %v10697_v22  ;;  %v5821_v11 = vld [vmem:[%s13524_s3 + $0x1e8] sm:$0xff] }
 0x3a6   : > { %9809 = vmatprep.subr.bf16.mxu1 %v12768_v38  ;;  %v10703_v31 = vunpack.i.l.bf16 %v10702_v52  ;;  %v10704_v39 = vunpack.i.h.bf16 %v10702_v52 }
 0x3a7   : > { %v5278_v21 = vsel %vm3973_vm3, %v5086_v51, %v10693_v30  ;;  %v5097_v30 = vld [vmem:[#allocation3 + $0x99] sm:$0xff] }
 0x3a8   : > { %9261 = vmatmul.mubr.f32.gmra.mrb[48].mxu1 %v4798_v7  ;;  %v5813_v7 = vld [vmem:[%s13524_s3 + $0x1a8] sm:$0xff]  ;;  %v5282_v42 = vsel %vm3973_vm3, %v5090_v34, %v10703_v31  ;;  %v5283_v53 = vsel %vm3973_vm3, %v5091_v36, %v10704_v39  ;;  %v5101_v31 = vld [vmem:[#allocation3 + $0xc9] sm:$0xff] }
 0x3a9   : > { %9263 = vmatprep.mubr.f32.mxu1 %v4799_v4  ;;  %v10707_v4 = vpop.permute.xlu1 %10706  ;;  %v9816_v2 = vpack.c.bf16 %v5813_v7, %v5812_v12 }
 0x3aa   : > { %v10708_v15 = vunpack.i.l.bf16 %v10707_v4  ;;  %v10709_v1 = vunpack.i.h.bf16 %v10707_v4 }
 0x3ac   : > { %9264 = vmatmul.mubr.f32.gmra.mrb[50].mxu1 %v4800_v23  ;;  %v5281_v23 = vsel %vm3973_vm3, %v5089_v33, %v10699_v40  ;;  %v5285_v16 = vsel %vm3973_vm3, %v5093_v18, %v10709_v1  ;;  %v6113_v40 = vld [vmem:[%s13524_s3 + $0x200] sm:$0xff]  ;;  %v5105_v1 = vld [vmem:[#allocation3 + $0xf9] sm:$0xff] }
 0x3ad   : > { %9266 = vmatprep.mubr.f32.mxu1 %v4801_v59  ;;  %v5815_v59 = vld [vmem:[%s13524_s3 + $0x1b8] sm:$0xff]  ;;  %v10717_v61 = vpop.permute.xlu1 %10716 }
 0x3ae   : > { %v10718_v25 = vunpack.i.l.bf16 %v10717_v61 }
 0x3b0   : > { %9267 = vmatmul.mubr.f32.gmra.mrb[52].mxu1 %v4802_v28  ;;  %v9820_v28 = vpack.c.bf16 %v5815_v59, %v5814_v19  ;;  %v5288_v24 = vsel %vm3973_vm3, %v5096_v63, %v10718_v25  ;;  %v5103_v19 = vld [vmem:[#allocation3 + $0xe1] sm:$0xff] }
 0x3b1   : > { %9269 = vmatprep.mubr.f32.mxu1 %v4803_v56  ;;  %v5092_v56 = vld [vmem:[#allocation3 + $0x61] sm:$0xff] }
 0x3b4   : > { %9270 = vmatmul.mubr.f32.gmra.mrb[54].mxu1 %v4804_v62  ;;  %v5284_v62 = vsel %vm3973_vm3, %v5092_v56, %v10708_v15 }
 0x3b5   : > { %9272 = vmatprep.mubr.f32.mxu1 %v4805_v3  ;;  %v9824_v3 = vpack.c.bf16 %v5817_v8, %v5816_v57  ;;  %v5106_v57 = vld [vmem:[#allocation3 + $0x109] sm:$0xff] }
 0x3b8   : > { %9273 = vmatmul.mubr.f32.gmra.mrb[56].mxu1 %v4806_v54  ;;  %v5818_v54 = vld [vmem:[%s13524_s3 + $0x1d0] sm:$0xff] }
 0x3b9   : > { %9275 = vmatprep.mubr.f32.mxu1 %v4807_v5  ;;  %v9828_v37 = vpack.c.bf16 %v5819_v35, %v5818_v54  ;;  %v5109_v35 = vld [vmem:[#allocation3 + $0x129] sm:$0xff] }
 0x3bc   : > { %9276 = vmatmul.mubr.f32.gmra.mrb[58].mxu1 %v4808_v55  ;;  %v10719_v55 = vunpack.i.h.bf16 %v10717_v61  ;;  %v5107_v61 = vld [vmem:[#allocation3 + $0x111] sm:$0xff] }
 0x3bd   : > { %9278 = vmatprep.mubr.f32.mxu1 %v4809_v60  ;;  %v5820_v60 = vld [vmem:[%s13524_s3 + $0x1e0] sm:$0xff] }
 0x3be   : > { %v9832_v14 = vpack.c.bf16 %v5821_v11, %v5820_v60  ;;  %v5289_v22 = vsel %vm3973_vm3, %v5097_v30, %v10719_v55  ;;  %v5112_v11 = vld [vmem:[#allocation3 + $0x151] sm:$0xff]  ;;  %v5113_v30 = vld [vmem:[#allocation3 + $0x159] sm:$0xff] }
 0x3c0   : > { %9279 = vmatmul.mubr.f32.gmra.mrb[60].mxu1 %v4810_v9  ;;  %v10727_v9 = vpop.permute.xlu1 %10726 }
 0x3c1   : > { %9281 = vmatprep.mubr.f32.mxu1 %v4811_v46  ;;  %v10728_v51 = vunpack.i.l.bf16 %v10727_v9  ;;  %v10729_v52 = vunpack.i.h.bf16 %v10727_v9 }
 0x3c3   : > { %v5293_v33 = vsel %vm3973_vm3, %v5101_v31, %v10729_v52 }
 0x3c4   : > { %9282 = vmatmul.mubr.f32.gmra.mrb[62].mxu1 %v4812_v20  ;;  %v5823_v20 = vld [vmem:[%s13524_s3 + $0x1f8] sm:$0xff]  ;;  %v10737_v7 = vpop.permute.xlu1 %10736 }
 0x3c5   : > { %9316 = vmatprep.mubr.f32.mxu1 %v5278_v21  ;;  %v9836_v21 = vpack.c.bf16 %v5823_v20, %v5822_v17  ;;  %v10738_v39 = vunpack.i.l.bf16 %v10737_v7  ;;  %v10739_v59 = vunpack.i.h.bf16 %v10737_v7 }
 0x3c7   : > { %v5297_v56 = vsel %vm3973_vm3, %v5105_v1, %v10739_v59 }
 0x3c8   : > { %9317 = vmatmul.mubr.f32.vlgmr.msra.gmra.mrb[32].mxu1 %v5279_v26  ;;  %v6114_v26 = vld [vmem:[%s13524_s3 + $0x208] sm:$0xff] }
 0x3c9   : > { %9319 = vmatprep.mubr.f32.mxu1 %v5280_v41  ;;  %9811 = vmatpush3.bf16.msra.mxu1 %v12768_v38  ;;  %v10712_v38 = vpop.permute.xlu0 %10711  ;;  %v12869_v41 = vpack.c.bf16 %v6114_v26, %v6113_v40  ;;  %v5584_v26 = vld [vmem:[#allocation3 + $0x30] sm:$0xff] }
 0x3ca   : > { %9813 = vmatprep.subr.bf16.mxu1 %v9812_v6  ;;  %v10713_v48 = vunpack.i.l.bf16 %v10712_v38  ;;  %v10714_v13 = vunpack.i.h.bf16 %v10712_v38 }
 0x3cc   : > { %9320 = vmatmul.mubr.f32.gmra.mrb[34].mxu1 %v5281_v23  ;;  %v5286_v5 = vsel %vm3973_vm3, %v5094_v10, %v10713_v48  ;;  %v5287_v43 = vsel %vm3973_vm3, %v5095_v58, %v10714_v13  ;;  %v5108_v13 = vld [vmem:[#allocation3 + $0x121] sm:$0xff] }
 0x3cd   : > { %9322 = vmatprep.mubr.f32.mxu1 %v5282_v42  ;;  %9815 = vmatpush3.bf16.msra.mxu1 %v9812_v6  ;;  %v10722_v50 = vpop.permute.xlu0 %10721  ;;  %v5100_v6 = vld [vmem:[#allocation3 + $0xc1] sm:$0xff]  ;;  %v5104_v42 = vld [vmem:[#allocation3 + $0xf1] sm:$0xff] }
 0x3ce   : > { %9817 = vmatprep.subr.bf16.mxu1 %v9816_v2  ;;  %v10723_v44 = vunpack.i.l.bf16 %v10722_v50  ;;  %v10724_v46 = vunpack.i.h.bf16 %v10722_v50  ;;  %v5292_v12 = vsel %vm3973_vm3, %v5100_v6, %v10728_v51  ;;  %v5296_v36 = vsel %vm3973_vm3, %v5104_v42, %v10738_v39  ;;  %v5110_v50 = vld [vmem:[#allocation3 + $0x139] sm:$0xff]  ;;  %v5115_v51 = vld [vmem:[#allocation3 + $0x171] sm:$0xff] }
 0x3d0   : > { %9323 = vmatmul.mubr.f32.gmra.mrb[36].mxu1 %v5283_v53  ;;  %v5290_v47 = vsel %vm3973_vm3, %v5098_v49, %v10723_v44  ;;  %v5291_v45 = vsel %vm3973_vm3, %v5099_v29, %v10724_v46 }
 0x3d1   : > { %9325 = vmatprep.mubr.f32.mxu1 %v5284_v62  ;;  %9819 = vmatpush3.bf16.msra.mxu1 %v9816_v2  ;;  %v10732_v0 = vpop.permute.xlu0 %10731  ;;  %v5102_v2 = vld [vmem:[#allocation3 + $0xd9] sm:$0xff] }
 0x3d2   : > { %9821 = vmatprep.subr.bf16.mxu1 %v9820_v28  ;;  %v10733_v27 = vunpack.i.l.bf16 %v10732_v0  ;;  %v10734_v4 = vunpack.i.h.bf16 %v10732_v0 }
 0x3d4   : > { %9326 = vmatmul.mubr.f32.gmra.mrb[38].mxu1 %v5285_v16  ;;  %v5294_v23 = vsel %vm3973_vm3, %v5102_v2, %v10733_v27  ;;  %v5295_v15 = vsel %vm3973_vm3, %v5103_v19, %v10734_v4  ;;  %v6115_v27 = vld [vmem:[%s13524_s3 + $0x210] sm:$0xff]  ;;  %v5585_v4 = vld [vmem:[#allocation3 + $0x38] sm:$0xff] }
 0x3d5   : > { %9328 = vmatprep.mubr.f32.mxu1 %v5286_v5  ;;  %9823 = vmatpush3.bf16.msra.mxu1 %v9820_v28  ;;  %v10742_v34 = vpop.permute.xlu0 %10741  ;;  %v10747_v28 = vpop.permute.xlu1 %10746  ;;  %v6118_v19 = vld [vmem:[%s13524_s3 + $0x228] sm:$0xff] }
 0x3d6   : > { %9825 = vmatprep.subr.bf16.mxu1 %v9824_v3  ;;  %v10743_v38 = vunpack.i.l.bf16 %v10742_v34  ;;  %v10744_v53 = vunpack.i.h.bf16 %v10742_v34  ;;  %v10748_v8 = vunpack.i.l.bf16 %v10747_v28  ;;  %v10749_v18 = vunpack.i.h.bf16 %v10747_v28  ;;  %v6117_v34 = vld [vmem:[%s13524_s3 + $0x220] sm:$0xff] }
 0x3d8   : > { %9329 = vmatmul.mubr.f32.gmra.mrb[40].mxu1 %v5287_v43  ;;  %v5298_v48 = vsel %vm3973_vm3, %v5106_v57, %v10743_v38  ;;  %v5300_v10 = vsel %vm3973_vm3, %v5108_v13, %v10748_v8  ;;  %v5301_v5 = vsel %vm3973_vm3, %v5109_v35, %v10749_v18  ;;  %v5111_v43 = vld [vmem:[#allocation3 + $0x141] sm:$0xff]  ;;  %v5587_v38 = vld [vmem:[#allocation3 + $0x50] sm:$0xff]  ;;  %v5590_v13 = vld [vmem:[#allocation3 + $0x78] sm:$0xff] }
 0x3d9   : > { %9331 = vmatprep.mubr.f32.mxu1 %v5288_v24  ;;  %9827 = vmatpush3.bf16.msra.mxu1 %v9824_v3  ;;  %v10752_v62 = vpop.permute.xlu0 %10751  ;;  %v5299_v3 = vsel %vm3973_vm3, %v5107_v61, %v10744_v53  ;;  %v10757_v54 = vpop.permute.xlu1 %10756  ;;  %v5588_v53 = vld [vmem:[#allocation3 + $0x60] sm:$0xff]  ;;  %v6120_v57 = vld [vmem:[%s13524_s3 + $0x238] sm:$0xff] }
 0x3da   : > { %9829 = vmatprep.subr.bf16.mxu1 %v9828_v37  ;;  %v10753_v16 = vunpack.i.l.bf16 %v10752_v62  ;;  %v10754_v25 = vunpack.i.h.bf16 %v10752_v62  ;;  %v10758_v58 = vunpack.i.l.bf16 %v10757_v54  ;;  %v10759_v63 = vunpack.i.h.bf16 %v10757_v54  ;;  %v5589_v62 = vld [vmem:[#allocation3 + $0x68] sm:$0xff]  ;;  %v5591_v35 = vld [vmem:[#allocation3 + $0x80] sm:$0xff] }
 0x3dc   : > { %9332 = vmatmul.mubr.f32.gmra.mrb[42].mxu1 %v5289_v22  ;;  %v5303_v60 = vsel %vm3973_vm3, %v5111_v43, %v10754_v25  ;;  %v5304_v24 = vsel %vm3973_vm3, %v5112_v11, %v10758_v58  ;;  %v5305_v46 = vsel %vm3973_vm3, %v5113_v30, %v10759_v63  ;;  %v5114_v22 = vld [vmem:[#allocation3 + $0x169] sm:$0xff]  ;;  %v5593_v43 = vld [vmem:[#allocation3 + $0x98] sm:$0xff] }
 0x3dd   : > { %9334 = vmatprep.mubr.f32.mxu1 %v5290_v47  ;;  %9831 = vmatpush3.bf16.msra.mxu1 %v9828_v37  ;;  %v5302_v37 = vsel %vm3973_vm3, %v5110_v50, %v10753_v16  ;;  %v10762_v55 = vpop.permute.xlu0 %10761  ;;  %v10767_v9 = vpop.permute.xlu1 %10766  ;;  %v5592_v50 = vld [vmem:[#allocation3 + $0x90] sm:$0xff]  ;;  %v5594_v11 = vld [vmem:[#allocation3 + $0xa8] sm:$0xff] }
 0x3de   : > { %9833 = vmatprep.subr.bf16.mxu1 %v9832_v14  ;;  %v10763_v44 = vunpack.i.l.bf16 %v10762_v55  ;;  %v10768_v49 = vunpack.i.l.bf16 %v10767_v9  ;;  %v10769_v47 = vunpack.i.h.bf16 %v10767_v9  ;;  %v5595_v30 = vld [vmem:[#allocation3 + $0xb0] sm:$0xff] }
 0x3e0   : > { %9335 = vmatmul.mubr.f32.gmra.mrb[44].mxu1 %v5291_v45  ;;  %v5306_v17 = vsel %vm3973_vm3, %v5114_v22, %v10763_v44  ;;  %v5117_v45 = vld [vmem:[#allocation3 + $0x189] sm:$0xff]  ;;  %v5596_v22 = vld [vmem:[#allocation3 + $0xc0] sm:$0xff] }
 0x3e1   : > { %9337 = vmatprep.mubr.f32.mxu1 %v5292_v12  ;;  %9835 = vmatpush3.bf16.msra.mxu1 %v9832_v14  ;;  %v10764_v14 = vunpack.i.h.bf16 %v10762_v55  ;;  %v10772_v20 = vpop.permute.xlu0 %10771  ;;  %v10777_v52 = vpop.permute.xlu1 %10776  ;;  %v5309_v40 = vsel %vm3973_vm3, %v5117_v45, %v10769_v47  ;;  %v6116_v12 = vld [vmem:[%s13524_s3 + $0x218] sm:$0xff] }
 0x3e2   : > { %9837 = vmatprep.subr.bf16.mxu1 %v9836_v21  ;;  %v10773_v29 = vunpack.i.l.bf16 %v10772_v20  ;;  %v10774_v6 = vunpack.i.h.bf16 %v10772_v20  ;;  %v10778_v7 = vunpack.i.l.bf16 %v10777_v52  ;;  %v10779_v2 = vunpack.i.h.bf16 %v10777_v52 }
 0x3e3   : > { %v5307_v0 = vsel %vm3973_vm3, %v5115_v51, %v10764_v14  ;;  %v5597_v51 = vld [vmem:[#allocation3 + $0xc8] sm:$0xff] }
 0x3e4   : > { %9338 = vmatmul.mubr.f32.gmra.mrb[46].mxu1 %v5293_v33  ;;  %v5776_v31 = vsel %vm3973_vm3, %v5584_v26, %v10773_v29  ;;  %v9844_v33 = vpack.c.bf16 %v6116_v12, %v6115_v27  ;;  %v5777_v39 = vsel %vm3973_vm3, %v5585_v4, %v10774_v6  ;;  %v5779_v1 = vsel %vm3973_vm3, %v5587_v38, %v10779_v2  ;;  %v5598_v29 = vld [vmem:[#allocation3 + $0xd8] sm:$0xff]  ;;  %v5599_v6 = vld [vmem:[#allocation3 + $0xe0] sm:$0xff]  ;;  %v5600_v27 = vld [vmem:[#allocation3 + $0xf0] sm:$0xff] }
 0x3e5   : > { %9340 = vmatprep.mubr.f32.mxu1 %v5294_v23  ;;  %9839 = vmatpush3.bf16.msra.mxu1 %v9836_v21  ;;  %v5308_v21 = vsel %vm3973_vm3, %v12625_v32, %v10768_v49  ;;  %v10782_v32 = vpop.permute.xlu0 %10781  ;;  %v5586_v23 = vld [vmem:[#allocation3 + $0x48] sm:$0xff]  ;;  %v10787_v42 = vpop.permute.xlu1 %10786 }
 0x3e6   : > { %9841 = vmatprep.subr.bf16.mxu1 %v12869_v41  ;;  %v10783_v59 = vunpack.i.l.bf16 %v10782_v32  ;;  %v10784_v28 = vunpack.i.h.bf16 %v10782_v32  ;;  %v10788_v8 = vunpack.i.l.bf16 %v10787_v42  ;;  %v10789_v18 = vunpack.i.h.bf16 %v10787_v42  ;;  %v5601_v32 = vld [vmem:[#allocation3 + $0xf8] sm:$0xff]  ;;  %v5602_v2 = vld [vmem:[#allocation3 + $0x108] sm:$0xff]  ;;  %v5604_v42 = vld [vmem:[#allocation3 + $0x120] sm:$0xff] }
 0x3e8   : > { %9341 = vmatmul.mubr.f32.gmra.mrb[48].mxu1 %v5295_v15  ;;  %v5778_v15 = vsel %vm3973_vm3, %v5586_v23, %v10778_v7 }
 0x3e9   : > { %9343 = vmatprep.mubr.f32.mxu1 %v5296_v36  ;;  %v9848_v36 = vpack.c.bf16 %v6118_v19, %v6117_v34  ;;  %v10797_v54 = vpop.permute.xlu1 %10796  ;;  %v5603_v19 = vld [vmem:[#allocation3 + $0x110] sm:$0xff] }
 0x3ea   : > { %v10798_v58 = vunpack.i.l.bf16 %v10797_v54  ;;  %v10799_v63 = vunpack.i.h.bf16 %v10797_v54  ;;  %v5609_v54 = vld [vmem:[#allocation3 + $0x158] sm:$0xff] }
 0x3ec   : > { %9344 = vmatmul.mubr.f32.gmra.mrb[50].mxu1 %v5297_v56  ;;  %v6119_v56 = vld [vmem:[%s13524_s3 + $0x230] sm:$0xff] }
 0x3ed   : > { %9346 = vmatprep.mubr.f32.mxu1 %v5298_v48  ;;  %v5780_v48 = vsel %vm3973_vm3, %v5588_v53, %v10783_v59  ;;  %v9852_v61 = vpack.c.bf16 %v6120_v57, %v6119_v56  ;;  %v10807_v9 = vpop.permute.xlu1 %10806  ;;  %v5606_v57 = vld [vmem:[#allocation3 + $0x138] sm:$0xff] }
 0x3ee   : > { %v10808_v49 = vunpack.i.l.bf16 %v10807_v9  ;;  %v10809_v47 = vunpack.i.h.bf16 %v10807_v9 }
 0x3f0   : > { %9347 = vmatmul.mubr.f32.gmra.mrb[52].mxu1 %v5299_v3  ;;  %v5781_v3 = vsel %vm3973_vm3, %v5589_v62, %v10784_v28  ;;  %v5790_v52 = vsel %vm3973_vm3, %v5598_v29, %v10808_v49  ;;  %v5791_v26 = vsel %vm3973_vm3, %v5599_v6, %v10809_v47  ;;  %v5607_v62 = vld [vmem:[#allocation3 + $0x140] sm:$0xff]  ;;  %v6084_v47 = vld [vmem:[#allocation3 + $0x52] sm:$0xff]  ;;  %v6086_v29 = vld [vmem:[#allocation3 + $0x6a] sm:$0xff] }
 0x3f1   : > { %9349 = vmatprep.mubr.f32.mxu1 %v5300_v10  ;;  %v5782_v10 = vsel %vm3973_vm3, %v5590_v13, %v10788_v8  ;;  %v10817_v45 = vpop.permute.xlu1 %10816  ;;  %v6090_v6 = vld [vmem:[#allocation3 + $0x9a] sm:$0xff] }
 0x3f2   : > { %v10818_v12 = vunpack.i.l.bf16 %v10817_v45  ;;  %v10819_v4 = vunpack.i.h.bf16 %v10817_v45  ;;  %v6089_v45 = vld [vmem:[#allocation3 + $0x92] sm:$0xff] }
 0x3f4   : > { %9350 = vmatmul.mubr.f32.gmra.mrb[54].mxu1 %v5301_v5  ;;  %v5783_v5 = vsel %vm3973_vm3, %v5591_v35, %v10789_v18  ;;  %v5794_v23 = vsel %vm3973_vm3, %v5602_v2, %v10818_v12  ;;  %v6094_v12 = vld [vmem:[#allocation3 + $0xca] sm:$0xff]  ;;  %v6100_v2 = vld [vmem:[#allocation3 + $0x112] sm:$0xff] }
 0x3f5   : > { %9352 = vmatprep.mubr.f32.mxu1 %v5302_v37  ;;  %v10827_v34 = vpop.permute.xlu1 %10826 }
 0x3f6   : > { %v10828_v38 = vunpack.i.l.bf16 %v10827_v34  ;;  %v10829_v53 = vunpack.i.h.bf16 %v10827_v34  ;;  %v6103_v34 = vld [vmem:[#allocation3 + $0x13a] sm:$0xff] }
 0x3f8   : > { %9353 = vmatmul.mubr.f32.gmra.mrb[56].mxu1 %v5303_v60  ;;  %v5799_v18 = vsel %vm3973_vm3, %v5607_v62, %v10829_v53  ;;  %v6112_v53 = vld [vmem:[#allocation3 + $0x1a2] sm:$0xff]  ;;  %v6745_v62 = vld [vmem:[%s13526_s5 + $0x20] sm:$0xff] }
 0x3f9   : > { %9355 = vmatprep.mubr.f32.mxu1 %v5304_v24  ;;  %v5786_v24 = vsel %vm3973_vm3, %v5594_v11, %v10798_v58 }
 0x3fc   : > { %9356 = vmatmul.mubr.f32.gmra.mrb[58].mxu1 %v5305_v46  ;;  %v5787_v46 = vsel %vm3973_vm3, %v5595_v30, %v10799_v63 }
 0x3fd   : > { %9358 = vmatprep.mubr.f32.mxu1 %v5306_v17 }
 0x400   : > { %9359 = vmatmul.mubr.f32.gmra.mrb[60].mxu1 %v5307_v0 }
 0x401   : > { %9361 = vmatprep.mubr.f32.mxu1 %v5308_v21 }
 0x404   : > { %9362 = vmatmul.mubr.f32.gmra.mrb[62].mxu1 %v5309_v40 }
 0x405   : > { %9396 = vmatprep.mubr.f32.mxu1 %v5776_v31 }
 0x408   : > { %9397 = vmatmul.mubr.f32.vlgmr.msra.gmra.mrb[32].mxu1 %v5777_v39 }
 0x409   : > { %9399 = vmatprep.mubr.f32.mxu1 %v5778_v15  ;;  %9843 = vmatpush3.bf16.msra.mxu1 %v12869_v41  ;;  %v10792_v41 = vpop.permute.xlu0 %10791  ;;  %v5795_v15 = vsel %vm3973_vm3, %v5603_v19, %v10819_v4  ;;  %v6098_v4 = vld [vmem:[#allocation3 + $0xfa] sm:$0xff]  ;;  %v6104_v19 = vld [vmem:[#allocation3 + $0x142] sm:$0xff] }
 0x40a   : > { %9845 = vmatprep.subr.bf16.mxu1 %v9844_v33  ;;  %v10793_v16 = vunpack.i.l.bf16 %v10792_v41  ;;  %v10794_v25 = vunpack.i.h.bf16 %v10792_v41  ;;  %v10837_v41 = vpop.permute.xlu1 %10836 }
 0x40b   : > { %v10838_v13 = vunpack.i.l.bf16 %v10837_v41  ;;  %v10839_v35 = vunpack.i.h.bf16 %v10837_v41  ;;  %v6744_v41 = vld [vmem:[%s13526_s5 + $0x18] sm:$0xff] }
 0x40c   : > { %9400 = vmatmul.mubr.f32.gmra.mrb[34].mxu1 %v5779_v1  ;;  %v5784_v37 = vsel %vm3973_vm3, %v5592_v50, %v10793_v16  ;;  %v5785_v60 = vsel %vm3973_vm3, %v5593_v43, %v10794_v25  ;;  %v5605_v1 = vld [vmem:[#allocation3 + $0x128] sm:$0xff] }
 0x40d   : > { %9402 = vmatprep.mubr.f32.mxu1 %v5780_v48  ;;  %9847 = vmatpush3.bf16.msra.mxu1 %v9844_v33  ;;  %v10802_v55 = vpop.permute.xlu0 %10801  ;;  %v5798_v48 = vsel %vm3973_vm3, %v5606_v57, %v10828_v38  ;;  %v6108_v38 = vld [vmem:[#allocation3 + $0x172] sm:$0xff] }
 0x40e   : > { %9849 = vmatprep.subr.bf16.mxu1 %v9848_v36  ;;  %v10803_v44 = vunpack.i.l.bf16 %v10802_v55  ;;  %v10804_v14 = vunpack.i.h.bf16 %v10802_v55  ;;  %v5611_v55 = vld [vmem:[#allocation3 + $0x170] sm:$0xff]  ;;  %v6742_v57 = vld [vmem:[%s13526_s5 + $0x8] sm:$0xff] }
 0x40f   : > { %v5803_v63 = vsel %vm3973_vm3, %v5611_v55, %v10839_v35  ;;  %v6750_v35 = vld [vmem:[%s13526_s5 + $0x48] sm:$0xff]  ;;  %v6753_v55 = vld [vmem:[%s13526_s5 + $0x60] sm:$0xff] }
 0x410   : > { %9403 = vmatmul.mubr.f32.gmra.mrb[36].mxu1 %v5781_v3  ;;  %v5788_v17 = vsel %vm3973_vm3, %v5596_v22, %v10803_v44  ;;  %v5789_v0 = vsel %vm3973_vm3, %v5597_v51, %v10804_v14  ;;  %v5608_v3 = vld [vmem:[#allocation3 + $0x150] sm:$0xff]  ;;  %v5614_v14 = vld [vmem:[#allocation3 + $0x198] sm:$0xff]  ;;  %v5615_v22 = vld [vmem:[#allocation3 + $0x1a0] sm:$0xff] }
 0x411   : > { %9405 = vmatprep.mubr.f32.mxu1 %v5782_v10  ;;  %9851 = vmatpush3.bf16.msra.mxu1 %v9848_v36  ;;  %v10812_v20 = vpop.permute.xlu0 %10811  ;;  %v6083_v51 = vld [vmem:[#allocation3 + $0x4a] sm:$0xff] }
 0x412   : > { %9853 = vmatprep.subr.bf16.mxu1 %v9852_v61  ;;  %v10813_v21 = vunpack.i.l.bf16 %v10812_v20  ;;  %v10814_v40 = vunpack.i.h.bf16 %v10812_v20  ;;  %v6082_v20 = vld [vmem:[#allocation3 + $0x3a] sm:$0xff] }
 0x414   : > { %9406 = vmatmul.mubr.f32.gmra.mrb[38].mxu1 %v5783_v5  ;;  %v5792_v7 = vsel %vm3973_vm3, %v5600_v27, %v10813_v21  ;;  %v5793_v33 = vsel %vm3973_vm3, %v5601_v32, %v10814_v40  ;;  %v5610_v5 = vld [vmem:[#allocation3 + $0x168] sm:$0xff]  ;;  %v6087_v21 = vld [vmem:[#allocation3 + $0x7a] sm:$0xff]  ;;  %v6097_v32 = vld [vmem:[#allocation3 + $0xf2] sm:$0xff] }
 0x415   : > { %9408 = vmatprep.mubr.f32.mxu1 %v5784_v37  ;;  %9855 = vmatpush3.bf16.msra.mxu1 %v9852_v61  ;;  %v10822_v31 = vpop.permute.xlu0 %10821  ;;  %v5802_v58 = vsel %vm3973_vm3, %v5610_v5, %v10838_v13  ;;  %v10847_v37 = vpop.permute.xlu1 %10846  ;;  %v6091_v40 = vld [vmem:[#allocation3 + $0xaa] sm:$0xff]  ;;  %v6093_v27 = vld [vmem:[#allocation3 + $0xc2] sm:$0xff] }
 0x416   : > { %v10823_v39 = vunpack.i.l.bf16 %v10822_v31  ;;  %v10824_v59 = vunpack.i.h.bf16 %v10822_v31  ;;  %v10848_v11 = vunpack.i.l.bf16 %v10847_v37  ;;  %v10849_v9 = vunpack.i.h.bf16 %v10847_v37  ;;  %v6096_v31 = vld [vmem:[#allocation3 + $0xe2] sm:$0xff]  ;;  %v13012_v37 = vld [vmem:[%s13525_s4] ss:$0 sm:$0xff] }
 0x417   : > { %v6747_v13 = vld [vmem:[%s13526_s5 + $0x30] sm:$0xff] }
 0x418   : > { %9409 = vmatmul.mubr.f32.gmra.mrb[40].mxu1 %v5785_v60  ;;  %v5796_v36 = vsel %vm3973_vm3, %v5604_v42, %v10823_v39  ;;  %v5797_v56 = vsel %vm3973_vm3, %v5605_v1, %v10824_v59  ;;  %v5612_v60 = vld [vmem:[#allocation3 + $0x180] sm:$0xff]  ;;  %v5807_v49 = vsel %vm3973_vm3, %v5615_v22, %v10849_v9  ;;  %v6105_v59 = vld [vmem:[#allocation3 + $0x152] sm:$0xff]  ;;  %v6107_v42 = vld [vmem:[#allocation3 + $0x16a] sm:$0xff] }
 0x419   : > { %9411 = vmatprep.mubr.f32.mxu1 %v5786_v24  ;;  %v10832_v28 = vpop.permute.xlu0 %10831  ;;  %v5613_v24 = vld [vmem:[#allocation3 + $0x188] sm:$0xff]  ;;  %v6111_v1 = vld [vmem:[#allocation3 + $0x19a] sm:$0xff] }
 0x41a   : > { %v10833_v8 = vunpack.i.l.bf16 %v10832_v28  ;;  %v10834_v61 = vunpack.i.h.bf16 %v10832_v28  ;;  %v6101_v39 = vld [vmem:[#allocation3 + $0x122] sm:$0xff]  ;;  %v6110_v28 = vld [vmem:[#allocation3 + $0x18a] sm:$0xff] }
 0x41b   : > { %v6751_v5 = vld [vmem:[%s13526_s5 + $0x50] sm:$0xff] }
 0x41c   : > { %9412 = vmatmul.mubr.f32.gmra.mrb[42].mxu1 %v5787_v46  ;;  %v5800_v16 = vsel %vm3973_vm3, %v5608_v3, %v10833_v8  ;;  %v5801_v25 = vsel %vm3973_vm3, %v5609_v54, %v10834_v61  ;;  %v5806_v46 = vsel %vm3973_vm3, %v5614_v14, %v10848_v11  ;;  %v6749_v54 = vld [vmem:[%s13526_s5 + $0x40] sm:$0xff] }
 0x41d   : > { %9414 = vmatprep.mubr.f32.mxu1 %v5788_v17  ;;  %v10842_v10 = vpop.permute.xlu0 %10841  ;;  %v6081_v17 = vld [vmem:[#allocation3 + $0x32] sm:$0xff] }
 0x41e   : > { %v10843_v50 = vunpack.i.l.bf16 %v10842_v10  ;;  %v10844_v43 = vunpack.i.h.bf16 %v10842_v10 }
 0x420   : > { %9415 = vmatmul.mubr.f32.gmra.mrb[44].mxu1 %v5789_v0  ;;  %v5804_v44 = vsel %vm3973_vm3, %v5612_v60, %v10843_v50  ;;  %v5805_v30 = vsel %vm3973_vm3, %v5613_v24, %v10844_v43  ;;  %v6085_v0 = vld [vmem:[#allocation3 + $0x62] sm:$0xff]  ;;  %v6754_v43 = vld [vmem:[%s13526_s5 + $0x68] sm:$0xff] }
 0x421   : > { %9417 = vmatprep.mubr.f32.mxu1 %v5790_v52  ;;  %v6088_v52 = vld [vmem:[#allocation3 + $0x82] sm:$0xff] }
 0x422   : > { %v6752_v50 = vld [vmem:[%s13526_s5 + $0x58] sm:$0xff] }
 0x424   : > { %9418 = vmatmul.mubr.f32.gmra.mrb[46].mxu1 %v5791_v26  ;;  %v6092_v26 = vld [vmem:[#allocation3 + $0xb2] sm:$0xff] }
 0x425   : > { %9420 = vmatprep.mubr.f32.mxu1 %v5792_v7  ;;  %v6095_v7 = vld [vmem:[#allocation3 + $0xda] sm:$0xff] }
 0x428   : > { %9421 = vmatmul.mubr.f32.gmra.mrb[48].mxu1 %v5793_v33  ;;  %v6099_v33 = vld [vmem:[#allocation3 + $0x10a] sm:$0xff] }
 0x429   : > { %9423 = vmatprep.mubr.f32.mxu1 %v5794_v23  ;;  %v6102_v23 = vld [vmem:[#allocation3 + $0x12a] sm:$0xff] }
 0x42c   : > { %9424 = vmatmul.mubr.f32.gmra.mrb[50].mxu1 %v5795_v15  ;;  %v6106_v15 = vld [vmem:[#allocation3 + $0x15a] sm:$0xff] }
 0x42d   : > { %9426 = vmatprep.mubr.f32.mxu1 %v5796_v36  ;;  %v6109_v36 = vld [vmem:[#allocation3 + $0x182] sm:$0xff] }
 0x430   : > { %9427 = vmatmul.mubr.f32.gmra.mrb[52].mxu1 %v5797_v56  ;;  %v6741_v56 = vld [vmem:[%s13526_s5] sm:$0xff] }
 0x431   : > { %9429 = vmatprep.mubr.f32.mxu1 %v5798_v48  ;;  %v9856_v8 = vpack.c.bf16 %v6742_v57, %v6741_v56  ;;  %v6743_v48 = vld [vmem:[%s13526_s5 + $0x10] sm:$0xff] }
 0x432   : > { %v9860_v61 = vpack.c.bf16 %v6744_v41, %v6743_v48 }
 0x433   : > { %9857 = vmatprep.subr.bf16.mxu1 %v9856_v8 }
 0x434   : > { %9430 = vmatmul.mubr.f32.gmra.mrb[54].mxu1 %v5799_v18  ;;  %v6746_v18 = vld [vmem:[%s13526_s5 + $0x28] sm:$0xff] }
 0x435   : > { %9432 = vmatprep.mubr.f32.mxu1 %v5800_v16  ;;  %v9864_v3 = vpack.c.bf16 %v6746_v18, %v6745_v62  ;;  %v6748_v16 = vld [vmem:[%s13526_s5 + $0x38] sm:$0xff] }
 0x436   : > { %v9868_v10 = vpack.c.bf16 %v6748_v16, %v6747_v13 }
 0x438   : > { %9433 = vmatmul.mubr.f32.gmra.mrb[56].mxu1 %v5801_v25  ;;  %v9872_v25 = vpack.c.bf16 %v6750_v35, %v6749_v54  ;;  %v6755_v54 = vld [vmem:[%s13526_s5 + $0x70] sm:$0xff]  ;;  %v6756_v35 = vld [vmem:[%s13526_s5 + $0x78] sm:$0xff] }
 0x439   : > { %9435 = vmatprep.mubr.f32.mxu1 %v5802_v58  ;;  %v9876_v58 = vpack.c.bf16 %v6752_v50, %v6751_v5 }
 0x43c   : > { %9436 = vmatmul.mubr.f32.gmra.mrb[58].mxu1 %v5803_v63 }
 0x43d   : > { %9438 = vmatprep.mubr.f32.mxu1 %v5804_v44  ;;  %v9880_v44 = vpack.c.bf16 %v6754_v43, %v6753_v55 }
 0x440   : > { %9439 = vmatmul.mubr.f32.gmra.mrb[60].mxu1 %v5805_v30 }
 0x441   : > { %9441 = vmatprep.mubr.f32.mxu1 %v5806_v46 }
 0x444   : > { %9442 = vmatmul.mubr.f32.gmra.mrb[62].mxu1 %v5807_v49 }
 0x445   : > { %9460 = vmatprep.mubr.msk.f32.mxu1 %vm3973_vm3, %v6081_v17 }
 0x448   : > { %9461 = vmatmul.mubr.msk.f32.vlgmr.msra.gmra.mrb[32].mxu1 %vm3973_vm3, %v6082_v20 }
 0x449   : > { %9463 = vmatprep.mubr.msk.f32.mxu1 %vm3973_vm3, %v6083_v51  ;;  %9859 = vmatpush3.bf16.msra.mxu1 %v9856_v8 }
 0x44a   : > { %9861 = vmatprep.subr.bf16.mxu1 %v9860_v61 }
 0x44c   : > { %9464 = vmatmul.mubr.msk.f32.gmra.mrb[34].mxu1 %vm3973_vm3, %v6084_v47 }
 0x44d   : > { %9466 = vmatprep.mubr.msk.f32.mxu1 %vm3973_vm3, %v6085_v0  ;;  %9863 = vmatpush3.bf16.msra.mxu1 %v9860_v61 }
 0x44e   : > { %9865 = vmatprep.subr.bf16.mxu1 %v9864_v3 }
 0x450   : > { %9467 = vmatmul.mubr.msk.f32.gmra.mrb[36].mxu1 %vm3973_vm3, %v6086_v29 }
 0x451   : > { %9469 = vmatprep.mubr.msk.f32.mxu1 %vm3973_vm3, %v6087_v21  ;;  %9867 = vmatpush3.bf16.msra.mxu1 %v9864_v3 }
 0x452   : > { %9869 = vmatprep.subr.bf16.mxu1 %v9868_v10 }
 0x454   : > { %9470 = vmatmul.mubr.msk.f32.gmra.mrb[38].mxu1 %vm3973_vm3, %v6088_v52 }
 0x455   : > { %9472 = vmatprep.mubr.msk.f32.mxu1 %vm3973_vm3, %v6089_v45  ;;  %9871 = vmatpush3.bf16.msra.mxu1 %v9868_v10 }
 0x456   : > { %9873 = vmatprep.subr.bf16.mxu1 %v9872_v25 }
 0x458   : > { %9473 = vmatmul.mubr.msk.f32.gmra.mrb[40].mxu1 %vm3973_vm3, %v6090_v6 }
 0x459   : > { %9475 = vmatprep.mubr.msk.f32.mxu1 %vm3973_vm3, %v6091_v40  ;;  %9875 = vmatpush3.bf16.msra.mxu1 %v9872_v25 }
 0x45a   : > { %9877 = vmatprep.subr.bf16.mxu1 %v9876_v58 }
 0x45c   : > { %9476 = vmatmul.mubr.msk.f32.gmra.mrb[42].mxu1 %vm3973_vm3, %v6092_v26 }
 0x45d   : > { %9478 = vmatprep.mubr.msk.f32.mxu1 %vm3973_vm3, %v6093_v27  ;;  %9879 = vmatpush3.bf16.msra.mxu1 %v9876_v58  ;;  %v9884_v58 = vpack.c.bf16 %v6756_v35, %v6755_v54 }
 0x45e   : > { %9881 = vmatprep.subr.bf16.mxu1 %v9880_v44 }
 0x460   : > { %9479 = vmatmul.mubr.msk.f32.gmra.mrb[44].mxu1 %vm3973_vm3, %v6094_v12 }
 0x461   : > { %9481 = vmatprep.mubr.msk.f32.mxu1 %vm3973_vm3, %v6095_v7  ;;  %9883 = vmatpush3.bf16.msra.mxu1 %v9880_v44 }
 0x462   : > { %9885 = vmatprep.subr.bf16.mxu1 %v9884_v58 }
 0x464   : > { %9482 = vmatmul.mubr.msk.f32.gmra.mrb[46].mxu1 %vm3973_vm3, %v6096_v31 }
 0x465   : > { %9484 = vmatprep.mubr.msk.f32.mxu1 %vm3973_vm3, %v6097_v32  ;;  %9887 = vmatpush3.bf16.msra.mxu1 %v9884_v58 }
 0x468   : > { %9485 = vmatmul.mubr.msk.f32.gmra.mrb[48].mxu1 %vm3973_vm3, %v6098_v4 }
 0x469   : > { %9487 = vmatprep.mubr.msk.f32.mxu1 %vm3973_vm3, %v6099_v33 }
 0x46c   : > { %9488 = vmatmul.mubr.msk.f32.gmra.mrb[50].mxu1 %vm3973_vm3, %v6100_v2 }
 0x46d   : > { %9490 = vmatprep.mubr.msk.f32.mxu1 %vm3973_vm3, %v6101_v39 }
 0x470   : > { %9491 = vmatmul.mubr.msk.f32.gmra.mrb[52].mxu1 %vm3973_vm3, %v6102_v23 }
 0x471   : > { %9493 = vmatprep.mubr.msk.f32.mxu1 %vm3973_vm3, %v6103_v34 }
 0x474   : > { %9494 = vmatmul.mubr.msk.f32.gmra.mrb[54].mxu1 %vm3973_vm3, %v6104_v19 }
 0x475   : > { %9496 = vmatprep.mubr.msk.f32.mxu1 %vm3973_vm3, %v6105_v59 }
 0x478   : > { %9497 = vmatmul.mubr.msk.f32.gmra.mrb[56].mxu1 %vm3973_vm3, %v6106_v15 }
 0x479   : > { %9499 = vmatprep.mubr.msk.f32.mxu1 %vm3973_vm3, %v6107_v42 }
 0x47c   : > { %9500 = vmatmul.mubr.msk.f32.gmra.mrb[58].mxu1 %vm3973_vm3, %v6108_v38 }
 0x47d   : > { %9502 = vmatprep.mubr.msk.f32.mxu1 %vm3973_vm3, %v6109_v36 }
 0x480   : > { %9503 = vmatmul.mubr.msk.f32.gmra.mrb[60].mxu1 %vm3973_vm3, %v6110_v28 }
 0x481   : > { %9505 = vmatprep.mubr.msk.f32.mxu1 %vm3973_vm3, %v6111_v1 }
 0x484   : > { %9506 = vmatmul.mubr.msk.f32.gmra.mrb[62].mxu1 %vm3973_vm3, %v6112_v53 }
 0x51b   : > { %v9462_v63 = vpop.f32.mrb[32].mxu1 }
 0x51c   : > { %v10064_v60 = vadd.f32 %v9462_v63, %v13012_v37  ;;  %v6283_v11 = vpop.f32.mrb[33].mxu1 }
 0x51d   : > { %v10065_v24 = vadd.f32 %v13012_v37, %v6283_v11 }
 0x51e   : > { %v6475_v9 = vmax.f32 %v10064_v60, 0.0 }
 0x51f   : > { %v6474_v30 = vmax.f32 %v10065_v24, 0.0  ;;  %v9465_v14 = vpop.f32.mrb[34].mxu1 }
 0x520   : > { %6507 = vst.msk [vmem:[#allocation4 + $0x8] sm:$0xff] %vm3973_vm3, %v6475_v9  ;;  %v10066_v46 = vadd.f32 %v9465_v14, %v13012_v37  ;;  %v6293_v22 = vpop.f32.mrb[35].mxu1 }
 0x521   : > { %6506 = vst.msk [vmem:[#allocation4] sm:$0xff] %vm3973_vm3, %v6474_v30  ;;  %v10067_v49 = vadd.f32 %v13012_v37, %v6293_v22 }
 0x522   : > { %v6477_v17 = vmax.f32 %v10066_v46, 0.0 }
 0x523   : > { %v6476_v20 = vmax.f32 %v10067_v49, 0.0  ;;  %v9468_v51 = vpop.f32.mrb[36].mxu1 }
 0x524   : > { %6509 = vst.msk [vmem:[#allocation4 + $0x18] sm:$0xff] %vm3973_vm3, %v6477_v17  ;;  %v10068_v47 = vadd.f32 %v9468_v51, %v13012_v37  ;;  %v6303_v0 = vpop.f32.mrb[37].mxu1 }
 0x525   : > { %6508 = vst.msk [vmem:[#allocation4 + $0x10] sm:$0xff] %vm3973_vm3, %v6476_v20  ;;  %v10069_v29 = vadd.f32 %v13012_v37, %v6303_v0 }
 0x526   : > { %v6479_v21 = vmax.f32 %v10068_v47, 0.0 }
 0x527   : > { %v6478_v52 = vmax.f32 %v10069_v29, 0.0  ;;  %v9471_v45 = vpop.f32.mrb[38].mxu1 }
 0x528   : > { %6511 = vst.msk [vmem:[#allocation4 + $0x28] sm:$0xff] %vm3973_vm3, %v6479_v21  ;;  %v10070_v6 = vadd.f32 %v9471_v45, %v13012_v37  ;;  %v6313_v40 = vpop.f32.mrb[39].mxu1  ;;  %v6538_v27 = vld [vmem:[#allocation4] ss:$2 sm:$0xff]  ;;  %v6570_v12 = vld [vmem:[#allocation4 + $0x1] ss:$2 sm:$0xff] }
 0x529   : > { %6510 = vst.msk [vmem:[#allocation4 + $0x20] sm:$0xff] %vm3973_vm3, %v6478_v52  ;;  %v10071_v26 = vadd.f32 %v13012_v37, %v6313_v40  ;;  %v6601_v23 = vmax.f32 %v6538_v27, %v6570_v12 }
 0x52a   : > { %v6481_v7 = vmax.f32 %v10070_v6, 0.0 }
 0x52b   : > { %v6480_v31 = vmax.f32 %v10071_v26, 0.0  ;;  %v9474_v32 = vpop.f32.mrb[40].mxu1 }
 0x52c   : > { %v6540_v4 = vld [vmem:[#allocation4 + $0x10] ss:$2 sm:$0xff]  ;;  %v6572_v33 = vld [vmem:[#allocation4 + $0x11] ss:$2 sm:$0xff]  ;;  %6513 = vst.msk [vmem:[#allocation4 + $0x38] sm:$0xff] %vm3973_vm3, %v6481_v7  ;;  %v10072_v2 = vadd.f32 %v9474_v32, %v13012_v37  ;;  %v6323_v39 = vpop.f32.mrb[41].mxu1 }
 0x52d   : > { %v6602_v34 = vmax.f32 %v6540_v4, %v6572_v33  ;;  %6512 = vst.msk [vmem:[#allocation4 + $0x30] sm:$0xff] %vm3973_vm3, %v6480_v31  ;;  %v10073_v19 = vadd.f32 %v13012_v37, %v6323_v39 }
 0x52e   : > { %v6483_v59 = vmax.f32 %v10072_v2, 0.0 }
 0x52f   : > { %v6617_v15 = vmax.f32 %v6601_v23, %v6602_v34  ;;  %v6482_v42 = vmax.f32 %v10073_v19, 0.0  ;;  %v9477_v38 = vpop.f32.mrb[42].mxu1  ;;  %v6926_v34 = vld [vmem:[%s13526_s5 + $0x80] sm:$0xff]  ;;  %v6927_v19 = vld [vmem:[%s13526_s5 + $0x88] sm:$0xff] }
 0x530   : > { %6515 = vst.msk [vmem:[#allocation4 + $0x48] sm:$0xff] %vm3973_vm3, %v6483_v59  ;;  %v10074_v36 = vadd.f32 %v9477_v38, %v13012_v37  ;;  %v6333_v28 = vpop.f32.mrb[43].mxu1  ;;  %v6542_v53 = vld [vmem:[#allocation4 + $0x20] ss:$2 sm:$0xff]  ;;  %v6574_v56 = vld [vmem:[#allocation4 + $0x21] ss:$2 sm:$0xff] }
 0x531   : > { %6626 = vst.msk [vmem:[#allocation5 + $0x11] sm:$0xff] %vm3973_vm3, %v6617_v15  ;;  %6514 = vst.msk [vmem:[#allocation4 + $0x40] sm:$0xff] %vm3973_vm3, %v6482_v42  ;;  %v10075_v1 = vadd.f32 %v13012_v37, %v6333_v28  ;;  %v6603_v3 = vmax.f32 %v6542_v53, %v6574_v56 }
 0x532   : > { %v6485_v57 = vmax.f32 %v10074_v36, 0.0  ;;  %v13085_v36 = vpack.c.bf16 %v6927_v19, %v6926_v34 }
 0x533   : > { %v6484_v8 = vmax.f32 %v10075_v1, 0.0  ;;  %v9480_v48 = vpop.f32.mrb[44].mxu1 }
 0x534   : > { %v6544_v41 = vld [vmem:[#allocation4 + $0x30] ss:$2 sm:$0xff]  ;;  %v6576_v62 = vld [vmem:[#allocation4 + $0x31] ss:$2 sm:$0xff]  ;;  %6517 = vst.msk [vmem:[#allocation4 + $0x58] sm:$0xff] %vm3973_vm3, %v6485_v57  ;;  %v10076_v61 = vadd.f32 %v9480_v48, %v13012_v37  ;;  %v6343_v18 = vpop.f32.mrb[45].mxu1  ;;  %9889 = vmatprep.subr.bf16.mxu1 %v13085_v36 }
 0x535   : > { %v6604_v13 = vmax.f32 %v6544_v41, %v6576_v62  ;;  %6516 = vst.msk [vmem:[#allocation4 + $0x50] sm:$0xff] %vm3973_vm3, %v6484_v8  ;;  %v10077_v16 = vadd.f32 %v13012_v37, %v6343_v18 }
 0x536   : > { %v6487_v10 = vmax.f32 %v10076_v61, 0.0 }
 0x537   : > { %v6618_v25 = vmax.f32 %v6603_v3, %v6604_v13  ;;  %v6486_v5 = vmax.f32 %v10077_v16, 0.0  ;;  %v9483_v50 = vpop.f32.mrb[46].mxu1 }
 0x538   : > { %6519 = vst.msk [vmem:[#allocation4 + $0x68] sm:$0xff] %vm3973_vm3, %v6487_v10  ;;  %v10078_v55 = vadd.f32 %v9483_v50, %v13012_v37  ;;  %v6353_v43 = vpop.f32.mrb[47].mxu1  ;;  %v6638_v60 = vld [vmem:[#allocation5 + $0x12] sm:$0x1]  ;;  %v6658_v11 = vld [vmem:[#allocation5 + $0x17] sm:$0x1] }
 0x539   : > { %6627 = vst.msk [vmem:[#allocation5 + $0x21] sm:$0xff] %vm3973_vm3, %v6618_v25  ;;  %6634 = vst.msk [vmem:[#allocation5 + $0x1] sm:$0xff] %vm3973_vm3, %v6618_v25  ;;  %v10079_v63 = vadd.f32 %v13012_v37, %v6353_v43  ;;  %v6546_v44 = vld [vmem:[#allocation4 + $0x40] ss:$2 sm:$0xff]  ;;  %v6578_v24 = vld [vmem:[#allocation4 + $0x41] ss:$2 sm:$0xff] }
 0x53a   : > { %6518 = vst.msk [vmem:[#allocation4 + $0x60] sm:$0xff] %vm3973_vm3, %v6486_v5  ;;  %v6489_v9 = vmax.f32 %v10078_v55, 0.0  ;;  %v6605_v20 = vmax.f32 %v6546_v44, %v6578_v24  ;;  %v13067_v26 = vld [vmem:[#allocation5 + $0x11] sm:$0xff] }
 0x53b   : > { %6648 = vst.msk [vmem:[#allocation5 + $0x10] sm:$0x1] %vm4029_vm4, %v6638_v60  ;;  %6668 = vst.msk [vmem:[#allocation5 + $0x19] sm:$0x1] %vm4029_vm4, %v6658_v11  ;;  %v6488_v30 = vmax.f32 %v10079_v63, 0.0  ;;  %v9486_v14 = vpop.f32.mrb[48].mxu1 }
 0x53c   : > { %v6548_v46 = vld [vmem:[#allocation4 + $0x50] ss:$2 sm:$0xff]  ;;  %v6580_v22 = vld [vmem:[#allocation4 + $0x51] ss:$2 sm:$0xff]  ;;  %6521 = vst.msk [vmem:[#allocation4 + $0x78] sm:$0xff] %vm3973_vm3, %v6489_v9  ;;  %v10080_v49 = vadd.f32 %v9486_v14, %v13012_v37  ;;  %v6363_v17 = vpop.f32.mrb[49].mxu1 }
 0x53d   : > { %v6606_v51 = vmax.f32 %v6548_v46, %v6580_v22  ;;  %6520 = vst.msk [vmem:[#allocation4 + $0x70] sm:$0xff] %vm3973_vm3, %v6488_v30  ;;  %v10081_v47 = vadd.f32 %v13012_v37, %v6363_v17 }
 0x53e   : > { %v6491_v0 = vmax.f32 %v10080_v49, 0.0 }
 0x53f   : > { %v6619_v29 = vmax.f32 %v6605_v20, %v6606_v51  ;;  %v6490_v21 = vmax.f32 %v10081_v47, 0.0  ;;  %v9489_v52 = vpop.f32.mrb[50].mxu1 }
 0x540   : > { %6523 = vst.msk [vmem:[#allocation4 + $0x88] sm:$0xff] %vm3973_vm3, %v6491_v0  ;;  %v10082_v45 = vadd.f32 %v9489_v52, %v13012_v37  ;;  %v6373_v6 = vpop.f32.mrb[51].mxu1  ;;  %v6693_v40 = vld [vmem:[#allocation5 + $0x1] sm:$0xff] }
 0x541   : > { %6628 = vst.msk [vmem:[#allocation5 + $0x31] sm:$0xff] %vm3973_vm3, %v6619_v29  ;;  %v6550_v27 = vld [vmem:[#allocation4 + $0x60] ss:$2 sm:$0xff]  ;;  %v6582_v12 = vld [vmem:[#allocation4 + $0x61] ss:$2 sm:$0xff]  ;;  %6522 = vst.msk [vmem:[#allocation4 + $0x80] sm:$0xff] %vm3973_vm3, %v6490_v21  ;;  %v10083_v7 = vadd.f32 %v13012_v37, %v6373_v6  ;;  %v10850_v31 = vpack.i.bf16 %v13067_v26, %v6693_v40 }
 0x542   : > { %v6639_v32 = vld [vmem:[#allocation5 + $0x22] sm:$0x1]  ;;  %v6493_v4 = vmax.f32 %v10082_v45, 0.0  ;;  %v6659_v33 = vld [vmem:[#allocation5 + $0x27] sm:$0x1]  ;;  %v6607_v28 = vmax.f32 %v6550_v27, %v6582_v12 }
 0x543   : > { %6649 = vst.msk [vmem:[#allocation5 + $0x20] sm:$0x1] %vm4029_vm4, %v6639_v32  ;;  %v6637_v2 = vld [vmem:[#allocation5 + $0x2] sm:$0x1]  ;;  %v6492_v39 = vmax.f32 %v10083_v7, 0.0  ;;  %10851 = vrot.lane.b32.xlu0 %v10850_v31, %s10994_s18  ;;  %v9492_v23 = vpop.f32.mrb[52].mxu1 }
 0x544   : > { %6669 = vst.msk [vmem:[#allocation5 + $0x29] sm:$0x1] %vm4029_vm4, %v6659_v33  ;;  %6647 = vst.msk [vmem:[#allocation5] sm:$0x1] %vm4029_vm4, %v6637_v2  ;;  %v6552_v59 = vld [vmem:[#allocation4 + $0x70] ss:$2 sm:$0xff]  ;;  %v10084_v42 = vadd.f32 %v9492_v23, %v13012_v37 }
 0x545   : > { %v6584_v15 = vld [vmem:[#allocation4 + $0x71] ss:$2 sm:$0xff]  ;;  %6525 = vst.msk [vmem:[#allocation4 + $0x98] sm:$0xff] %vm3973_vm3, %v6493_v4  ;;  %v6383_v38 = vpop.f32.mrb[53].mxu1  ;;  %6524 = vst.msk [vmem:[#allocation4 + $0x90] sm:$0xff] %vm3973_vm3, %v6492_v39  ;;  %v13093_v18 = vld [vmem:[#allocation5 + $0x21] sm:$0xff] }
 0x546   : > { %v6608_v1 = vmax.f32 %v6552_v59, %v6584_v15  ;;  %v10085_v53 = vadd.f32 %v13012_v37, %v6383_v38  ;;  %v6657_v56 = vld [vmem:[#allocation5 + $0x7] sm:$0x1]  ;;  %v6495_v57 = vmax.f32 %v10084_v42, 0.0 }
 0x547   : > { %6667 = vst.msk [vmem:[#allocation5 + $0x9] sm:$0x1] %vm4029_vm4, %v6657_v56  ;;  %v9495_v41 = vpop.f32.mrb[54].mxu1 }
 0x548   : > { %v6620_v8 = vmax.f32 %v6607_v28, %v6608_v1  ;;  %v6494_v48 = vmax.f32 %v10085_v53, 0.0  ;;  %6527 = vst.msk [vmem:[#allocation4 + $0xa8] sm:$0xff] %vm3973_vm3, %v6495_v57  ;;  %v10086_v62 = vadd.f32 %v9495_v41, %v13012_v37  ;;  %v6393_v61 = vpop.f32.mrb[55].mxu1  ;;  %v13095_v3 = vld [vmem:[#allocation5 + $0x31] sm:$0xff]  ;;  %v6554_v35 = vld [vmem:[#allocation4 + $0x80] ss:$2 sm:$0xff] }
 0x549   : > { %v10087_v13 = vadd.f32 %v13012_v37, %v6393_v61  ;;  %v13102_v16 = vpack.i.bf16 %v13095_v3, %v13093_v18  ;;  %v6640_v10 = vld [vmem:[#allocation5 + $0x32] sm:$0x1]  ;;  %v6660_v54 = vld [vmem:[#allocation5 + $0x37] sm:$0x1]  ;;  %v6586_v25 = vld [vmem:[#allocation4 + $0x81] ss:$2 sm:$0xff] }
 0x54a   : > { %6629 = vst.msk [vmem:[#allocation5 + $0x41] sm:$0xff] %vm3973_vm3, %v6620_v8  ;;  %6526 = vst.msk [vmem:[#allocation4 + $0xa0] sm:$0xff] %vm3973_vm3, %v6494_v48  ;;  %v6497_v5 = vmax.f32 %v10086_v62, 0.0  ;;  %v6609_v11 = vmax.f32 %v6554_v35, %v6586_v25  ;;  %v13136_v56 = vld [vmem:[#allocation5 + $0x20] sm:$0xff]  ;;  %v13143_v48 = vld [vmem:[#allocation5 + $0x10] sm:$0xff] }
 0x54b   : > { %6650 = vst.msk [vmem:[#allocation5 + $0x30] sm:$0x1] %vm4029_vm4, %v6640_v10  ;;  %6670 = vst.msk [vmem:[#allocation5 + $0x39] sm:$0x1] %vm4029_vm4, %v6660_v54  ;;  %v6496_v50 = vmax.f32 %v10087_v13, 0.0  ;;  %10856 = vrot.lane.b32.xlu1 %v13102_v16, %s10994_s18  ;;  %v9498_v58 = vpop.f32.mrb[56].mxu1  ;;  %v10870_v61 = vpack.i.bf16 %v13136_v56, %v13143_v48 }
 0x54c   : > { %v6556_v55 = vld [vmem:[#allocation4 + $0x90] ss:$2 sm:$0xff]  ;;  %v6588_v43 = vld [vmem:[#allocation4 + $0x91] ss:$2 sm:$0xff]  ;;  %6529 = vst.msk [vmem:[#allocation4 + $0xb8] sm:$0xff] %vm3973_vm3, %v6497_v5  ;;  %v10088_v63 = vadd.f32 %v9498_v58, %v13012_v37  ;;  %v6403_v60 = vpop.f32.mrb[57].mxu1 }
 0x54d   : > { %v6610_v44 = vmax.f32 %v6556_v55, %v6588_v43  ;;  %6528 = vst.msk [vmem:[#allocation4 + $0xb0] sm:$0xff] %vm3973_vm3, %v6496_v50  ;;  %v10089_v24 = vadd.f32 %v13012_v37, %v6403_v60 }
 0x54e   : > { %v6499_v9 = vmax.f32 %v10088_v63, 0.0 }
 0x54f   : > { %v6621_v30 = vmax.f32 %v6609_v11, %v6610_v44  ;;  %v6498_v14 = vmax.f32 %v10089_v24, 0.0  ;;  %v9501_v46 = vpop.f32.mrb[58].mxu1 }
 0x550   : > { %6531 = vst.msk [vmem:[#allocation4 + $0xc8] sm:$0xff] %vm3973_vm3, %v6499_v9  ;;  %v10090_v22 = vadd.f32 %v9501_v46, %v13012_v37  ;;  %v6413_v49 = vpop.f32.mrb[59].mxu1  ;;  %v13167_v46 = vld [vmem:[#allocation5 + $0x22] sm:$0xff] }
 0x551   : > { %6630 = vst.msk [vmem:[#allocation5 + $0x51] sm:$0xff] %vm3973_vm3, %v6621_v30  ;;  %6530 = vst.msk [vmem:[#allocation4 + $0xc0] sm:$0xff] %vm3973_vm3, %v6498_v14  ;;  %v10091_v17 = vadd.f32 %v13012_v37, %v6413_v49  ;;  %v6641_v20 = vld [vmem:[#allocation5 + $0x42] sm:$0x1]  ;;  %v6661_v51 = vld [vmem:[#allocation5 + $0x47] sm:$0x1] }
 0x552   : > { %v6558_v47 = vld [vmem:[#allocation4 + $0xa0] ss:$2 sm:$0xff]  ;;  %v6590_v0 = vld [vmem:[#allocation4 + $0xa1] ss:$2 sm:$0xff]  ;;  %v6501_v29 = vmax.f32 %v10090_v22, 0.0 }
 0x553   : > { %6651 = vst.msk [vmem:[#allocation5 + $0x40] sm:$0x1] %vm4029_vm4, %v6641_v20  ;;  %6671 = vst.msk [vmem:[#allocation5 + $0x49] sm:$0x1] %vm4029_vm4, %v6661_v51  ;;  %v6500_v21 = vmax.f32 %v10091_v17, 0.0  ;;  %v9504_v52 = vpop.f32.mrb[60].mxu1  ;;  %v6611_v12 = vmax.f32 %v6558_v47, %v6590_v0 }
 0x554   : > { %v6560_v45 = vld [vmem:[#allocation4 + $0xb0] ss:$2 sm:$0xff]  ;;  %v6592_v6 = vld [vmem:[#allocation4 + $0xb1] ss:$2 sm:$0xff]  ;;  %6533 = vst.msk [vmem:[#allocation4 + $0xd8] sm:$0xff] %vm3973_vm3, %v6501_v29  ;;  %v10092_v40 = vadd.f32 %v9504_v52, %v13012_v37  ;;  %v6423_v27 = vpop.f32.mrb[61].mxu1 }
 0x555   : > { %v6612_v7 = vmax.f32 %v6560_v45, %v6592_v6  ;;  %6532 = vst.msk [vmem:[#allocation4 + $0xd0] sm:$0xff] %vm3973_vm3, %v6500_v21  ;;  %v10093_v31 = vadd.f32 %v13012_v37, %v6423_v27  ;;  %v13125_v34 = vld [vmem:[#allocation5 + $0x41] sm:$0xff]  ;;  %v13175_v20 = vld [vmem:[#allocation5 + $0x12] sm:$0xff] }
 0x556   : > { %v6503_v32 = vmax.f32 %v10092_v40, 0.0  ;;  %v13177_v51 = vld [vmem:[#allocation5 + $0x30] sm:$0xff]  ;;  %v10890_v47 = vpack.i.bf16 %v13167_v46, %v13175_v20 }
 0x557   : > { %v6622_v4 = vmax.f32 %v6611_v12, %v6612_v7  ;;  %v6502_v33 = vmax.f32 %v10093_v31, 0.0  ;;  %v9507_v2 = vpop.f32.mrb[62].mxu1  ;;  %v13207_v31 = vld [vmem:[#allocation5 + $0x32] sm:$0xff] }
 0x558   : > { %6535 = vst.msk [vmem:[#allocation4 + $0xe8] sm:$0xff] %vm3973_vm3, %v6503_v32  ;;  %v10094_v39 = vadd.f32 %v9507_v2, %v13012_v37  ;;  %v6433_v23 = vpop.f32.mrb[63].mxu1  ;;  %v13127_v19 = vld [vmem:[#allocation5 + $0x51] sm:$0xff]  ;;  %v6562_v28 = vld [vmem:[#allocation4 + $0xc0] ss:$2 sm:$0xff] }
 0x559   : > { %6631 = vst.msk [vmem:[#allocation5 + $0x61] sm:$0xff] %vm3973_vm3, %v6622_v4  ;;  %6534 = vst.msk [vmem:[#allocation4 + $0xe0] sm:$0xff] %vm3973_vm3, %v6502_v33  ;;  %v10095_v59 = vadd.f32 %v13012_v37, %v6433_v23  ;;  %v13134_v15 = vpack.i.bf16 %v13127_v19, %v13125_v34  ;;  %v6642_v42 = vld [vmem:[#allocation5 + $0x52] sm:$0x1]  ;;  %v6662_v38 = vld [vmem:[#allocation5 + $0x57] sm:$0x1] }
 0x55a   : > { %v6594_v1 = vld [vmem:[#allocation4 + $0xc1] ss:$2 sm:$0xff]  ;;  %v6505_v53 = vmax.f32 %v10094_v39, 0.0  ;;  %6652 = vst.msk [vmem:[#allocation5 + $0x50] sm:$0x1] %vm4029_vm4, %v6642_v42  ;;  %v6928_v42 = vld [vmem:[%s13526_s5 + $0x90] sm:$0xff] }
 0x55b   : > { %6672 = vst.msk [vmem:[#allocation5 + $0x59] sm:$0x1] %vm4029_vm4, %v6662_v38  ;;  %v6504_v57 = vmax.f32 %v10095_v59, 0.0  ;;  %10861 = vrot.lane.b32.xlu0 %v13134_v15, %s10994_s18  ;;  %v6613_v41 = vmax.f32 %v6562_v28, %v6594_v1  ;;  %v13169_v22 = vld [vmem:[#allocation5 + $0x40] sm:$0xff]  ;;  %v6929_v38 = vld [vmem:[%s13526_s5 + $0x98] sm:$0xff] }
 0x55c   : > { %v6564_v37 = vld [vmem:[#allocation4 + $0xd0] ss:$2 sm:$0xff]  ;;  %v6596_v8 = vld [vmem:[#allocation4 + $0xd1] ss:$2 sm:$0xff]  ;;  %6537 = vst.msk [vmem:[#allocation4 + $0xf8] sm:$0xff] %vm3973_vm3, %v6505_v53  ;;  %v10875_v0 = vpack.i.bf16 %v13169_v22, %v13177_v51  ;;  %v13203_v7 = vld [vmem:[#allocation5 + $0x42] sm:$0xff] }
 0x55d   : > { %v6614_v62 = vmax.f32 %v6564_v37, %v6596_v8  ;;  %6536 = vst.msk [vmem:[#allocation4 + $0xf0] sm:$0xff] %vm3973_vm3, %v6504_v57  ;;  %v10895_v32 = vpack.i.bf16 %v13203_v7, %v13207_v31  ;;  %v6685_v53 = vld [vmem:[#allocation5] sm:$0xff]  ;;  %v9892_v37 = vpack.c.bf16 %v6929_v38, %v6928_v42 }
 0x55e   : > { %v6930_v8 = vld [vmem:[%s13526_s5 + $0xa0] sm:$0xff] }
 0x55f   : > { %v6623_v13 = vmax.f32 %v6613_v41, %v6614_v62  ;;  %10871 = vrot.lane.b32.xlu0 %v10870_v61, %s10994_s18  ;;  %v6931_v41 = vld [vmem:[%s13526_s5 + $0xa8] sm:$0xff] }
 0x560   : > { %v6643_v10 = vld [vmem:[#allocation5 + $0x62] sm:$0x1]  ;;  %v6663_v54 = vld [vmem:[#allocation5 + $0x67] sm:$0x1]  ;;  %v9896_v62 = vpack.c.bf16 %v6931_v41, %v6930_v8  ;;  %v7113_v8 = vld [vmem:[%s13526_s5 + $0x110] sm:$0xff] }
 0x561   : > { %6632 = vst.msk [vmem:[#allocation5 + $0x71] sm:$0xff] %vm3973_vm3, %v6623_v13  ;;  %6636 = vst.msk [vmem:[#allocation5 + $0x91] sm:$0xff] %vm3973_vm3, %v6623_v13  ;;  %v6566_v35 = vld [vmem:[#allocation4 + $0xe0] ss:$2 sm:$0xff]  ;;  %v6598_v25 = vld [vmem:[#allocation4 + $0xe1] ss:$2 sm:$0xff] }
 0x562   : > { %6653 = vst.msk [vmem:[#allocation5 + $0x60] sm:$0x1] %vm4029_vm4, %v6643_v10  ;;  %6673 = vst.msk [vmem:[#allocation5 + $0x69] sm:$0x1] %vm4029_vm4, %v6663_v54  ;;  %v6615_v58 = vmax.f32 %v6566_v35, %v6598_v25  ;;  %v13153_v63 = vld [vmem:[#allocation5 + $0x50] sm:$0xff]  ;;  %v13155_v60 = vld [vmem:[#allocation5 + $0x61] sm:$0xff] }
 0x563   : > { %v13188_v21 = vld [vmem:[#allocation5 + $0x52] sm:$0xff] }
 0x564   : > { %v6568_v5 = vld [vmem:[#allocation4 + $0xf0] ss:$2 sm:$0xff]  ;;  %v6600_v50 = vld [vmem:[#allocation4 + $0xf1] ss:$2 sm:$0xff] }
 0x565   : > { %v6616_v55 = vmax.f32 %v6568_v5, %v6600_v50  ;;  %v6933_v13 = vld [vmem:[%s13526_s5 + $0xb8] sm:$0xff]  ;;  %v6934_v5 = vld [vmem:[%s13526_s5 + $0xc0] sm:$0xff]  ;;  %v6935_v50 = vld [vmem:[%s13526_s5 + $0xc8] sm:$0xff] }
 0x566   : > { %v7114_v41 = vld [vmem:[%s13526_s5 + $0x118] sm:$0xff] }
 0x567   : > { %v6624_v43 = vmax.f32 %v6615_v58, %v6616_v55  ;;  %v9904_v58 = vpack.c.bf16 %v6935_v50, %v6934_v5  ;;  %v6936_v55 = vld [vmem:[%s13526_s5 + $0xd0] sm:$0xff] }
 0x568   : > { %v13159_v44 = vld [vmem:[#allocation5 + $0x71] sm:$0xff] }
 0x569   : > { %v13157_v11 = vld [vmem:[#allocation5 + $0x60] sm:$0xff]  ;;  %v6644_v24 = vld [vmem:[#allocation5 + $0x72] sm:$0x1]  ;;  %6633 = vst.msk [vmem:[#allocation5 + $0x81] sm:$0xff] %vm3973_vm3, %v6624_v43  ;;  %v10865_v30 = vpack.i.bf16 %v13159_v44, %v13155_v60  ;;  %v6664_v14 = vld [vmem:[#allocation5 + $0x77] sm:$0x1] }
 0x56a   : > { %v10880_v9 = vpack.i.bf16 %v13157_v11, %v13153_v63  ;;  %6654 = vst.msk [vmem:[#allocation5 + $0x70] sm:$0x1] %vm4029_vm4, %v6644_v24  ;;  %6674 = vst.msk [vmem:[#allocation5 + $0x79] sm:$0x1] %vm4029_vm4, %v6664_v14  ;;  %v6646_v49 = vld [vmem:[#allocation5 + $0x92] sm:$0x1] }
 0x56b   : > { %10866 = vrot.lane.b32.xlu1 %v10865_v30, %s10994_s18  ;;  %6656 = vst.msk [vmem:[#allocation5 + $0x90] sm:$0x1] %vm4029_vm4, %v6646_v49  ;;  %v6666_v17 = vld [vmem:[#allocation5 + $0x97] sm:$0x1]  ;;  %v13184_v29 = vld [vmem:[#allocation5 + $0x62] sm:$0xff]  ;;  %v6937_v43 = vld [vmem:[%s13526_s5 + $0xd8] sm:$0xff] }
 0x56c   : > { %10881 = vrot.lane.b32.xlu0 %v10880_v9, %s10994_s18  ;;  %6676 = vst.msk [vmem:[#allocation5 + $0x99] sm:$0x1] %vm4029_vm4, %v6666_v17  ;;  %v10900_v6 = vpack.i.bf16 %v13184_v29, %v13188_v21  ;;  %v7256_v39 = vld [vmem:[#allocation5 + $0x91] sm:$0xff]  ;;  %v9908_v24 = vpack.c.bf16 %v6937_v43, %v6936_v55  ;;  %v6938_v9 = vld [vmem:[%s13526_s5 + $0xe0] sm:$0xff] }
 0x56d   : > { %v6940_v17 = vld [vmem:[%s13526_s5 + $0xf0] sm:$0xff]  ;;  %v7118_v43 = vld [vmem:[%s13526_s5 + $0x138] sm:$0xff] }
 0x56e   : > { %v7117_v55 = vld [vmem:[%s13526_s5 + $0x130] sm:$0xff] }
 0x56f   : > { %10876 = vrot.lane.b32.xlu1 %v10875_v0, %s10994_s18 }
 0x570   : > { %10891 = vrot.lane.b32.xlu0 %v10890_v47, %s10994_s18  ;;  %v6645_v52 = vld [vmem:[#allocation5 + $0x82] sm:$0x1]  ;;  %v6665_v45 = vld [vmem:[#allocation5 + $0x87] sm:$0x1]  ;;  %v6941_v47 = vld [vmem:[%s13526_s5 + $0xf8] sm:$0xff] }
 0x571   : > { %6655 = vst.msk [vmem:[#allocation5 + $0x80] sm:$0x1] %vm4029_vm4, %v6645_v52  ;;  %6675 = vst.msk [vmem:[#allocation5 + $0x89] sm:$0x1] %vm4029_vm4, %v6665_v45  ;;  %v13197_v40 = vld [vmem:[#allocation5 + $0x70] sm:$0xff]  ;;  %v13219_v2 = vld [vmem:[#allocation5 + $0x81] sm:$0xff] }
 0x572   : > { %v10925_v23 = vpack.i.bf16 %v7256_v39, %v13219_v2 }
 0x574   : > { %10901 = vrot.lane.b32.xlu0 %v10900_v6, %s10994_s18 }
 0x578   : > { %10911 = vrot.lane.b32.xlu0 %v13102_v16, %s10994_s18  ;;  %v13199_v27 = vld [vmem:[#allocation5 + $0x80] sm:$0xff]  ;;  %v13214_v16 = vld [vmem:[#allocation5 + $0x72] sm:$0xff] }
 0x579   : > { %v10885_v12 = vpack.i.bf16 %v13199_v27, %v13197_v40  ;;  %v13211_v4 = vld [vmem:[#allocation5 + $0x82] sm:$0xff] }
 0x57a   : > { %v10905_v33 = vpack.i.bf16 %v13211_v4, %v13214_v16 }
 0x57b   : > { %10886 = vrot.lane.b32.xlu1 %v10885_v12, %s10994_s18  ;;  %v9916_v12 = vpack.c.bf16 %v6941_v47, %v6940_v17  ;;  %v7119_v17 = vld [vmem:[%s13526_s5 + $0x140] sm:$0xff]  ;;  %v7120_v47 = vld [vmem:[%s13526_s5 + $0x148] sm:$0xff] }
 0x57c   : > { %10921 = vrot.lane.b32.xlu0 %v10865_v30, %s10994_s18  ;;  %v6939_v30 = vld [vmem:[%s13526_s5 + $0xe8] sm:$0xff] }
 0x57d   : > { %v9912_v14 = vpack.c.bf16 %v6939_v30, %v6938_v9  ;;  %v9932_v30 = vpack.c.bf16 %v7118_v43, %v7117_v55  ;;  %v7303_v43 = vld [vmem:[%s13526_s5 + $0x1b0] sm:$0xff] }
 0x57f   : > { %10896 = vrot.lane.b32.xlu1 %v10895_v32, %s10994_s18  ;;  %v7111_v32 = vld [vmem:[%s13526_s5 + $0x100] sm:$0xff] }
 0x583   : > { %10906 = vrot.lane.b32.xlu1 %v10905_v33, %s10994_s18  ;;  %v7112_v33 = vld [vmem:[%s13526_s5 + $0x108] sm:$0xff] }
 0x584   : > { %v9920_v39 = vpack.c.bf16 %v7112_v33, %v7111_v32  ;;  %v9936_v32 = vpack.c.bf16 %v7120_v47, %v7119_v17  ;;  %v7121_v33 = vld [vmem:[%s13526_s5 + $0x150] sm:$0xff]  ;;  %v7305_v17 = vld [vmem:[%s13526_s5 + $0x1c0] sm:$0xff]  ;;  %v7306_v47 = vld [vmem:[%s13526_s5 + $0x1c8] sm:$0xff] }
 0x587   : > { %10916 = vrot.lane.b32.xlu1 %v13134_v15, %s10994_s18 }
 0x58b   : > { %10926 = vrot.lane.b32.xlu1 %v10925_v23, %s10994_s18 }
 0x5b5   : > { %v10852_v59 = vpop.permute.xlu0 %10851 }
 0x5b6   : > { %v10854_v28 = vunpack.i.h.bf16 %v10852_v59  ;;  %v10853_v1 = vunpack.i.l.bf16 %v10852_v59 }
 0x5b8   : > { %v6733_v57 = vsel %vm3973_vm3, %v6685_v53, %v10853_v1  ;;  %v6734_v15 = vsel %vm3973_vm3, %v13143_v48, %v10854_v28  ;;  %v6932_v48 = vld [vmem:[%s13526_s5 + $0xb0] sm:$0xff] }
 0x5b9   : > { %9540 = vmatprep.mubr.f32.mxu1 %v6733_v57  ;;  %v9900_v25 = vpack.c.bf16 %v6933_v13, %v6932_v48  ;;  %v9924_v13 = vpack.c.bf16 %v7114_v41, %v7113_v8 }
 0x5ba   : > { %9541 = vmatmul.mubr.f32.vlgmr.msra.gmra.mrb[64].mxu1 %v6734_v15 }
 0x5bb   : > { %9891 = vmatpush3.bf16.msra.mxu1 %v13085_v36 }
 0x5bc   : > { %9893 = vmatprep.subr.bf16.mxu1 %v9892_v37 }
 0x5bd   : > { %v10857_v61 = vpop.permute.xlu1 %10856 }
 0x5be   : > { %v10859_v10 = vunpack.i.h.bf16 %v10857_v61  ;;  %v10858_v54 = vunpack.i.l.bf16 %v10857_v61 }
 0x5bf   : > { %9895 = vmatpush3.bf16.msra.mxu1 %v9892_v37  ;;  %v6870_v37 = vld [vmem:[#allocation5 + $0x2] sm:$0xff] }
 0x5c0   : > { %v6735_v35 = vsel %vm3973_vm3, %v13136_v56, %v10858_v54  ;;  %v6736_v36 = vsel %vm3973_vm3, %v13177_v51, %v10859_v10  ;;  %9897 = vmatprep.subr.bf16.mxu1 %v9896_v62 }
 0x5c1   : > { %9543 = vmatprep.mubr.f32.mxu1 %v6735_v35  ;;  %v7115_v35 = vld [vmem:[%s13526_s5 + $0x120] sm:$0xff] }
 0x5c2   : > { %9544 = vmatmul.mubr.f32.gmra.mrb[66].mxu1 %v6736_v36  ;;  %v7116_v36 = vld [vmem:[%s13526_s5 + $0x128] sm:$0xff] }
 0x5c3   : > { %9899 = vmatpush3.bf16.msra.mxu1 %v9896_v62  ;;  %v9928_v50 = vpack.c.bf16 %v7116_v36, %v7115_v35  ;;  %v7301_v36 = vld [vmem:[%s13526_s5 + $0x1a0] sm:$0xff] }
 0x5c4   : > { %9901 = vmatprep.subr.bf16.mxu1 %v9900_v25 }
 0x5c7   : > { %9903 = vmatpush3.bf16.msra.mxu1 %v9900_v25 }
 0x5c8   : > { %9905 = vmatprep.subr.bf16.mxu1 %v9904_v58 }
 0x5cb   : > { %9907 = vmatpush3.bf16.msra.mxu1 %v9904_v58 }
 0x5cc   : > { %9909 = vmatprep.subr.bf16.mxu1 %v9908_v24 }
 0x5cd   : > { %v10862_v49 = vpop.permute.xlu0 %10861 }
 0x5ce   : > { %v10864_v0 = vunpack.i.h.bf16 %v10862_v49  ;;  %v10863_v52 = vunpack.i.l.bf16 %v10862_v49 }
 0x5cf   : > { %9911 = vmatpush3.bf16.msra.mxu1 %v9908_v24 }
 0x5d0   : > { %v6737_v45 = vsel %vm3973_vm3, %v13169_v22, %v10863_v52  ;;  %v6738_v6 = vsel %vm3973_vm3, %v13153_v63, %v10864_v0  ;;  %9913 = vmatprep.subr.bf16.mxu1 %v9912_v14 }
 0x5d1   : > { %9546 = vmatprep.mubr.f32.mxu1 %v6737_v45  ;;  %v10872_v23 = vpop.permute.xlu0 %10871 }
 0x5d2   : > { %9547 = vmatmul.mubr.f32.gmra.mrb[68].mxu1 %v6738_v6  ;;  %v10873_v42 = vunpack.i.l.bf16 %v10872_v23  ;;  %v10874_v57 = vunpack.i.h.bf16 %v10872_v23 }
 0x5d3   : > { %9915 = vmatpush3.bf16.msra.mxu1 %v9912_v14 }
 0x5d4   : > { %9917 = vmatprep.subr.bf16.mxu1 %v9916_v12  ;;  %v6918_v61 = vsel %vm3973_vm3, %v6870_v37, %v10873_v42  ;;  %v6919_v54 = vsel %vm3973_vm3, %v13175_v20, %v10874_v57  ;;  %v7123_v42 = vld [vmem:[%s13526_s5 + $0x160] sm:$0xff] }
 0x5d5   : > { %v7297_v57 = vld [vmem:[%s13526_s5 + $0x180] sm:$0xff] }
 0x5d7   : > { %9919 = vmatpush3.bf16.msra.mxu1 %v9916_v12 }
 0x5d8   : > { %9921 = vmatprep.subr.bf16.mxu1 %v9920_v39 }
 0x5dd   : > { %v10867_v59 = vpop.permute.xlu1 %10866 }
 0x5de   : > { %v10869_v38 = vunpack.i.h.bf16 %v10867_v59  ;;  %v10868_v28 = vunpack.i.l.bf16 %v10867_v59  ;;  %v10882_v48 = vpop.permute.xlu0 %10881 }
 0x5df   : > { %v10883_v25 = vunpack.i.l.bf16 %v10882_v48  ;;  %v10884_v58 = vunpack.i.h.bf16 %v10882_v48 }
 0x5e0   : > { %v6739_v1 = vsel %vm3973_vm3, %v13157_v11, %v10868_v28  ;;  %v6740_v53 = vsel %vm3973_vm3, %v13197_v40, %v10869_v38  ;;  %v7124_v38 = vld [vmem:[%s13526_s5 + $0x168] sm:$0xff] }
 0x5e1   : > { %v10877_v15 = vpop.permute.xlu1 %10876  ;;  %9549 = vmatprep.mubr.f32.mxu1 %v6739_v1  ;;  %v6922_v24 = vsel %vm3973_vm3, %v13203_v7, %v10883_v25  ;;  %v6923_v49 = vsel %vm3973_vm3, %v13188_v21, %v10884_v58  ;;  %v9944_v28 = vpack.c.bf16 %v7124_v38, %v7123_v42  ;;  %v7125_v1 = vld [vmem:[%s13526_s5 + $0x170] sm:$0xff]  ;;  %v7302_v25 = vld [vmem:[%s13526_s5 + $0x1a8] sm:$0xff] }
 0x5e2   : > { %v10878_v62 = vunpack.i.l.bf16 %v10877_v15  ;;  %9550 = vmatmul.mubr.f32.gmra.mrb[70].mxu1 %v6740_v53  ;;  %v10879_v10 = vunpack.i.h.bf16 %v10877_v15  ;;  %v10892_v9 = vpop.permute.xlu0 %10891  ;;  %v7298_v15 = vld [vmem:[%s13526_s5 + $0x188] sm:$0xff] }
 0x5e3   : > { %9584 = vmatprep.mubr.f32.mxu1 %v6918_v61  ;;  %v10893_v0 = vunpack.i.l.bf16 %v10892_v9  ;;  %v9952_v8 = vpack.c.bf16 %v7298_v15, %v7297_v57  ;;  %v10894_v41 = vunpack.i.h.bf16 %v10892_v9  ;;  %v7300_v61 = vld [vmem:[%s13526_s5 + $0x198] sm:$0xff]  ;;  %v7435_v42 = vld [vmem:[%s13526_s5 + $0x208] sm:$0xff] }
 0x5e4   : > { %v6920_v5 = vsel %vm3973_vm3, %v13167_v46, %v10878_v62  ;;  %v6921_v20 = vsel %vm3973_vm3, %v13207_v31, %v10879_v10  ;;  %v7299_v62 = vld [vmem:[%s13526_s5 + $0x190] sm:$0xff] }
 0x5e5   : > { %v7103_v23 = vsel %vm3973_vm3, %v13067_v26, %v10893_v0  ;;  %v7126_v26 = vld [vmem:[%s13526_s5 + $0x178] sm:$0xff]  ;;  %v9956_v10 = vpack.c.bf16 %v7300_v61, %v7299_v62  ;;  %v7104_v35 = vsel %vm3973_vm3, %v13093_v18, %v10894_v41  ;;  %v7438_v62 = vld [vmem:[%s13526_s5 + $0x220] sm:$0xff]  ;;  %v7439_v61 = vld [vmem:[%s13526_s5 + $0x228] sm:$0xff] }
 0x5e6   : > { %9585 = vmatmul.mubr.f32.vlgmr.msra.gmra.mrb[64].mxu1 %v6919_v54  ;;  %v9948_v53 = vpack.c.bf16 %v7126_v26, %v7125_v1  ;;  %v7436_v26 = vld [vmem:[%s13526_s5 + $0x210] sm:$0xff] }
 0x5e7   : > { %9923 = vmatpush3.bf16.msra.mxu1 %v9920_v39  ;;  %9587 = vmatprep.mubr.f32.mxu1 %v6920_v5  ;;  %v7122_v39 = vld [vmem:[%s13526_s5 + $0x158] sm:$0xff] }
 0x5e8   : > { %9925 = vmatprep.subr.bf16.mxu1 %v9924_v13  ;;  %v9940_v59 = vpack.c.bf16 %v7122_v39, %v7121_v33  ;;  %v7311_v39 = vld [vmem:[%s13526_s5 + $0x1f0] sm:$0xff] }
 0x5ea   : > { %9588 = vmatmul.mubr.f32.gmra.mrb[66].mxu1 %v6921_v20  ;;  %v9960_v20 = vpack.c.bf16 %v7302_v25, %v7301_v36  ;;  %v7440_v36 = vld [vmem:[%s13526_s5 + $0x230] sm:$0xff]  ;;  %v7441_v25 = vld [vmem:[%s13526_s5 + $0x238] sm:$0xff] }
 0x5eb   : > { %9927 = vmatpush3.bf16.msra.mxu1 %v9924_v13  ;;  %9590 = vmatprep.mubr.f32.mxu1 %v6922_v24  ;;  %v10902_v13 = vpop.permute.xlu0 %10901  ;;  %v7304_v24 = vld [vmem:[%s13526_s5 + $0x1b8] sm:$0xff] }
 0x5ec   : > { %9929 = vmatprep.subr.bf16.mxu1 %v9928_v50  ;;  %v10903_v5 = vunpack.i.l.bf16 %v10902_v13  ;;  %v10904_v55 = vunpack.i.h.bf16 %v10902_v13 }
 0x5ed   : > { %v10887_v14 = vpop.permute.xlu1 %10886 }
 0x5ee   : > { %v10889_v52 = vunpack.i.h.bf16 %v10887_v14  ;;  %v10888_v45 = vunpack.i.l.bf16 %v10887_v14  ;;  %9591 = vmatmul.mubr.f32.gmra.mrb[68].mxu1 %v6923_v49  ;;  %v9964_v14 = vpack.c.bf16 %v7304_v24, %v7303_v43 }
 0x5ef   : > { %9931 = vmatpush3.bf16.msra.mxu1 %v9928_v50 }
 0x5f0   : > { %9933 = vmatprep.subr.bf16.mxu1 %v9932_v30  ;;  %v6924_v6 = vsel %vm3973_vm3, %v13184_v29, %v10888_v45  ;;  %v6925_v12 = vsel %vm3973_vm3, %v13214_v16, %v10889_v52  ;;  %v9968_v52 = vpack.c.bf16 %v7306_v47, %v7305_v17  ;;  %v7307_v45 = vld [vmem:[%s13526_s5 + $0x1d0] sm:$0xff] }
 0x5f1   : > { %9593 = vmatprep.mubr.f32.mxu1 %v6924_v6  ;;  %v10897_v37 = vpop.permute.xlu1 %10896  ;;  %v7308_v6 = vld [vmem:[%s13526_s5 + $0x1d8] sm:$0xff] }
 0x5f2   : > { %9594 = vmatmul.mubr.f32.gmra.mrb[70].mxu1 %v6925_v12  ;;  %v10898_v48 = vunpack.i.l.bf16 %v10897_v37  ;;  %v10899_v54 = vunpack.i.h.bf16 %v10897_v37 }
 0x5f3   : > { %9935 = vmatpush3.bf16.msra.mxu1 %v9932_v30  ;;  %9628 = vmatprep.mubr.f32.mxu1 %v7103_v23  ;;  %v10912_v30 = vpop.permute.xlu0 %10911 }
 0x5f4   : > { %9937 = vmatprep.subr.bf16.mxu1 %v9936_v32  ;;  %v7105_v50 = vsel %vm3973_vm3, %v13095_v3, %v10898_v48  ;;  %v7106_v18 = vsel %vm3973_vm3, %v13125_v34, %v10899_v54  ;;  %v7107_v3 = vsel %vm3973_vm3, %v13127_v19, %v10903_v5  ;;  %v7108_v34 = vsel %vm3973_vm3, %v13155_v60, %v10904_v55  ;;  %v7248_v55 = vld [vmem:[#allocation5 + $0x90] sm:$0xff] }
 0x5f5   : > { %v10907_v58 = vpop.permute.xlu1 %10906  ;;  %v10913_v0 = vunpack.i.l.bf16 %v10912_v30  ;;  %v10914_v1 = vunpack.i.h.bf16 %v10912_v30  ;;  %v9992_v54 = vpack.c.bf16 %v7439_v61, %v7438_v62 }
 0x5f6   : > { %v10908_v9 = vunpack.i.l.bf16 %v10907_v58  ;;  %v10909_v49 = vunpack.i.h.bf16 %v10907_v58 }
 0x5f7   : > { %9939 = vmatpush3.bf16.msra.mxu1 %v9936_v32  ;;  %v7289_v12 = vsel %vm3973_vm3, %v13136_v56, %v10913_v0  ;;  %v7310_v32 = vld [vmem:[%s13526_s5 + $0x1e8] sm:$0xff]  ;;  %v7312_v56 = vld [vmem:[%s13526_s5 + $0x1f8] sm:$0xff]  ;;  %v10922_v15 = vpop.permute.xlu0 %10921  ;;  %v7290_v41 = vsel %vm3973_vm3, %v13177_v51, %v10914_v1 }
 0x5f8   : > { %9941 = vmatprep.subr.bf16.mxu1 %v9940_v59  ;;  %v7109_v19 = vsel %vm3973_vm3, %v13159_v44, %v10908_v9  ;;  %v7110_v60 = vsel %vm3973_vm3, %v13219_v2, %v10909_v49  ;;  %v9972_v44 = vpack.c.bf16 %v7308_v6, %v7307_v45  ;;  %v7309_v2 = vld [vmem:[%s13526_s5 + $0x1e0] sm:$0xff]  ;;  %v9980_v23 = vpack.c.bf16 %v7312_v56, %v7311_v39 }
 0x5f9   : > { %v9976_v33 = vpack.c.bf16 %v7310_v32, %v7309_v2  ;;  %v10917_v38 = vpop.permute.xlu1 %10916  ;;  %v10923_v48 = vunpack.i.l.bf16 %v10922_v15 }
 0x5fa   : > { %v10918_v57 = vunpack.i.l.bf16 %v10917_v38 }
 0x5fb   : > { %9943 = vmatpush3.bf16.msra.mxu1 %v9940_v59  ;;  %v7434_v59 = vld [vmem:[%s13526_s5 + $0x200] sm:$0xff] }
 0x5fc   : > { %9945 = vmatprep.subr.bf16.mxu1 %v9944_v28  ;;  %v7291_v13 = vsel %vm3973_vm3, %v13169_v22, %v10918_v57  ;;  %v7293_v22 = vsel %vm3973_vm3, %v13157_v11, %v10923_v48 }
 0x5ff   : > { %9947 = vmatpush3.bf16.msra.mxu1 %v9944_v28  ;;  %v9984_v28 = vpack.c.bf16 %v7435_v42, %v7434_v59 }
 0x600   : > { %9949 = vmatprep.subr.bf16.mxu1 %v9948_v53 }
 0x603   : > { %9951 = vmatpush3.bf16.msra.mxu1 %v9948_v53  ;;  %v7437_v53 = vld [vmem:[%s13526_s5 + $0x218] sm:$0xff] }
 0x604   : > { %9953 = vmatprep.subr.bf16.mxu1 %v9952_v8  ;;  %v9988_v37 = vpack.c.bf16 %v7437_v53, %v7436_v26 }
 0x606   : > { %9629 = vmatmul.mubr.f32.vlgmr.msra.gmra.mrb[64].mxu1 %v7104_v35  ;;  %v10924_v35 = vunpack.i.h.bf16 %v10922_v15 }
 0x607   : > { %9631 = vmatprep.mubr.f32.mxu1 %v7105_v50  ;;  %9955 = vmatpush3.bf16.msra.mxu1 %v9952_v8  ;;  %v10919_v8 = vunpack.i.h.bf16 %v10917_v38  ;;  %v9996_v50 = vpack.c.bf16 %v7441_v25, %v7440_v36 }
 0x608   : > { %9957 = vmatprep.subr.bf16.mxu1 %v9956_v10 }
 0x609   : > { %v7292_v51 = vsel %vm3973_vm3, %v13153_v63, %v10919_v8  ;;  %v7294_v63 = vsel %vm3973_vm3, %v13197_v40, %v10924_v35  ;;  %v7433_v40 = vld [vmem:[#allocation5 + $0x92] sm:$0xff] }
 0x60a   : > { %9632 = vmatmul.mubr.f32.gmra.mrb[66].mxu1 %v7106_v18 }
 0x60b   : > { %9634 = vmatprep.mubr.f32.mxu1 %v7107_v3  ;;  %9959 = vmatpush3.bf16.msra.mxu1 %v9956_v10  ;;  %v10927_v10 = vpop.permute.xlu1 %10926 }
 0x60c   : > { %9961 = vmatprep.subr.bf16.mxu1 %v9960_v20  ;;  %v10928_v5 = vunpack.i.l.bf16 %v10927_v10  ;;  %v10929_v58 = vunpack.i.h.bf16 %v10927_v10 }
 0x60e   : > { %9635 = vmatmul.mubr.f32.gmra.mrb[68].mxu1 %v7108_v34  ;;  %v7296_v11 = vsel %vm3973_vm3, %v7248_v55, %v10929_v58 }
 0x60f   : > { %9637 = vmatprep.mubr.f32.mxu1 %v7109_v19  ;;  %9963 = vmatpush3.bf16.msra.mxu1 %v9960_v20  ;;  %v7295_v20 = vsel %vm3973_vm3, %v13199_v27, %v10928_v5 }
 0x610   : > { %9965 = vmatprep.subr.bf16.mxu1 %v9964_v14 }
 0x612   : > { %9638 = vmatmul.mubr.f32.gmra.mrb[70].mxu1 %v7110_v60 }
 0x613   : > { %9967 = vmatpush3.bf16.msra.mxu1 %v9964_v14  ;;  %9672 = vmatprep.mubr.f32.mxu1 %v7289_v12 }
 0x614   : > { %9969 = vmatprep.subr.bf16.mxu1 %v9968_v52 }
 0x617   : > { %9971 = vmatpush3.bf16.msra.mxu1 %v9968_v52 }
 0x618   : > { %9973 = vmatprep.subr.bf16.mxu1 %v9972_v44 }
 0x61b   : > { %9975 = vmatpush3.bf16.msra.mxu1 %v9972_v44 }
 0x61c   : > { %9977 = vmatprep.subr.bf16.mxu1 %v9976_v33 }
 0x61f   : > { %9979 = vmatpush3.bf16.msra.mxu1 %v9976_v33 }
 0x620   : > { %9981 = vmatprep.subr.bf16.mxu1 %v9980_v23 }
 0x623   : > { %9983 = vmatpush3.bf16.msra.mxu1 %v9980_v23 }
 0x624   : > { %9985 = vmatprep.subr.bf16.mxu1 %v9984_v28 }
 0x626   : > { %9673 = vmatmul.mubr.f32.vlgmr.msra.gmra.mrb[64].mxu1 %v7290_v41 }
 0x627   : > { %9675 = vmatprep.mubr.f32.mxu1 %v7291_v13  ;;  %9987 = vmatpush3.bf16.msra.mxu1 %v9984_v28 }
 0x628   : > { %9989 = vmatprep.subr.bf16.mxu1 %v9988_v37 }
 0x62a   : > { %9676 = vmatmul.mubr.f32.gmra.mrb[66].mxu1 %v7292_v51 }
 0x62b   : > { %9678 = vmatprep.mubr.f32.mxu1 %v7293_v22  ;;  %9991 = vmatpush3.bf16.msra.mxu1 %v9988_v37 }
 0x62c   : > { %9993 = vmatprep.subr.bf16.mxu1 %v9992_v54 }
 0x62e   : > { %9679 = vmatmul.mubr.f32.gmra.mrb[68].mxu1 %v7294_v63 }
 0x62f   : > { %9681 = vmatprep.mubr.f32.mxu1 %v7295_v20  ;;  %9995 = vmatpush3.bf16.msra.mxu1 %v9992_v54 }
 0x630   : > { %9997 = vmatprep.subr.bf16.mxu1 %v9996_v50 }
 0x632   : > { %9682 = vmatmul.mubr.f32.gmra.mrb[70].mxu1 %v7296_v11 }
 0x633   : > { %9999 = vmatpush3.bf16.msra.mxu1 %v9996_v50  ;;  %9700 = vmatprep.mubr.msk.f32.mxu1 %vm3973_vm3, %v13167_v46  ;;  %v8017_v46 = vld [vmem:[%s13527_s6] ss:$0 sm:$0xff] }
 0x636   : > { %9701 = vmatmul.mubr.msk.f32.vlgmr.msra.gmra.mrb[64].mxu1 %vm3973_vm3, %v13207_v31 }
 0x637   : > { %9703 = vmatprep.mubr.msk.f32.mxu1 %vm3973_vm3, %v13203_v7 }
 0x63a   : > { %9704 = vmatmul.mubr.msk.f32.gmra.mrb[66].mxu1 %vm3973_vm3, %v13188_v21 }
 0x63b   : > { %9706 = vmatprep.mubr.msk.f32.mxu1 %vm3973_vm3, %v13184_v29 }
 0x63e   : > { %9707 = vmatmul.mubr.msk.f32.gmra.mrb[68].mxu1 %vm3973_vm3, %v13214_v16 }
 0x63f   : > { %9709 = vmatprep.mubr.msk.f32.mxu1 %vm3973_vm3, %v13211_v4 }
 0x642   : > { %9710 = vmatmul.mubr.msk.f32.gmra.mrb[70].mxu1 %vm3973_vm3, %v7433_v40 }
 0x709   : > { %v9702_v21 = vpop.f32.mrb[64].mxu1 }
 0x70a   : > { %v10096_v27 = vadd.f32 %v9702_v21, %v8017_v46  ;;  %v7532_v7 = vpop.f32.mrb[65].mxu1 }
 0x70b   : > { %v10097_v29 = vadd.f32 %v8017_v46, %v7532_v7 }
 0x70c   : > { %v7580_v31 = vmax.f32 %v10096_v27, 0.0 }
 0x70d   : > { %v7579_v18 = vmax.f32 %v10097_v29, 0.0  ;;  %v9705_v16 = vpop.f32.mrb[66].mxu1 }
 0x70e   : > { %7588 = vst [vmem:[%s271_s22 + $0x8] sm:$0xff] %v7580_v31  ;;  %v10098_v4 = vadd.f32 %v9705_v16, %v8017_v46  ;;  %v7542_v43 = vpop.f32.mrb[67].mxu1 }
 0x70f   : > { %7587 = vst [vmem:[%s271_s22] sm:$0xff] %v7579_v18  ;;  %v10099_v24 = vadd.f32 %v8017_v46, %v7542_v43 }
 0x710   : > { %v7582_v9 = vmax.f32 %v10098_v4, 0.0 }
 0x711   : > { %v7581_v3 = vmax.f32 %v10099_v24, 0.0  ;;  %v9708_v30 = vpop.f32.mrb[68].mxu1 }
 0x712   : > { %7590 = vst [vmem:[%s271_s22 + $0x18] sm:$0xff] %v7582_v9  ;;  %v10100_v14 = vadd.f32 %v9708_v30, %v8017_v46  ;;  %v7552_v49 = vpop.f32.mrb[69].mxu1 }
 0x713   : > { %7589 = vst [vmem:[%s271_s22 + $0x10] sm:$0xff] %v7581_v3  ;;  %v10101_v34 = vadd.f32 %v8017_v46, %v7552_v49 }
 0x714   : > { %v7584_v17 = vmax.f32 %v10100_v14, 0.0 }
 0x715   : > { %v7583_v47 = vmax.f32 %v10101_v34, 0.0  ;;  %v9711_v0 = vpop.f32.mrb[70].mxu1 }
 0x716   : > { %7592 = vst [vmem:[%s271_s22 + $0x28] sm:$0xff] %v7584_v17  ;;  %v10102_v19 = vadd.f32 %v9711_v0, %v8017_v46  ;;  %v7562_v52 = vpop.f32.mrb[71].mxu1 }
 0x717   : > { %7591 = vst [vmem:[%s271_s22 + $0x20] sm:$0xff] %v7583_v47  ;;  %v10103_v60 = vadd.f32 %v8017_v46, %v7562_v52 }
 0x718   : > { %v7586_v45 = vmax.f32 %v10102_v19, 0.0 }
 0x719   : > { %v7585_v6 = vmax.f32 %v10103_v60, 0.0 }
 0x71a   : > { %7594 = vst [vmem:[%s271_s22 + $0x38] sm:$0xff] %v7586_v45 }
 0x71b   : > { %7593 = vst [vmem:[%s271_s22 + $0x30] sm:$0xff] %v7585_v6 }
 0x71c   : > { %10943 = shalt.err (!%p10940_p3)
}
 0x71d   : > { %s10944_s17 = scalar_lea.hbm %s13474_s9, 1024  ;;  %s10948_s21 = scalar_lea.hbm %s13528_s7, 2048 }
 0x71e   : > { %p10945_p4 = scmp.ne.s32.totalorder %s13474_s9, %s10944_s17  ;;  %p10949_p9 = scmp.lt.u32.totalorder %s13474_s9, %s13528_s7 }
 0x71f   : > { %p10950_p10 = scmp.lt.u32.totalorder %s10948_s21, %s10944_s17  ;;  %p10952_p12 = scmp.lt.u32.totalorder %s10944_s17, %s13474_s9 }
 0x720   : > { %p10946_p7 = pnand %p10945_p4, %p11076_p5 }
 0x721   : > { %p10951_p11 = por %p10950_p10, %p10949_p9 }
 0x722   : > { %p10947_p8 = pneg %p10946_p7 }
 0x723   : > { %p10953_p13 = por %p10952_p12, %p10951_p11 }
 0x725   : > { %p10954_p0 = pnand %p10953_p13, %p10947_p8 }
 0x727   : > { %10957 = shalt.err (!%p10954_p0)
}
 0x728   : > { %s10996_s8 = smov 128   ;;  %s10997_s18 = smov 8  }
 0x729   : > { %10488 = dma.vmem_to_hbm [thread:$0]  (%p11076_p5), %s13476_s29, 1024, %s13474_s9, %s13480_s28, %s10996_s8, %s10996_s8, %s10997_s18  }
 0x72a PF: > { %p10494_p1 = scmp.ge.s32.totalorder %s10992_s27, 2  ;;  %s7624_s13 = sand.u32 1, %s10980_s24  }
 0x72b   : > { %s7625_s14 = scalar_lea.sflag [#allocation7], %s7624_s13 }
 0x72c   : > { %p10491_p2 = pnand %p10494_p1, %p11080_p6 }
 0x72e   : > { %10975 = dma.done.wait (!%p10491_p2), %s7625_s14, 1024  }
 0x72f   : > { %10977 = vsyncadd (!%p10491_p2), %s7625_s14, 4294966272  ;;  %p17_p3 = scmp.ge.s32.totalorder %s11063_s30, 4   ;;  %s13739_s24 = smov %s10984_s25 }
 0x730   : > { %s13740_s25 = smov %s10988_s26  ;;  %s13741_s26 = smov %s11074_s10 }
 0x731   : > { %s13742_s27 = smov %s11063_s30  ;;  %19 = sbr.rel (!%p17_p3) target bundleno = 3 (0x3), region = 131 }
 0x738   :  { %7630 = vsyncpa [#allocation7], 1 }
 0x739   :  { %7632 = vsyncpa [#allocation7 + $0x1], 1 }

</bundles_post_ra>
